<compile_context>
chip_gen: v7x
topology: tpu7x:2x2x1
jax: 0.10.0
libtpu: 0.0.40
codegen_flags: <defaults>
</compile_context>

<pallas_src>
import functools

import jax
import jax.numpy as jnp
from jax.experimental import pallas as pl
from jax.experimental.pallas import tpu as pltpu


# ------------------------- generation-aware config -------------------------

def _tpu_info():
    try:
        return pltpu.get_tpu_info()
    except Exception:
        return None


def _vmem_limit_bytes():
    phys = None
    info = _tpu_info()
    if info is not None:
        try:
            phys = int(info.vmem_capacity_bytes)
        except Exception:
            phys = None
    if phys is None:
        phys = 64 * 1024 * 1024              # conservative (v7x per-TC VMEM)
    # ~3/4 of physical: ~96 MiB on v5e/v6e (128 MiB), ~48 MiB on v7x (64 MiB).
    return max(32 * 1024 * 1024, (phys * 3) // 4)


def _num_tensorcores():
    info = _tpu_info()
    if info is None:
        return 1
    for name in ("num_cores", "core_count", "num_tensorcores", "tensorcore_count"):
        v = getattr(info, name, None)
        if isinstance(v, int) and v > 0:
            return v
    try:
        # Heuristic: v7x exposes 64 MiB of VMEM per TensorCore and has 2 TCs.
        return 2 if int(info.vmem_capacity_bytes) <= 64 * 1024 * 1024 else 1
    except Exception:
        return 1


_VMEM_LIMIT = _vmem_limit_bytes()
_NUM_TC = _num_tensorcores()


def _mosaic_params():
    return pltpu.CompilerParams(
        dimension_semantics=("parallel",),
        vmem_limit_bytes=_VMEM_LIMIT,
    )


def _choose_tm(M, cap=1024):
    """Largest multiple-of-8 divisor of M (capped).  Only split into >=2 grid
    steps when the chip actually has more than one TensorCore (v7x); on
    single-TC v5e/v6e the extra step is pure per-step overhead."""
    best = None
    d = 8
    while d <= min(cap, M):
        if M % d == 0:
            best = d
        d += 8
    if best is None:
        return M                      # not a multiple of 8: one full block
    if _NUM_TC > 1 and M // best < 2 and best % 16 == 0:
        best //= 2
    return best


def _swap01(x):
    """(A, B, C) -> (B, A, C), keeping the lane (last) dim in place."""
    try:
        return pltpu.einshape("abc->bac", x)
    except Exception:
        return jnp.transpose(x, (1, 0, 2))


# ----------------------------- Pallas kernels ------------------------------

def _cswin_attn_block_kernel(x_ref, g_ref, b_ref, wq0_ref, bq0_ref, wq1_ref,
                             bq1_ref, wp0_ref, wp1_ref, bp_ref, o_ref,
                             *, heads, split, scale, eps):
    """Fused LN1 + qkv + CSWin window attention (both branches, gather done in
    VMEM) + output projection + residual, one batch image per grid step."""
    _, H, W, C = o_ref.shape
    Ch = C // 2
    hd = Ch // heads
    L = H * W

    # ---- LayerNorm1 (f32 statistics) + branch-grouped qkv projections ----
    xin = x_ref[0].astype(jnp.float32).reshape(L, C)
    mu = jnp.mean(xin, axis=-1, keepdims=True)
    var = jnp.mean(jnp.square(xin - mu), axis=-1, keepdims=True)
    xn = (xin - mu) * jax.lax.rsqrt(var + eps)
    xn = xn * g_ref[...].astype(jnp.float32) + b_ref[...].astype(jnp.float32)
    xb = xn.astype(jnp.bfloat16)
    qkv0 = jnp.dot(xb, wq0_ref[...].astype(jnp.bfloat16),
                   preferred_element_type=jnp.float32) + bq0_ref[...].astype(jnp.float32)
    qkv1 = jnp.dot(xb, wq1_ref[...].astype(jnp.bfloat16),
                   preferred_element_type=jnp.float32) + bq1_ref[...].astype(jnp.float32)

    def branch_attn(xw):
        # xw: (nW, T, 3*Ch) f32 windowed qkv.  Heads are separated with lane
        # masks + full-width MXU matmuls (no 8-wide lane slices / lane concat);
        # windows form a single batch dimension for the dot_general.
        nW, T, _ = xw.shape
        q = xw[:, :, :Ch] * scale
        k = xw[:, :, Ch:2 * Ch].astype(jnp.bfloat16)
        v = xw[:, :, 2 * Ch:].astype(jnp.bfloat16)
        lane = jax.lax.broadcasted_iota(jnp.int32, (1, 1, Ch), 2)
        out = jnp.zeros((nW, T, Ch), jnp.float32)
        for h in range(heads):
            hmask = jnp.logical_and(lane >= h * hd, lane < (h + 1) * hd)
            qh = jnp.where(hmask, q, 0.0).astype(jnp.bfloat16)
            s = jnp.einsum("wtd,wsd->wts", qh, k,
                           preferred_element_type=jnp.float32)
            s = s - jnp.max(s, axis=-1, keepdims=True)
            p = jnp.exp(s)
            p = p * pl.reciprocal(jnp.sum(p, axis=-1, keepdims=True), approx=True)
            oh = jnp.einsum("wts,wsd->wtd", p.astype(jnp.bfloat16), v,
                            preferred_element_type=jnp.float32)
            out = out + jnp.where(hmask, oh, 0.0)
        return out

    # ---- branch 0: vertical stripes (H_sp = H, W_sp = split) ----
    nw0 = W // split
    x0 = _swap01(qkv0.reshape(H, W, 3 * Ch))            # (W, H, 3Ch)
    x0 = x0.reshape(nw0, split * H, 3 * Ch)             # windows along W
    a0 = branch_attn(x0)
    a0 = _swap01(a0.reshape(W, H, Ch)).reshape(L, Ch)   # back to image order

    # ---- branch 1: horizontal stripes (H_sp = split, W_sp = W) ----
    nw1 = H // split
    a1 = branch_attn(qkv1.reshape(nw1, split * W, 3 * Ch)).reshape(L, Ch)

    # ---- fused projection (row-split proj weight, no lane concat) + residual
    y = jnp.dot(a0.astype(jnp.bfloat16), wp0_ref[...].astype(jnp.bfloat16),
                preferred_element_type=jnp.float32)
    y = y + jnp.dot(a1.astype(jnp.bfloat16), wp1_ref[...].astype(jnp.bfloat16),
                    preferred_element_type=jnp.float32)
    y = y + bp_ref[...].astype(jnp.float32) + xin
    o_ref[0] = y.reshape(H, W, C).astype(o_ref.dtype)


def cswin_attention_block(x_img, norm_g, norm_b, wq0, bq0, wq1, bq1,
                          proj_w, proj_b, heads, split):
    # x_img: (B, H, W, C); one grid step per batch image.
    B, H, W, C = x_img.shape
    Ch = C // 2
    hd = Ch // heads
    scale = float(hd) ** -0.5
    wp0 = proj_w[:Ch, :]
    wp1 = proj_w[Ch:, :]
    img = lambda i: (i, 0, 0, 0)
    c2 = lambda i: (0, 0)
    # TODO(synk): mark the constant weight/bias blocks with
    # pipeline_mode=pl.Buffered(1) once single-buffered pipeline_mode is
    # verified on this Pallas version (they never change across grid steps).
    return pl.pallas_call(
        functools.partial(_cswin_attn_block_kernel, heads=heads, split=split,
                          scale=scale, eps=1e-5),
        out_shape=jax.ShapeDtypeStruct((B, H, W, C), jnp.bfloat16),
        grid=(B,),
        in_specs=[
            pl.BlockSpec((1, H, W, C), img),
            pl.BlockSpec((1, C), c2),
            pl.BlockSpec((1, C), c2),
            pl.BlockSpec((C, 3 * Ch), c2),
            pl.BlockSpec((1, 3 * Ch), c2),
            pl.BlockSpec((C, 3 * Ch), c2),
            pl.BlockSpec((1, 3 * Ch), c2),
            pl.BlockSpec((Ch, C), c2),
            pl.BlockSpec((Ch, C), c2),
            pl.BlockSpec((1, C), c2),
        ],
        out_specs=pl.BlockSpec((1, H, W, C), img),
        compiler_params=_mosaic_params(),
    )(x_img, norm_g.reshape(1, C), norm_b.reshape(1, C),
      wq0, bq0.reshape(1, 3 * Ch), wq1, bq1.reshape(1, 3 * Ch),
      wp0, wp1, proj_b.reshape(1, C))


def _ln_linear_kernel(x_ref, g_ref, b_ref, w_ref, bias_ref, o_ref, *, eps):
    # Fused LayerNorm (f32 stats) + matmul (bf16 operands, f32 acc) + bias.
    x = x_ref[...].astype(jnp.float32)
    mu = jnp.mean(x, axis=-1, keepdims=True)
    var = jnp.mean(jnp.square(x - mu), axis=-1, keepdims=True)
    xn = (x - mu) * jax.lax.rsqrt(var + eps)
    xn = xn * g_ref[...].astype(jnp.float32) + b_ref[...].astype(jnp.float32)
    y = jnp.dot(xn.astype(jnp.bfloat16), w_ref[...].astype(jnp.bfloat16),
                preferred_element_type=jnp.float32)
    o_ref[...] = (y + bias_ref[...].astype(jnp.float32)).astype(o_ref.dtype)


def ln_linear(x, g, b, w, bias, eps=1e-5, out_dtype=jnp.bfloat16):
    M, K = x.shape
    N = w.shape[1]
    TM = _choose_tm(M)
    return pl.pallas_call(
        functools.partial(_ln_linear_kernel, eps=eps),
        out_shape=jax.ShapeDtypeStruct((M, N), out_dtype),
        grid=(pl.cdiv(M, TM),),
        in_specs=[
            pl.BlockSpec((TM, K), lambda i: (i, 0)),
            pl.BlockSpec((1, K), lambda i: (0, 0)),
            pl.BlockSpec((1, K), lambda i: (0, 0)),
            pl.BlockSpec((K, N), lambda i: (0, 0)),
            pl.BlockSpec((1, N), lambda i: (0, 0)),
        ],
        out_specs=pl.BlockSpec((TM, N), lambda i: (i, 0)),
        compiler_params=_mosaic_params(),
    )(x, g.reshape(1, K), b.reshape(1, K), w, bias.reshape(1, N))


def _linear_res_kernel(x_ref, w_ref, b_ref, r_ref, o_ref):
    # Fused matmul (bf16 operands, f32 acc) + bias + residual add.
    y = jnp.dot(x_ref[...].astype(jnp.bfloat16), w_ref[...].astype(jnp.bfloat16),
                preferred_element_type=jnp.float32)
    y = y + b_ref[...].astype(jnp.float32) + r_ref[...].astype(jnp.float32)
    o_ref[...] = y.astype(o_ref.dtype)


def linear_residual(x, w, b, res, out_dtype=jnp.bfloat16):
    M, K = x.shape
    N = w.shape[1]
    TM = _choose_tm(M)
    return pl.pallas_call(
        _linear_res_kernel,
        out_shape=jax.ShapeDtypeStruct((M, N), out_dtype),
        grid=(pl.cdiv(M, TM),),
        in_specs=[
            pl.BlockSpec((TM, K), lambda i: (i, 0)),
            pl.BlockSpec((K, N), lambda i: (0, 0)),
            pl.BlockSpec((1, N), lambda i: (0, 0)),
            pl.BlockSpec((TM, N), lambda i: (i, 0)),
        ],
        out_specs=pl.BlockSpec((TM, N), lambda i: (i, 0)),
        compiler_params=_mosaic_params(),
    )(x, w, b.reshape(1, N), res)


def _dwconv_kernel(x_ref, w_ref, b_ref, o_ref, xp_ref, *, act):
    # Depthwise 3x3.  Zero padding is done in a VMEM scratch (no HBM pad pass).
    _, H, W, C = o_ref.shape
    xp_ref[...] = jnp.zeros_like(xp_ref)
    xp_ref[1:H + 1, 1:W + 1, :] = x_ref[0].astype(xp_ref.dtype)
    w = w_ref[...].astype(jnp.float32)
    acc = jnp.zeros((H, W, C), jnp.float32)
    for dy in range(3):
        for dx in range(3):
            acc = acc + xp_ref[dy:dy + H, dx:dx + W, :] * w[dy, dx, :]
    acc = acc + b_ref[...].astype(jnp.float32)
    if act == "sigmoid_gate":          # PA module: x * sigmoid(dwconv(x))
        acc = x_ref[0].astype(jnp.float32) * jax.nn.sigmoid(acc)
    o_ref[0] = acc.astype(o_ref.dtype)


def depthwise3x3(x, w, b, act="none", out_dtype=None):
    # x: (B, H, W, C), w: (3, 3, C), b: (C,)
    B, H, W, C = x.shape
    out_dtype = x.dtype if out_dtype is None else out_dtype
    return pl.pallas_call(
        functools.partial(_dwconv_kernel, act=act),
        out_shape=jax.ShapeDtypeStruct((B, H, W, C), out_dtype),
        grid=(B,),
        in_specs=[
            pl.BlockSpec((1, H, W, C), lambda i: (i, 0, 0, 0)),
            pl.BlockSpec((3, 3, C), lambda i: (0, 0, 0)),
            pl.BlockSpec((1, C), lambda i: (0, 0)),
        ],
        out_specs=pl.BlockSpec((1, H, W, C), lambda i: (i, 0, 0, 0)),
        scratch_shapes=[pltpu.VMEM((H + 2, W + 2, C), jnp.float32)],
        compiler_params=_mosaic_params(),
    )(x, w, b.reshape(1, C))


def _conv3x3_res_kernel(x_ref, w_ref, b_ref, r_ref, o_ref, xp_ref):
    # Dense 3x3 conv as 9 shifted MXU matmuls accumulated in f32, fused with
    # bias + long-skip residual.  No HBM im2col, one input read per image.
    _, H, W, Cin = x_ref.shape
    Cout = o_ref.shape[-1]
    xp_ref[...] = jnp.zeros_like(xp_ref)
    xp_ref[1:H + 1, 1:W + 1, :] = x_ref[0].astype(xp_ref.dtype)
    acc = jnp.zeros((H * W, Cout), jnp.float32)
    for dy in range(3):
        for dx in range(3):
            tap = xp_ref[dy:dy + H, dx:dx + W, :].astype(jnp.bfloat16)
            acc = acc + jnp.dot(tap.reshape(H * W, Cin),
                                w_ref[3 * dy + dx].astype(jnp.bfloat16),
                                preferred_element_type=jnp.float32)
    acc = acc + b_ref[...].astype(jnp.float32)
    acc = acc + r_ref[0].astype(jnp.float32).reshape(H * W, Cout)
    o_ref[0] = acc.reshape(H, W, Cout).astype(o_ref.dtype)


def conv3x3_residual(x, w, b, res):
    # x: (B, H, W, Cin) activations; w: (3, 3, Cin, Cout); res: (B, H, W, Cout)
    B, H, W, Cin = x.shape
    Cout = w.shape[-1]
    w9 = w.reshape(9, Cin, Cout)           # (dy, dx) major tap order
    return pl.pallas_call(
        _conv3x3_res_kernel,
        out_shape=jax.ShapeDtypeStruct((B, H, W, Cout), res.dtype),
        grid=(B,),
        in_specs=[
            pl.BlockSpec((1, H, W, Cin), lambda i: (i, 0, 0, 0)),
            pl.BlockSpec((9, Cin, Cout), lambda i: (0, 0, 0)),
            pl.BlockSpec((1, Cout), lambda i: (0, 0)),
            pl.BlockSpec((1, H, W, Cout), lambda i: (i, 0, 0, 0)),
        ],
        out_specs=pl.BlockSpec((1, H, W, Cout), lambda i: (i, 0, 0, 0)),
        scratch_shapes=[pltpu.VMEM((H + 2, W + 2, Cin), jnp.float32)],
        compiler_params=_mosaic_params(),
    )(x, w9, b.reshape(1, Cout), res)


# ------------------------------- model glue --------------------------------

def _gelu_exact(x):
    # torch nn.GELU default (exact erf form).
    # TODO(synk): fuse into the producing kernels once erf lowering in Mosaic
    # is verified; kept as a bf16 XLA elementwise op between kernels.
    return jax.nn.gelu(x, approximate=False)


def cswin_block(x, p, H, W, split_size, num_heads):
    B, L, C = x.shape
    Ch = C // 2
    h2 = num_heads // 2

    # Branch-grouped qkv weights: output columns ordered [q | k | v] per branch
    # so each branch gets its own lane-dense qkv tensor (no concat in kernels).
    qw, qb = p["qkv_w"], p["qkv_b"]
    wq0 = jnp.concatenate([qw[:, :Ch], qw[:, C:C + Ch], qw[:, 2 * C:2 * C + Ch]], axis=1)
    wq1 = jnp.concatenate([qw[:, Ch:C], qw[:, C + Ch:2 * C], qw[:, 2 * C + Ch:]], axis=1)
    bq0 = jnp.concatenate([qb[:Ch], qb[C:C + Ch], qb[2 * C:2 * C + Ch]])
    bq1 = jnp.concatenate([qb[Ch:C], qb[C + Ch:2 * C], qb[2 * C + Ch:]])
    # NOTE: LePEAttention.get_v (LePE conv) exists in __init__ but is unused in
    # the reference forward, so it is intentionally omitted.

    # Fused LN1 + qkv + CSWin window attention (both branches) + proj + residual.
    x = cswin_attention_block(x.reshape(B, H, W, C), p["norm1_g"], p["norm1_b"],
                              wq0, bq0, wq1, bq1, p["proj_w"], p["proj_b"],
                              h2, split_size)
    x2d = x.reshape(B * L, C)

    # LeFF: fused LN2+linear1, GELU, depthwise 3x3, GELU, fused linear2+residual.
    y = ln_linear(x2d, p["norm2_g"], p["norm2_b"], p["l1_w"], p["l1_b"])
    y = _gelu_exact(y)
    hidden = y.shape[-1]
    y = depthwise3x3(y.reshape(B, H, W, hidden), p["dw_w"], p["dw_b"])
    y = _gelu_exact(y.reshape(B * L, hidden))
    x2d = linear_residual(y, p["l2_w"], p["l2_b"], x2d)
    return x2d.reshape(B, L, C)


def rstb_forward(x_nhwc, p, split_size, num_heads):
    B, H, W, C = x_nhwc.shape
    x1 = x_nhwc                                              # f32 long-skip
    # PatchEmbed: PA gate (x * sigmoid(dwconv3x3(x))); tokens carried in bf16.
    x = depthwise3x3(x_nhwc, p["pa_w"], p["pa_b"], act="sigmoid_gate",
                     out_dtype=jnp.bfloat16)
    x = x.reshape(B, H * W, C)
    for bp in p["blocks"]:
        x = cswin_block(x, bp, H, W, split_size, num_heads)
    # PatchUnEmbed -> dense conv3x3 + long-skip residual (is_spa=True path).
    return conv3x3_residual(x.reshape(B, H, W, C), p["conv_w"], p["conv_b"], x1)


@functools.partial(jax.jit, static_argnums=(2, 3))
def cswinir_forward(x, params, split_size, num_heads):
    # x: (b, c, a, H, W) float32, transtype=1, is_spa=True.
    b, c, a, H, W = x.shape
    # check_image_size (transtype == 1)
    x = jnp.transpose(x, (0, 2, 1, 3, 4)).reshape(b * a, c, H, W)
    mod_h = (split_size - H % split_size) % split_size
    mod_w = (split_size - W % split_size) % split_size
    if mod_h or mod_w:
        x = jnp.pad(x, ((0, 0), (0, 0), (0, mod_h), (0, mod_w)), mode="reflect")
    # forward_features (pos_drop is identity at drop_rate=0)
    x_nhwc = jnp.transpose(x, (0, 2, 3, 1))
    out = rstb_forward(x_nhwc, params, split_size, num_heads)
    out = jnp.transpose(out, (0, 3, 1, 2))
    out = out[:, :, :H, :W]
    out = out.reshape(b, a, c, H, W).transpose(0, 2, 1, 3, 4)
    return out


# --------------------------- parameter creation -----------------------------

def init_params(key, C, depth, mlp_ratio):
    hidden = int(C * mlp_ratio)
    keys = iter(jax.random.split(key, 64))

    def nrm(shape, std=0.02):
        return jax.random.normal(next(keys), shape, jnp.float32) * std

    params = {
        "pa_w": nrm((3, 3, C), 0.1),          # PatchEmbed.pos depthwise conv
        "pa_b": nrm((C,), 0.01),
        "conv_w": nrm((3, 3, C, C), 0.05),    # RSTB tail conv (HWIO)
        "conv_b": nrm((C,), 0.01),
        "blocks": [],
    }
    for _ in range(depth):
        params["blocks"].append({
            "norm1_g": jnp.ones((C,), jnp.float32),
            "norm1_b": jnp.zeros((C,), jnp.float32),
            "qkv_w": nrm((C, 3 * C)),
            "qkv_b": nrm((3 * C,), 0.01),
            "proj_w": nrm((C, C)),
            "proj_b": nrm((C,), 0.01),
            "norm2_g": jnp.ones((C,), jnp.float32),
            "norm2_b": jnp.zeros((C,), jnp.float32),
            "l1_w": nrm((C, hidden)),
            "l1_b": nrm((hidden,), 0.01),
            "dw_w": nrm((3, 3, hidden), 0.1),
            "dw_b": nrm((hidden,), 0.01),
            "l2_w": nrm((hidden, C)),
            "l2_b": nrm((C,), 0.01),
        })
    return params


# --------------------------------- main -------------------------------------

if __name__ == "__main__":
    # Small CSWinIR config: embed_dim=32, depths=2, num_heads=4, split_size=2,
    # mlp_ratio=2.0, transtype=1, is_spa=True.
    C = 32
    num_heads = 4
    split_size = 2
    depth = 2
    mlp_ratio = 2.0
    b, a, H, W = 1, 2, 8, 8

    key = jax.random.PRNGKey(0)
    kx, kp = jax.random.split(key)
    x = jax.random.normal(kx, (b, C, a, H, W), jnp.float32)
    params = init_params(kp, C, depth, mlp_ratio)

    out = cswinir_forward(x, params, split_size, num_heads)
    out = jax.block_until_ready(out)
    assert out.shape == (b, C, a, H, W), out.shape
    assert jnp.all(jnp.isfinite(out))
    print("KERNEL_OK")
</pallas_src>

<mosaic_0001>
module attributes {stable_mosaic.version = 11 : i64} {
  func.func @_cswin_attn_block_kernel(%arg0: i32, %arg1: memref<1x8x8x32xbf16, #tpu.memory_space<vmem>>, %arg2: memref<1x32xf32, #tpu.memory_space<vmem>>, %arg3: memref<1x32xf32, #tpu.memory_space<vmem>>, %arg4: memref<32x48xf32, #tpu.memory_space<vmem>>, %arg5: memref<1x48xf32, #tpu.memory_space<vmem>>, %arg6: memref<32x48xf32, #tpu.memory_space<vmem>>, %arg7: memref<1x48xf32, #tpu.memory_space<vmem>>, %arg8: memref<16x32xf32, #tpu.memory_space<vmem>>, %arg9: memref<16x32xf32, #tpu.memory_space<vmem>>, %arg10: memref<1x32xf32, #tpu.memory_space<vmem>>, %arg11: memref<1x8x8x32xbf16, #tpu.memory_space<vmem>>) attributes {dimension_semantics = [#tpu.dimension_semantics<parallel>], iteration_bounds = array<i64: 2>, scalar_prefetch = 0 : i64, scratch_operands = 0 : i64, tpu.core_type = #tpu.core_type<tc>, window_params = [{transform_indices = @transform_0, window_bounds = array<i64: 1, 8, 8, 32>}, {pipeline_mode = #tpu.pipeline_mode<synchronous>, transform_indices = @transform_1, window_bounds = array<i64: 1, 32>}, {pipeline_mode = #tpu.pipeline_mode<synchronous>, transform_indices = @transform_2, window_bounds = array<i64: 1, 32>}, {pipeline_mode = #tpu.pipeline_mode<synchronous>, transform_indices = @transform_3, window_bounds = array<i64: 32, 48>}, {pipeline_mode = #tpu.pipeline_mode<synchronous>, transform_indices = @transform_4, window_bounds = array<i64: 1, 48>}, {pipeline_mode = #tpu.pipeline_mode<synchronous>, transform_indices = @transform_5, window_bounds = array<i64: 32, 48>}, {pipeline_mode = #tpu.pipeline_mode<synchronous>, transform_indices = @transform_6, window_bounds = array<i64: 1, 48>}, {pipeline_mode = #tpu.pipeline_mode<synchronous>, transform_indices = @transform_7, window_bounds = array<i64: 16, 32>}, {pipeline_mode = #tpu.pipeline_mode<synchronous>, transform_indices = @transform_8, window_bounds = array<i64: 16, 32>}, {pipeline_mode = #tpu.pipeline_mode<synchronous>, transform_indices = @transform_9, window_bounds = array<i64: 1, 32>}, {transform_indices = @transform_10, window_bounds = array<i64: 1, 8, 8, 32>}]} {
    %c0 = arith.constant 0 : index
    %c0_0 = arith.constant 0 : index
    %c0_1 = arith.constant 0 : index
    %c0_2 = arith.constant 0 : index
    %0 = vector.load %arg1[%c0, %c0_0, %c0_1, %c0_2] : memref<1x8x8x32xbf16, #tpu.memory_space<vmem>>, vector<1x8x8x32xbf16>
    %1 = vector.shape_cast %0 : vector<1x8x8x32xbf16> to vector<8x8x32xbf16>
    %2 = arith.extf %1 : vector<8x8x32xbf16> to vector<8x8x32xf32>
    %3 = vector.shape_cast %2 : vector<8x8x32xf32> to vector<64x32xf32>
    %cst = arith.constant dense<0.000000e+00> : vector<64xf32>
    %4 = vector.multi_reduction <add>, %3, %cst [1] : vector<64x32xf32> to vector<64xf32>
    %5 = vector.shape_cast %4 : vector<64xf32> to vector<64x1xf32>
    %cst_3 = arith.constant 3.200000e+01 : f32
    %6 = vector.broadcast %cst_3 : f32 to vector<64x1xf32>
    %7 = arith.divf %5, %6 : vector<64x1xf32>
    %8 = vector.broadcast %7 : vector<64x1xf32> to vector<64x32xf32>
    %9 = arith.subf %3, %8 : vector<64x32xf32>
    %10 = arith.mulf %9, %9 : vector<64x32xf32>
    %cst_4 = arith.constant dense<0.000000e+00> : vector<64xf32>
    %11 = vector.multi_reduction <add>, %10, %cst_4 [1] : vector<64x32xf32> to vector<64xf32>
    %12 = vector.shape_cast %11 : vector<64xf32> to vector<64x1xf32>
    %cst_5 = arith.constant 3.200000e+01 : f32
    %13 = vector.broadcast %cst_5 : f32 to vector<64x1xf32>
    %14 = arith.divf %12, %13 : vector<64x1xf32>
    %15 = vector.broadcast %7 : vector<64x1xf32> to vector<64x32xf32>
    %16 = arith.subf %3, %15 : vector<64x32xf32>
    %cst_6 = arith.constant 9.99999974E-6 : f32
    %17 = vector.broadcast %cst_6 : f32 to vector<64x1xf32>
    %18 = arith.addf %14, %17 : vector<64x1xf32>
    %19 = math.rsqrt %18 : vector<64x1xf32>
    %20 = vector.broadcast %19 : vector<64x1xf32> to vector<64x32xf32>
    %21 = arith.mulf %16, %20 : vector<64x32xf32>
    %c0_7 = arith.constant 0 : index
    %c0_8 = arith.constant 0 : index
    %22 = vector.load %arg2[%c0_7, %c0_8] : memref<1x32xf32, #tpu.memory_space<vmem>>, vector<1x32xf32>
    %23 = vector.broadcast %22 : vector<1x32xf32> to vector<64x32xf32>
    %24 = arith.mulf %21, %23 : vector<64x32xf32>
    %c0_9 = arith.constant 0 : index
    %c0_10 = arith.constant 0 : index
    %25 = vector.load %arg3[%c0_9, %c0_10] : memref<1x32xf32, #tpu.memory_space<vmem>>, vector<1x32xf32>
    %26 = vector.broadcast %25 : vector<1x32xf32> to vector<64x32xf32>
    %27 = arith.addf %24, %26 : vector<64x32xf32>
    %28 = arith.truncf %27 : vector<64x32xf32> to vector<64x32xbf16>
    %c0_11 = arith.constant 0 : index
    %c0_12 = arith.constant 0 : index
    %29 = vector.load %arg4[%c0_11, %c0_12] : memref<32x48xf32, #tpu.memory_space<vmem>>, vector<32x48xf32>
    %30 = arith.truncf %29 : vector<32x48xf32> to vector<32x48xbf16>
    %cst_13 = arith.constant dense<0.000000e+00> : vector<64x48xf32>
    %31 = tpu.matmul %28, %30, %cst_13 {dimension_numbers = #tpu.dot_dimension_numbers<[1], [0], [0], [1], [0, 0, 1, 1], [], []>} : vector<64x32xbf16>, vector<32x48xbf16>, vector<64x48xf32> -> vector<64x48xf32>
    %c0_14 = arith.constant 0 : index
    %c0_15 = arith.constant 0 : index
    %32 = vector.load %arg5[%c0_14, %c0_15] : memref<1x48xf32, #tpu.memory_space<vmem>>, vector<1x48xf32>
    %33 = vector.broadcast %32 : vector<1x48xf32> to vector<64x48xf32>
    %34 = arith.addf %31, %33 : vector<64x48xf32>
    %c0_16 = arith.constant 0 : index
    %c0_17 = arith.constant 0 : index
    %35 = vector.load %arg6[%c0_16, %c0_17] : memref<32x48xf32, #tpu.memory_space<vmem>>, vector<32x48xf32>
    %36 = arith.truncf %35 : vector<32x48xf32> to vector<32x48xbf16>
    %cst_18 = arith.constant dense<0.000000e+00> : vector<64x48xf32>
    %37 = tpu.matmul %28, %36, %cst_18 {dimension_numbers = #tpu.dot_dimension_numbers<[1], [0], [0], [1], [0, 0, 1, 1], [], []>} : vector<64x32xbf16>, vector<32x48xbf16>, vector<64x48xf32> -> vector<64x48xf32>
    %c0_19 = arith.constant 0 : index
    %c0_20 = arith.constant 0 : index
    %38 = vector.load %arg7[%c0_19, %c0_20] : memref<1x48xf32, #tpu.memory_space<vmem>>, vector<1x48xf32>
    %39 = vector.broadcast %38 : vector<1x48xf32> to vector<64x48xf32>
    %40 = arith.addf %37, %39 : vector<64x48xf32>
    %41 = vector.shape_cast %34 : vector<64x48xf32> to vector<8x8x48xf32>
    %42 = tpu.transpose %41, [1, 0, 2] : vector<8x8x48xf32> -> vector<8x8x48xf32>
    %43 = vector.shape_cast %42 : vector<8x8x48xf32> to vector<4x16x48xf32>
    %44 = vector.extract_strided_slice %43 {offsets = [0, 0, 0], sizes = [4, 16, 16], strides = [1, 1, 1]} : vector<4x16x48xf32> to vector<4x16x16xf32>
    %cst_21 = arith.constant 0.353553385 : f32
    %45 = vector.broadcast %cst_21 : f32 to vector<4x16x16xf32>
    %46 = arith.mulf %44, %45 : vector<4x16x16xf32>
    %47 = vector.extract_strided_slice %43 {offsets = [0, 0, 16], sizes = [4, 16, 16], strides = [1, 1, 1]} : vector<4x16x48xf32> to vector<4x16x16xf32>
    %48 = arith.truncf %47 : vector<4x16x16xf32> to vector<4x16x16xbf16>
    %49 = vector.extract_strided_slice %43 {offsets = [0, 0, 32], sizes = [4, 16, 16], strides = [1, 1, 1]} : vector<4x16x48xf32> to vector<4x16x16xf32>
    %50 = arith.truncf %49 : vector<4x16x16xf32> to vector<4x16x16xbf16>
    %51 = tpu.iota {dimensions = array<i32: 2>} : vector<1x1x16xi32>
    %cst_22 = arith.constant 0.000000e+00 : f32
    %52 = vector.broadcast %cst_22 : f32 to vector<4x16x16xf32>
    %c0_i32 = arith.constant 0 : i32
    %53 = vector.broadcast %c0_i32 : i32 to vector<1x1x16xi32>
    %54 = arith.cmpi sge, %51, %53 : vector<1x1x16xi32>
    %c8_i32 = arith.constant 8 : i32
    %55 = vector.broadcast %c8_i32 : i32 to vector<1x1x16xi32>
    %56 = arith.cmpi slt, %51, %55 : vector<1x1x16xi32>
    %57 = arith.andi %54, %56 : vector<1x1x16xi1>
    %cst_23 = arith.constant 0.000000e+00 : f32
    %58 = vector.shape_cast %57 : vector<1x1x16xi1> to vector<1x1x16xi1>
    %59 = vector.broadcast %58 : vector<1x1x16xi1> to vector<4x16x16xi1>
    %60 = vector.broadcast %cst_23 : f32 to vector<4x16x16xf32>
    %61 = arith.select %59, %46, %60 : vector<4x16x16xi1>, vector<4x16x16xf32>
    %62 = arith.truncf %61 : vector<4x16x16xf32> to vector<4x16x16xbf16>
    "tpu.trace_start"() <{level = 10 : i32, message = "wtd,wsd->wts"}> : () -> ()
    %cst_24 = arith.constant dense<0.000000e+00> : vector<4x16x16xf32>
    %63 = tpu.matmul %62, %48, %cst_24 {dimension_numbers = #tpu.dot_dimension_numbers<[2], [2], [1], [1], [0, 0, 0, 1, 1, 1], [0], [0]>} : vector<4x16x16xbf16>, vector<4x16x16xbf16>, vector<4x16x16xf32> -> vector<4x16x16xf32>
    "tpu.trace_stop"() : () -> ()
    %cst_25 = arith.constant dense<0xFF800000> : vector<4x16xf32>
    %64 = vector.multi_reduction <maximumf>, %63, %cst_25 [2] : vector<4x16x16xf32> to vector<4x16xf32>
    %65 = vector.shape_cast %64 : vector<4x16xf32> to vector<4x16x1xf32>
    %66 = vector.broadcast %65 : vector<4x16x1xf32> to vector<4x16x16xf32>
    %67 = arith.subf %63, %66 : vector<4x16x16xf32>
    %68 = math.exp %67 : vector<4x16x16xf32>
    %cst_26 = arith.constant dense<0.000000e+00> : vector<4x16xf32>
    %69 = vector.multi_reduction <add>, %68, %cst_26 [2] : vector<4x16x16xf32> to vector<4x16xf32>
    %70 = vector.shape_cast %69 : vector<4x16xf32> to vector<4x16x1xf32>
    %71 = tpu.reciprocal %70 {approx = true} : vector<4x16x1xf32> -> vector<4x16x1xf32>
    %72 = vector.broadcast %71 : vector<4x16x1xf32> to vector<4x16x16xf32>
    %73 = arith.mulf %68, %72 : vector<4x16x16xf32>
    %74 = arith.truncf %73 : vector<4x16x16xf32> to vector<4x16x16xbf16>
    "tpu.trace_start"() <{level = 10 : i32, message = "wts,wsd->wtd"}> : () -> ()
    %cst_27 = arith.constant dense<0.000000e+00> : vector<4x16x16xf32>
    %75 = tpu.matmul %74, %50, %cst_27 {dimension_numbers = #tpu.dot_dimension_numbers<[2], [1], [1], [2], [0, 0, 0, 1, 1, 2], [0], [0]>} : vector<4x16x16xbf16>, vector<4x16x16xbf16>, vector<4x16x16xf32> -> vector<4x16x16xf32>
    %cst_28 = arith.constant 0.000000e+00 : f32
    "tpu.trace_stop"() : () -> ()
    %76 = vector.shape_cast %57 : vector<1x1x16xi1> to vector<1x1x16xi1>
    %77 = vector.broadcast %76 : vector<1x1x16xi1> to vector<4x16x16xi1>
    %78 = vector.broadcast %cst_28 : f32 to vector<4x16x16xf32>
    %79 = arith.select %77, %75, %78 : vector<4x16x16xi1>, vector<4x16x16xf32>
    %80 = arith.addf %52, %79 : vector<4x16x16xf32>
    %c8_i32_29 = arith.constant 8 : i32
    %81 = vector.broadcast %c8_i32_29 : i32 to vector<1x1x16xi32>
    %82 = arith.cmpi sge, %51, %81 : vector<1x1x16xi32>
    %c16_i32 = arith.constant 16 : i32
    %83 = vector.broadcast %c16_i32 : i32 to vector<1x1x16xi32>
    %84 = arith.cmpi slt, %51, %83 : vector<1x1x16xi32>
    %85 = arith.andi %82, %84 : vector<1x1x16xi1>
    %cst_30 = arith.constant 0.000000e+00 : f32
    %86 = vector.shape_cast %85 : vector<1x1x16xi1> to vector<1x1x16xi1>
    %87 = vector.broadcast %86 : vector<1x1x16xi1> to vector<4x16x16xi1>
    %88 = vector.broadcast %cst_30 : f32 to vector<4x16x16xf32>
    %89 = arith.select %87, %46, %88 : vector<4x16x16xi1>, vector<4x16x16xf32>
    %90 = arith.truncf %89 : vector<4x16x16xf32> to vector<4x16x16xbf16>
    "tpu.trace_start"() <{level = 10 : i32, message = "wtd,wsd->wts"}> : () -> ()
    %cst_31 = arith.constant dense<0.000000e+00> : vector<4x16x16xf32>
    %91 = tpu.matmul %90, %48, %cst_31 {dimension_numbers = #tpu.dot_dimension_numbers<[2], [2], [1], [1], [0, 0, 0, 1, 1, 1], [0], [0]>} : vector<4x16x16xbf16>, vector<4x16x16xbf16>, vector<4x16x16xf32> -> vector<4x16x16xf32>
    "tpu.trace_stop"() : () -> ()
    %cst_32 = arith.constant dense<0xFF800000> : vector<4x16xf32>
    %92 = vector.multi_reduction <maximumf>, %91, %cst_32 [2] : vector<4x16x16xf32> to vector<4x16xf32>
    %93 = vector.shape_cast %92 : vector<4x16xf32> to vector<4x16x1xf32>
    %94 = vector.broadcast %93 : vector<4x16x1xf32> to vector<4x16x16xf32>
    %95 = arith.subf %91, %94 : vector<4x16x16xf32>
    %96 = math.exp %95 : vector<4x16x16xf32>
    %cst_33 = arith.constant dense<0.000000e+00> : vector<4x16xf32>
    %97 = vector.multi_reduction <add>, %96, %cst_33 [2] : vector<4x16x16xf32> to vector<4x16xf32>
    %98 = vector.shape_cast %97 : vector<4x16xf32> to vector<4x16x1xf32>
    %99 = tpu.reciprocal %98 {approx = true} : vector<4x16x1xf32> -> vector<4x16x1xf32>
    %100 = vector.broadcast %99 : vector<4x16x1xf32> to vector<4x16x16xf32>
    %101 = arith.mulf %96, %100 : vector<4x16x16xf32>
    %102 = arith.truncf %101 : vector<4x16x16xf32> to vector<4x16x16xbf16>
    "tpu.trace_start"() <{level = 10 : i32, message = "wts,wsd->wtd"}> : () -> ()
    %cst_34 = arith.constant dense<0.000000e+00> : vector<4x16x16xf32>
    %103 = tpu.matmul %102, %50, %cst_34 {dimension_numbers = #tpu.dot_dimension_numbers<[2], [1], [1], [2], [0, 0, 0, 1, 1, 2], [0], [0]>} : vector<4x16x16xbf16>, vector<4x16x16xbf16>, vector<4x16x16xf32> -> vector<4x16x16xf32>
    %cst_35 = arith.constant 0.000000e+00 : f32
    "tpu.trace_stop"() : () -> ()
    %104 = vector.shape_cast %85 : vector<1x1x16xi1> to vector<1x1x16xi1>
    %105 = vector.broadcast %104 : vector<1x1x16xi1> to vector<4x16x16xi1>
    %106 = vector.broadcast %cst_35 : f32 to vector<4x16x16xf32>
    %107 = arith.select %105, %103, %106 : vector<4x16x16xi1>, vector<4x16x16xf32>
    %108 = arith.addf %80, %107 : vector<4x16x16xf32>
    %109 = vector.shape_cast %108 : vector<4x16x16xf32> to vector<8x8x16xf32>
    %110 = tpu.transpose %109, [1, 0, 2] : vector<8x8x16xf32> -> vector<8x8x16xf32>
    %111 = vector.shape_cast %110 : vector<8x8x16xf32> to vector<64x16xf32>
    %112 = vector.shape_cast %40 : vector<64x48xf32> to vector<4x16x48xf32>
    %113 = vector.extract_strided_slice %112 {offsets = [0, 0, 0], sizes = [4, 16, 16], strides = [1, 1, 1]} : vector<4x16x48xf32> to vector<4x16x16xf32>
    %cst_36 = arith.constant 0.353553385 : f32
    %114 = vector.broadcast %cst_36 : f32 to vector<4x16x16xf32>
    %115 = arith.mulf %113, %114 : vector<4x16x16xf32>
    %116 = vector.extract_strided_slice %112 {offsets = [0, 0, 16], sizes = [4, 16, 16], strides = [1, 1, 1]} : vector<4x16x48xf32> to vector<4x16x16xf32>
    %117 = arith.truncf %116 : vector<4x16x16xf32> to vector<4x16x16xbf16>
    %118 = vector.extract_strided_slice %112 {offsets = [0, 0, 32], sizes = [4, 16, 16], strides = [1, 1, 1]} : vector<4x16x48xf32> to vector<4x16x16xf32>
    %119 = arith.truncf %118 : vector<4x16x16xf32> to vector<4x16x16xbf16>
    %120 = tpu.iota {dimensions = array<i32: 2>} : vector<1x1x16xi32>
    %cst_37 = arith.constant 0.000000e+00 : f32
    %121 = vector.broadcast %cst_37 : f32 to vector<4x16x16xf32>
    %c0_i32_38 = arith.constant 0 : i32
    %122 = vector.broadcast %c0_i32_38 : i32 to vector<1x1x16xi32>
    %123 = arith.cmpi sge, %120, %122 : vector<1x1x16xi32>
    %c8_i32_39 = arith.constant 8 : i32
    %124 = vector.broadcast %c8_i32_39 : i32 to vector<1x1x16xi32>
    %125 = arith.cmpi slt, %120, %124 : vector<1x1x16xi32>
    %126 = arith.andi %123, %125 : vector<1x1x16xi1>
    %cst_40 = arith.constant 0.000000e+00 : f32
    %127 = vector.shape_cast %126 : vector<1x1x16xi1> to vector<1x1x16xi1>
    %128 = vector.broadcast %127 : vector<1x1x16xi1> to vector<4x16x16xi1>
    %129 = vector.broadcast %cst_40 : f32 to vector<4x16x16xf32>
    %130 = arith.select %128, %115, %129 : vector<4x16x16xi1>, vector<4x16x16xf32>
    %131 = arith.truncf %130 : vector<4x16x16xf32> to vector<4x16x16xbf16>
    "tpu.trace_start"() <{level = 10 : i32, message = "wtd,wsd->wts"}> : () -> ()
    %cst_41 = arith.constant dense<0.000000e+00> : vector<4x16x16xf32>
    %132 = tpu.matmul %131, %117, %cst_41 {dimension_numbers = #tpu.dot_dimension_numbers<[2], [2], [1], [1], [0, 0, 0, 1, 1, 1], [0], [0]>} : vector<4x16x16xbf16>, vector<4x16x16xbf16>, vector<4x16x16xf32> -> vector<4x16x16xf32>
    "tpu.trace_stop"() : () -> ()
    %cst_42 = arith.constant dense<0xFF800000> : vector<4x16xf32>
    %133 = vector.multi_reduction <maximumf>, %132, %cst_42 [2] : vector<4x16x16xf32> to vector<4x16xf32>
    %134 = vector.shape_cast %133 : vector<4x16xf32> to vector<4x16x1xf32>
    %135 = vector.broadcast %134 : vector<4x16x1xf32> to vector<4x16x16xf32>
    %136 = arith.subf %132, %135 : vector<4x16x16xf32>
    %137 = math.exp %136 : vector<4x16x16xf32>
    %cst_43 = arith.constant dense<0.000000e+00> : vector<4x16xf32>
    %138 = vector.multi_reduction <add>, %137, %cst_43 [2] : vector<4x16x16xf32> to vector<4x16xf32>
    %139 = vector.shape_cast %138 : vector<4x16xf32> to vector<4x16x1xf32>
    %140 = tpu.reciprocal %139 {approx = true} : vector<4x16x1xf32> -> vector<4x16x1xf32>
    %141 = vector.broadcast %140 : vector<4x16x1xf32> to vector<4x16x16xf32>
    %142 = arith.mulf %137, %141 : vector<4x16x16xf32>
    %143 = arith.truncf %142 : vector<4x16x16xf32> to vector<4x16x16xbf16>
    "tpu.trace_start"() <{level = 10 : i32, message = "wts,wsd->wtd"}> : () -> ()
    %cst_44 = arith.constant dense<0.000000e+00> : vector<4x16x16xf32>
    %144 = tpu.matmul %143, %119, %cst_44 {dimension_numbers = #tpu.dot_dimension_numbers<[2], [1], [1], [2], [0, 0, 0, 1, 1, 2], [0], [0]>} : vector<4x16x16xbf16>, vector<4x16x16xbf16>, vector<4x16x16xf32> -> vector<4x16x16xf32>
    %cst_45 = arith.constant 0.000000e+00 : f32
    "tpu.trace_stop"() : () -> ()
    %145 = vector.shape_cast %126 : vector<1x1x16xi1> to vector<1x1x16xi1>
    %146 = vector.broadcast %145 : vector<1x1x16xi1> to vector<4x16x16xi1>
    %147 = vector.broadcast %cst_45 : f32 to vector<4x16x16xf32>
    %148 = arith.select %146, %144, %147 : vector<4x16x16xi1>, vector<4x16x16xf32>
    %149 = arith.addf %121, %148 : vector<4x16x16xf32>
    %c8_i32_46 = arith.constant 8 : i32
    %150 = vector.broadcast %c8_i32_46 : i32 to vector<1x1x16xi32>
    %151 = arith.cmpi sge, %120, %150 : vector<1x1x16xi32>
    %c16_i32_47 = arith.constant 16 : i32
    %152 = vector.broadcast %c16_i32_47 : i32 to vector<1x1x16xi32>
    %153 = arith.cmpi slt, %120, %152 : vector<1x1x16xi32>
    %154 = arith.andi %151, %153 : vector<1x1x16xi1>
    %cst_48 = arith.constant 0.000000e+00 : f32
    %155 = vector.shape_cast %154 : vector<1x1x16xi1> to vector<1x1x16xi1>
    %156 = vector.broadcast %155 : vector<1x1x16xi1> to vector<4x16x16xi1>
    %157 = vector.broadcast %cst_48 : f32 to vector<4x16x16xf32>
    %158 = arith.select %156, %115, %157 : vector<4x16x16xi1>, vector<4x16x16xf32>
    %159 = arith.truncf %158 : vector<4x16x16xf32> to vector<4x16x16xbf16>
    "tpu.trace_start"() <{level = 10 : i32, message = "wtd,wsd->wts"}> : () -> ()
    %cst_49 = arith.constant dense<0.000000e+00> : vector<4x16x16xf32>
    %160 = tpu.matmul %159, %117, %cst_49 {dimension_numbers = #tpu.dot_dimension_numbers<[2], [2], [1], [1], [0, 0, 0, 1, 1, 1], [0], [0]>} : vector<4x16x16xbf16>, vector<4x16x16xbf16>, vector<4x16x16xf32> -> vector<4x16x16xf32>
    "tpu.trace_stop"() : () -> ()
    %cst_50 = arith.constant dense<0xFF800000> : vector<4x16xf32>
    %161 = vector.multi_reduction <maximumf>, %160, %cst_50 [2] : vector<4x16x16xf32> to vector<4x16xf32>
    %162 = vector.shape_cast %161 : vector<4x16xf32> to vector<4x16x1xf32>
    %163 = vector.broadcast %162 : vector<4x16x1xf32> to vector<4x16x16xf32>
    %164 = arith.subf %160, %163 : vector<4x16x16xf32>
    %165 = math.exp %164 : vector<4x16x16xf32>
    %cst_51 = arith.constant dense<0.000000e+00> : vector<4x16xf32>
    %166 = vector.multi_reduction <add>, %165, %cst_51 [2] : vector<4x16x16xf32> to vector<4x16xf32>
    %167 = vector.shape_cast %166 : vector<4x16xf32> to vector<4x16x1xf32>
    %168 = tpu.reciprocal %167 {approx = true} : vector<4x16x1xf32> -> vector<4x16x1xf32>
    %169 = vector.broadcast %168 : vector<4x16x1xf32> to vector<4x16x16xf32>
    %170 = arith.mulf %165, %169 : vector<4x16x16xf32>
    %171 = arith.truncf %170 : vector<4x16x16xf32> to vector<4x16x16xbf16>
    "tpu.trace_start"() <{level = 10 : i32, message = "wts,wsd->wtd"}> : () -> ()
    %cst_52 = arith.constant dense<0.000000e+00> : vector<4x16x16xf32>
    %172 = tpu.matmul %171, %119, %cst_52 {dimension_numbers = #tpu.dot_dimension_numbers<[2], [1], [1], [2], [0, 0, 0, 1, 1, 2], [0], [0]>} : vector<4x16x16xbf16>, vector<4x16x16xbf16>, vector<4x16x16xf32> -> vector<4x16x16xf32>
    %cst_53 = arith.constant 0.000000e+00 : f32
    "tpu.trace_stop"() : () -> ()
    %173 = vector.shape_cast %154 : vector<1x1x16xi1> to vector<1x1x16xi1>
    %174 = vector.broadcast %173 : vector<1x1x16xi1> to vector<4x16x16xi1>
    %175 = vector.broadcast %cst_53 : f32 to vector<4x16x16xf32>
    %176 = arith.select %174, %172, %175 : vector<4x16x16xi1>, vector<4x16x16xf32>
    %177 = arith.addf %149, %176 : vector<4x16x16xf32>
    %178 = vector.shape_cast %177 : vector<4x16x16xf32> to vector<64x16xf32>
    %179 = arith.truncf %111 : vector<64x16xf32> to vector<64x16xbf16>
    %c0_54 = arith.constant 0 : index
    %c0_55 = arith.constant 0 : index
    %180 = vector.load %arg8[%c0_54, %c0_55] : memref<16x32xf32, #tpu.memory_space<vmem>>, vector<16x32xf32>
    %181 = arith.truncf %180 : vector<16x32xf32> to vector<16x32xbf16>
    %cst_56 = arith.constant dense<0.000000e+00> : vector<64x32xf32>
    %182 = tpu.matmul %179, %181, %cst_56 {dimension_numbers = #tpu.dot_dimension_numbers<[1], [0], [0], [1], [0, 0, 1, 1], [], []>} : vector<64x16xbf16>, vector<16x32xbf16>, vector<64x32xf32> -> vector<64x32xf32>
    %183 = arith.truncf %178 : vector<64x16xf32> to vector<64x16xbf16>
    %c0_57 = arith.constant 0 : index
    %c0_58 = arith.constant 0 : index
    %184 = vector.load %arg9[%c0_57, %c0_58] : memref<16x32xf32, #tpu.memory_space<vmem>>, vector<16x32xf32>
    %185 = arith.truncf %184 : vector<16x32xf32> to vector<16x32xbf16>
    %cst_59 = arith.constant dense<0.000000e+00> : vector<64x32xf32>
    %186 = tpu.matmul %183, %185, %cst_59 {dimension_numbers = #tpu.dot_dimension_numbers<[1], [0], [0], [1], [0, 0, 1, 1], [], []>} : vector<64x16xbf16>, vector<16x32xbf16>, vector<64x32xf32> -> vector<64x32xf32>
    %187 = arith.addf %182, %186 : vector<64x32xf32>
    %c0_60 = arith.constant 0 : index
    %c0_61 = arith.constant 0 : index
    %188 = vector.load %arg10[%c0_60, %c0_61] : memref<1x32xf32, #tpu.memory_space<vmem>>, vector<1x32xf32>
    %189 = vector.broadcast %188 : vector<1x32xf32> to vector<64x32xf32>
    %190 = arith.addf %187, %189 : vector<64x32xf32>
    %191 = arith.addf %190, %3 : vector<64x32xf32>
    %192 = vector.shape_cast %191 : vector<64x32xf32> to vector<8x8x32xf32>
    %193 = arith.truncf %192 : vector<8x8x32xf32> to vector<8x8x32xbf16>
    %c0_62 = arith.constant 0 : index
    %c0_63 = arith.constant 0 : index
    %c0_64 = arith.constant 0 : index
    %c0_65 = arith.constant 0 : index
    %194 = vector.load %arg11[%c0_62, %c0_63, %c0_64, %c0_65] : memref<1x8x8x32xbf16, #tpu.memory_space<vmem>>, vector<1x8x8x32xbf16>
    %195 = vector.shape_cast %194 : vector<1x8x8x32xbf16> to vector<8x8x32xbf16>
    %196 = vector.shape_cast %193 : vector<8x8x32xbf16> to vector<1x8x8x32xbf16>
    tpu.vector_store %arg11[%c0_62, %c0_63, %c0_64, %c0_65], %196 {strides = array<i32>} : memref<1x8x8x32xbf16, #tpu.memory_space<vmem>>, vector<1x8x8x32xbf16>,
    return
  }
  func.func @transform_0(%arg0: i32) -> (i32, i32, i32, i32) {
    %c0_i32 = arith.constant 0 : i32
    %c0_i32_0 = arith.constant 0 : i32
    %c0_i32_1 = arith.constant 0 : i32
    %c0_i32_2 = arith.constant 0 : i32
    return %arg0, %c0_i32, %c0_i32_0, %c0_i32_1 : i32, i32, i32, i32
  }
  func.func @transform_1(%arg0: i32) -> (i32, i32) {
    %c0_i32 = arith.constant 0 : i32
    %c0_i32_0 = arith.constant 0 : i32
    %c0_i32_1 = arith.constant 0 : i32
    return %c0_i32, %c0_i32_0 : i32, i32
  }
  func.func @transform_2(%arg0: i32) -> (i32, i32) {
    %c0_i32 = arith.constant 0 : i32
    %c0_i32_0 = arith.constant 0 : i32
    %c0_i32_1 = arith.constant 0 : i32
    return %c0_i32, %c0_i32_0 : i32, i32
  }
  func.func @transform_3(%arg0: i32) -> (i32, i32) {
    %c0_i32 = arith.constant 0 : i32
    %c0_i32_0 = arith.constant 0 : i32
    %c0_i32_1 = arith.constant 0 : i32
    return %c0_i32, %c0_i32_0 : i32, i32
  }
  func.func @transform_4(%arg0: i32) -> (i32, i32) {
    %c0_i32 = arith.constant 0 : i32
    %c0_i32_0 = arith.constant 0 : i32
    %c0_i32_1 = arith.constant 0 : i32
    return %c0_i32, %c0_i32_0 : i32, i32
  }
  func.func @transform_5(%arg0: i32) -> (i32, i32) {
    %c0_i32 = arith.constant 0 : i32
    %c0_i32_0 = arith.constant 0 : i32
    %c0_i32_1 = arith.constant 0 : i32
    return %c0_i32, %c0_i32_0 : i32, i32
  }
  func.func @transform_6(%arg0: i32) -> (i32, i32) {
    %c0_i32 = arith.constant 0 : i32
    %c0_i32_0 = arith.constant 0 : i32
    %c0_i32_1 = arith.constant 0 : i32
    return %c0_i32, %c0_i32_0 : i32, i32
  }
  func.func @transform_7(%arg0: i32) -> (i32, i32) {
    %c0_i32 = arith.constant 0 : i32
    %c0_i32_0 = arith.constant 0 : i32
    %c0_i32_1 = arith.constant 0 : i32
    return %c0_i32, %c0_i32_0 : i32, i32
  }
  func.func @transform_8(%arg0: i32) -> (i32, i32) {
    %c0_i32 = arith.constant 0 : i32
    %c0_i32_0 = arith.constant 0 : i32
    %c0_i32_1 = arith.constant 0 : i32
    return %c0_i32, %c0_i32_0 : i32, i32
  }
  func.func @transform_9(%arg0: i32) -> (i32, i32) {
    %c0_i32 = arith.constant 0 : i32
    %c0_i32_0 = arith.constant 0 : i32
    %c0_i32_1 = arith.constant 0 : i32
    return %c0_i32, %c0_i32_0 : i32, i32
  }
  func.func @transform_10(%arg0: i32) -> (i32, i32, i32, i32) {
    %c0_i32 = arith.constant 0 : i32
    %c0_i32_0 = arith.constant 0 : i32
    %c0_i32_1 = arith.constant 0 : i32
    %c0_i32_2 = arith.constant 0 : i32
    return %arg0, %c0_i32, %c0_i32_0, %c0_i32_1 : i32, i32, i32, i32
  }
}

module attributes {stable_mosaic.version = 11 : i64} {
  func.func @_dwconv_kernel(%arg0: i32, %arg1: memref<1x8x8x32xf32, #tpu.memory_space<vmem>>, %arg2: memref<3x3x32xf32, #tpu.memory_space<vmem>>, %arg3: memref<1x32xf32, #tpu.memory_space<vmem>>, %arg4: memref<1x8x8x32xbf16, #tpu.memory_space<vmem>>, %arg5: memref<10x10x32xf32, #tpu.memory_space<vmem>>) attributes {dimension_semantics = [#tpu.dimension_semantics<parallel>], iteration_bounds = array<i64: 2>, scalar_prefetch = 0 : i64, scratch_operands = 1 : i64, tpu.core_type = #tpu.core_type<tc>, window_params = [{transform_indices = @transform_0, window_bounds = array<i64: 1, 8, 8, 32>}, {pipeline_mode = #tpu.pipeline_mode<synchronous>, transform_indices = @transform_1, window_bounds = array<i64: 3, 3, 32>}, {pipeline_mode = #tpu.pipeline_mode<synchronous>, transform_indices = @transform_2, window_bounds = array<i64: 1, 32>}, {transform_indices = @transform_3, window_bounds = array<i64: 1, 8, 8, 32>}]} {
    %cst = arith.constant 0.000000e+00 : f32
    %0 = vector.broadcast %cst : f32 to vector<10x10x32xf32>
    %c0 = arith.constant 0 : index
    %c0_0 = arith.constant 0 : index
    %c0_1 = arith.constant 0 : index
    %1 = vector.load %arg5[%c0, %c0_0, %c0_1] : memref<10x10x32xf32, #tpu.memory_space<vmem>>, vector<10x10x32xf32>
    tpu.vector_store %arg5[%c0, %c0_0, %c0_1], %0 {strides = array<i32>} : memref<10x10x32xf32, #tpu.memory_space<vmem>>, vector<10x10x32xf32>,
    %c0_2 = arith.constant 0 : index
    %c0_3 = arith.constant 0 : index
    %c0_4 = arith.constant 0 : index
    %c0_5 = arith.constant 0 : index
    %2 = vector.load %arg1[%c0_2, %c0_3, %c0_4, %c0_5] : memref<1x8x8x32xf32, #tpu.memory_space<vmem>>, vector<1x8x8x32xf32>
    %3 = vector.shape_cast %2 : vector<1x8x8x32xf32> to vector<8x8x32xf32>
    %c1 = arith.constant 1 : index
    %c1_6 = arith.constant 1 : index
    %c0_7 = arith.constant 0 : index
    %4 = vector.load %arg5[%c1, %c1_6, %c0_7] : memref<10x10x32xf32, #tpu.memory_space<vmem>>, vector<8x8x32xf32>
    tpu.vector_store %arg5[%c1, %c1_6, %c0_7], %3 {strides = array<i32>} : memref<10x10x32xf32, #tpu.memory_space<vmem>>, vector<8x8x32xf32>,
    %c0_8 = arith.constant 0 : index
    %c0_9 = arith.constant 0 : index
    %c0_10 = arith.constant 0 : index
    %5 = vector.load %arg2[%c0_8, %c0_9, %c0_10] : memref<3x3x32xf32, #tpu.memory_space<vmem>>, vector<3x3x32xf32>
    %cst_11 = arith.constant 0.000000e+00 : f32
    %6 = vector.broadcast %cst_11 : f32 to vector<8x8x32xf32>
    %c0_12 = arith.constant 0 : index
    %c0_13 = arith.constant 0 : index
    %c0_14 = arith.constant 0 : index
    %7 = vector.load %arg5[%c0_12, %c0_13, %c0_14] : memref<10x10x32xf32, #tpu.memory_space<vmem>>, vector<8x8x32xf32>
    %8 = vector.extract_strided_slice %5 {offsets = [0, 0, 0], sizes = [1, 1, 32], strides = [1, 1, 1]} : vector<3x3x32xf32> to vector<1x1x32xf32>
    %9 = vector.shape_cast %8 : vector<1x1x32xf32> to vector<32xf32>
    %10 = vector.shape_cast %9 : vector<32xf32> to vector<1x1x32xf32>
    %11 = vector.broadcast %10 : vector<1x1x32xf32> to vector<8x8x32xf32>
    %12 = arith.mulf %7, %11 : vector<8x8x32xf32>
    %13 = arith.addf %6, %12 : vector<8x8x32xf32>
    %c0_15 = arith.constant 0 : index
    %c1_16 = arith.constant 1 : index
    %c0_17 = arith.constant 0 : index
    %14 = vector.load %arg5[%c0_15, %c1_16, %c0_17] : memref<10x10x32xf32, #tpu.memory_space<vmem>>, vector<8x8x32xf32>
    %15 = vector.extract_strided_slice %5 {offsets = [0, 1, 0], sizes = [1, 1, 32], strides = [1, 1, 1]} : vector<3x3x32xf32> to vector<1x1x32xf32>
    %16 = vector.shape_cast %15 : vector<1x1x32xf32> to vector<32xf32>
    %17 = vector.shape_cast %16 : vector<32xf32> to vector<1x1x32xf32>
    %18 = vector.broadcast %17 : vector<1x1x32xf32> to vector<8x8x32xf32>
    %19 = arith.mulf %14, %18 : vector<8x8x32xf32>
    %20 = arith.addf %13, %19 : vector<8x8x32xf32>
    %c0_18 = arith.constant 0 : index
    %c2 = arith.constant 2 : index
    %c0_19 = arith.constant 0 : index
    %21 = vector.load %arg5[%c0_18, %c2, %c0_19] : memref<10x10x32xf32, #tpu.memory_space<vmem>>, vector<8x8x32xf32>
    %22 = vector.extract_strided_slice %5 {offsets = [0, 2, 0], sizes = [1, 1, 32], strides = [1, 1, 1]} : vector<3x3x32xf32> to vector<1x1x32xf32>
    %23 = vector.shape_cast %22 : vector<1x1x32xf32> to vector<32xf32>
    %24 = vector.shape_cast %23 : vector<32xf32> to vector<1x1x32xf32>
    %25 = vector.broadcast %24 : vector<1x1x32xf32> to vector<8x8x32xf32>
    %26 = arith.mulf %21, %25 : vector<8x8x32xf32>
    %27 = arith.addf %20, %26 : vector<8x8x32xf32>
    %c1_20 = arith.constant 1 : index
    %c0_21 = arith.constant 0 : index
    %c0_22 = arith.constant 0 : index
    %28 = vector.load %arg5[%c1_20, %c0_21, %c0_22] : memref<10x10x32xf32, #tpu.memory_space<vmem>>, vector<8x8x32xf32>
    %29 = vector.extract_strided_slice %5 {offsets = [1, 0, 0], sizes = [1, 1, 32], strides = [1, 1, 1]} : vector<3x3x32xf32> to vector<1x1x32xf32>
    %30 = vector.shape_cast %29 : vector<1x1x32xf32> to vector<32xf32>
    %31 = vector.shape_cast %30 : vector<32xf32> to vector<1x1x32xf32>
    %32 = vector.broadcast %31 : vector<1x1x32xf32> to vector<8x8x32xf32>
    %33 = arith.mulf %28, %32 : vector<8x8x32xf32>
    %34 = arith.addf %27, %33 : vector<8x8x32xf32>
    %c1_23 = arith.constant 1 : index
    %c1_24 = arith.constant 1 : index
    %c0_25 = arith.constant 0 : index
    %35 = vector.load %arg5[%c1_23, %c1_24, %c0_25] : memref<10x10x32xf32, #tpu.memory_space<vmem>>, vector<8x8x32xf32>
    %36 = vector.extract_strided_slice %5 {offsets = [1, 1, 0], sizes = [1, 1, 32], strides = [1, 1, 1]} : vector<3x3x32xf32> to vector<1x1x32xf32>
    %37 = vector.shape_cast %36 : vector<1x1x32xf32> to vector<32xf32>
    %38 = vector.shape_cast %37 : vector<32xf32> to vector<1x1x32xf32>
    %39 = vector.broadcast %38 : vector<1x1x32xf32> to vector<8x8x32xf32>
    %40 = arith.mulf %35, %39 : vector<8x8x32xf32>
    %41 = arith.addf %34, %40 : vector<8x8x32xf32>
    %c1_26 = arith.constant 1 : index
    %c2_27 = arith.constant 2 : index
    %c0_28 = arith.constant 0 : index
    %42 = vector.load %arg5[%c1_26, %c2_27, %c0_28] : memref<10x10x32xf32, #tpu.memory_space<vmem>>, vector<8x8x32xf32>
    %43 = vector.extract_strided_slice %5 {offsets = [1, 2, 0], sizes = [1, 1, 32], strides = [1, 1, 1]} : vector<3x3x32xf32> to vector<1x1x32xf32>
    %44 = vector.shape_cast %43 : vector<1x1x32xf32> to vector<32xf32>
    %45 = vector.shape_cast %44 : vector<32xf32> to vector<1x1x32xf32>
    %46 = vector.broadcast %45 : vector<1x1x32xf32> to vector<8x8x32xf32>
    %47 = arith.mulf %42, %46 : vector<8x8x32xf32>
    %48 = arith.addf %41, %47 : vector<8x8x32xf32>
    %c2_29 = arith.constant 2 : index
    %c0_30 = arith.constant 0 : index
    %c0_31 = arith.constant 0 : index
    %49 = vector.load %arg5[%c2_29, %c0_30, %c0_31] : memref<10x10x32xf32, #tpu.memory_space<vmem>>, vector<8x8x32xf32>
    %50 = vector.extract_strided_slice %5 {offsets = [2, 0, 0], sizes = [1, 1, 32], strides = [1, 1, 1]} : vector<3x3x32xf32> to vector<1x1x32xf32>
    %51 = vector.shape_cast %50 : vector<1x1x32xf32> to vector<32xf32>
    %52 = vector.shape_cast %51 : vector<32xf32> to vector<1x1x32xf32>
    %53 = vector.broadcast %52 : vector<1x1x32xf32> to vector<8x8x32xf32>
    %54 = arith.mulf %49, %53 : vector<8x8x32xf32>
    %55 = arith.addf %48, %54 : vector<8x8x32xf32>
    %c2_32 = arith.constant 2 : index
    %c1_33 = arith.constant 1 : index
    %c0_34 = arith.constant 0 : index
    %56 = vector.load %arg5[%c2_32, %c1_33, %c0_34] : memref<10x10x32xf32, #tpu.memory_space<vmem>>, vector<8x8x32xf32>
    %57 = vector.extract_strided_slice %5 {offsets = [2, 1, 0], sizes = [1, 1, 32], strides = [1, 1, 1]} : vector<3x3x32xf32> to vector<1x1x32xf32>
    %58 = vector.shape_cast %57 : vector<1x1x32xf32> to vector<32xf32>
    %59 = vector.shape_cast %58 : vector<32xf32> to vector<1x1x32xf32>
    %60 = vector.broadcast %59 : vector<1x1x32xf32> to vector<8x8x32xf32>
    %61 = arith.mulf %56, %60 : vector<8x8x32xf32>
    %62 = arith.addf %55, %61 : vector<8x8x32xf32>
    %c2_35 = arith.constant 2 : index
    %c2_36 = arith.constant 2 : index
    %c0_37 = arith.constant 0 : index
    %63 = vector.load %arg5[%c2_35, %c2_36, %c0_37] : memref<10x10x32xf32, #tpu.memory_space<vmem>>, vector<8x8x32xf32>
    %64 = vector.extract_strided_slice %5 {offsets = [2, 2, 0], sizes = [1, 1, 32], strides = [1, 1, 1]} : vector<3x3x32xf32> to vector<1x1x32xf32>
    %65 = vector.shape_cast %64 : vector<1x1x32xf32> to vector<32xf32>
    %66 = vector.shape_cast %65 : vector<32xf32> to vector<1x1x32xf32>
    %67 = vector.broadcast %66 : vector<1x1x32xf32> to vector<8x8x32xf32>
    %68 = arith.mulf %63, %67 : vector<8x8x32xf32>
    %69 = arith.addf %62, %68 : vector<8x8x32xf32>
    %c0_38 = arith.constant 0 : index
    %c0_39 = arith.constant 0 : index
    %70 = vector.load %arg3[%c0_38, %c0_39] : memref<1x32xf32, #tpu.memory_space<vmem>>, vector<1x32xf32>
    %71 = vector.shape_cast %70 : vector<1x32xf32> to vector<1x1x32xf32>
    %72 = vector.broadcast %71 : vector<1x1x32xf32> to vector<8x8x32xf32>
    %73 = arith.addf %69, %72 : vector<8x8x32xf32>
    %c0_40 = arith.constant 0 : index
    %c0_41 = arith.constant 0 : index
    %c0_42 = arith.constant 0 : index
    %c0_43 = arith.constant 0 : index
    %74 = vector.load %arg1[%c0_40, %c0_41, %c0_42, %c0_43] : memref<1x8x8x32xf32, #tpu.memory_space<vmem>>, vector<1x8x8x32xf32>
    %75 = vector.shape_cast %74 : vector<1x8x8x32xf32> to vector<8x8x32xf32>
    %76 = arith.negf %73 : vector<8x8x32xf32>
    %77 = math.exp %76 : vector<8x8x32xf32>
    %cst_44 = arith.constant 1.000000e+00 : f32
    %78 = vector.broadcast %cst_44 : f32 to vector<8x8x32xf32>
    %79 = arith.addf %78, %77 : vector<8x8x32xf32>
    %80 = arith.divf %78, %79 : vector<8x8x32xf32>
    %81 = arith.mulf %75, %80 : vector<8x8x32xf32>
    %82 = arith.truncf %81 : vector<8x8x32xf32> to vector<8x8x32xbf16>
    %c0_45 = arith.constant 0 : index
    %c0_46 = arith.constant 0 : index
    %c0_47 = arith.constant 0 : index
    %c0_48 = arith.constant 0 : index
    %83 = vector.load %arg4[%c0_45, %c0_46, %c0_47, %c0_48] : memref<1x8x8x32xbf16, #tpu.memory_space<vmem>>, vector<1x8x8x32xbf16>
    %84 = vector.shape_cast %83 : vector<1x8x8x32xbf16> to vector<8x8x32xbf16>
    %85 = vector.shape_cast %82 : vector<8x8x32xbf16> to vector<1x8x8x32xbf16>
    tpu.vector_store %arg4[%c0_45, %c0_46, %c0_47, %c0_48], %85 {strides = array<i32>} : memref<1x8x8x32xbf16, #tpu.memory_space<vmem>>, vector<1x8x8x32xbf16>,
    return
  }
  func.func @transform_0(%arg0: i32) -> (i32, i32, i32, i32) {
    %c0_i32 = arith.constant 0 : i32
    %c0_i32_0 = arith.constant 0 : i32
    %c0_i32_1 = arith.constant 0 : i32
    %c0_i32_2 = arith.constant 0 : i32
    return %arg0, %c0_i32, %c0_i32_0, %c0_i32_1 : i32, i32, i32, i32
  }
  func.func @transform_1(%arg0: i32) -> (i32, i32, i32) {
    %c0_i32 = arith.constant 0 : i32
    %c0_i32_0 = arith.constant 0 : i32
    %c0_i32_1 = arith.constant 0 : i32
    %c0_i32_2 = arith.constant 0 : i32
    return %c0_i32, %c0_i32_0, %c0_i32_1 : i32, i32, i32
  }
  func.func @transform_2(%arg0: i32) -> (i32, i32) {
    %c0_i32 = arith.constant 0 : i32
    %c0_i32_0 = arith.constant 0 : i32
    %c0_i32_1 = arith.constant 0 : i32
    return %c0_i32, %c0_i32_0 : i32, i32
  }
  func.func @transform_3(%arg0: i32) -> (i32, i32, i32, i32) {
    %c0_i32 = arith.constant 0 : i32
    %c0_i32_0 = arith.constant 0 : i32
    %c0_i32_1 = arith.constant 0 : i32
    %c0_i32_2 = arith.constant 0 : i32
    return %arg0, %c0_i32, %c0_i32_0, %c0_i32_1 : i32, i32, i32, i32
  }
}

module attributes {stable_mosaic.version = 11 : i64} {
  func.func @_ln_linear_kernel(%arg0: i32, %arg1: memref<128x32xbf16, #tpu.memory_space<vmem>>, %arg2: memref<1x32xf32, #tpu.memory_space<vmem>>, %arg3: memref<1x32xf32, #tpu.memory_space<vmem>>, %arg4: memref<32x64xf32, #tpu.memory_space<vmem>>, %arg5: memref<1x64xf32, #tpu.memory_space<vmem>>, %arg6: memref<128x64xbf16, #tpu.memory_space<vmem>>) attributes {dimension_semantics = [#tpu.dimension_semantics<parallel>], iteration_bounds = array<i64: 1>, scalar_prefetch = 0 : i64, scratch_operands = 0 : i64, tpu.core_type = #tpu.core_type<tc>, window_params = [{transform_indices = @transform_0, window_bounds = array<i64: 128, 32>}, {pipeline_mode = #tpu.pipeline_mode<synchronous>, transform_indices = @transform_1, window_bounds = array<i64: 1, 32>}, {pipeline_mode = #tpu.pipeline_mode<synchronous>, transform_indices = @transform_2, window_bounds = array<i64: 1, 32>}, {pipeline_mode = #tpu.pipeline_mode<synchronous>, transform_indices = @transform_3, window_bounds = array<i64: 32, 64>}, {pipeline_mode = #tpu.pipeline_mode<synchronous>, transform_indices = @transform_4, window_bounds = array<i64: 1, 64>}, {transform_indices = @transform_5, window_bounds = array<i64: 128, 64>}]} {
    %c0 = arith.constant 0 : index
    %c0_0 = arith.constant 0 : index
    %0 = vector.load %arg1[%c0, %c0_0] : memref<128x32xbf16, #tpu.memory_space<vmem>>, vector<128x32xbf16>
    %1 = arith.extf %0 : vector<128x32xbf16> to vector<128x32xf32>
    %cst = arith.constant dense<0.000000e+00> : vector<128xf32>
    %2 = vector.multi_reduction <add>, %1, %cst [1] : vector<128x32xf32> to vector<128xf32>
    %3 = vector.shape_cast %2 : vector<128xf32> to vector<128x1xf32>
    %cst_1 = arith.constant 3.200000e+01 : f32
    %4 = vector.broadcast %cst_1 : f32 to vector<128x1xf32>
    %5 = arith.divf %3, %4 : vector<128x1xf32>
    %6 = vector.broadcast %5 : vector<128x1xf32> to vector<128x32xf32>
    %7 = arith.subf %1, %6 : vector<128x32xf32>
    %8 = arith.mulf %7, %7 : vector<128x32xf32>
    %cst_2 = arith.constant dense<0.000000e+00> : vector<128xf32>
    %9 = vector.multi_reduction <add>, %8, %cst_2 [1] : vector<128x32xf32> to vector<128xf32>
    %10 = vector.shape_cast %9 : vector<128xf32> to vector<128x1xf32>
    %cst_3 = arith.constant 3.200000e+01 : f32
    %11 = vector.broadcast %cst_3 : f32 to vector<128x1xf32>
    %12 = arith.divf %10, %11 : vector<128x1xf32>
    %13 = vector.broadcast %5 : vector<128x1xf32> to vector<128x32xf32>
    %14 = arith.subf %1, %13 : vector<128x32xf32>
    %cst_4 = arith.constant 9.99999974E-6 : f32
    %15 = vector.broadcast %cst_4 : f32 to vector<128x1xf32>
    %16 = arith.addf %12, %15 : vector<128x1xf32>
    %17 = math.rsqrt %16 : vector<128x1xf32>
    %18 = vector.broadcast %17 : vector<128x1xf32> to vector<128x32xf32>
    %19 = arith.mulf %14, %18 : vector<128x32xf32>
    %c0_5 = arith.constant 0 : index
    %c0_6 = arith.constant 0 : index
    %20 = vector.load %arg2[%c0_5, %c0_6] : memref<1x32xf32, #tpu.memory_space<vmem>>, vector<1x32xf32>
    %21 = vector.broadcast %20 : vector<1x32xf32> to vector<128x32xf32>
    %22 = arith.mulf %19, %21 : vector<128x32xf32>
    %c0_7 = arith.constant 0 : index
    %c0_8 = arith.constant 0 : index
    %23 = vector.load %arg3[%c0_7, %c0_8] : memref<1x32xf32, #tpu.memory_space<vmem>>, vector<1x32xf32>
    %24 = vector.broadcast %23 : vector<1x32xf32> to vector<128x32xf32>
    %25 = arith.addf %22, %24 : vector<128x32xf32>
    %26 = arith.truncf %25 : vector<128x32xf32> to vector<128x32xbf16>
    %c0_9 = arith.constant 0 : index
    %c0_10 = arith.constant 0 : index
    %27 = vector.load %arg4[%c0_9, %c0_10] : memref<32x64xf32, #tpu.memory_space<vmem>>, vector<32x64xf32>
    %28 = arith.truncf %27 : vector<32x64xf32> to vector<32x64xbf16>
    %cst_11 = arith.constant dense<0.000000e+00> : vector<128x64xf32>
    %29 = tpu.matmul %26, %28, %cst_11 {dimension_numbers = #tpu.dot_dimension_numbers<[1], [0], [0], [1], [0, 0, 1, 1], [], []>} : vector<128x32xbf16>, vector<32x64xbf16>, vector<128x64xf32> -> vector<128x64xf32>
    %c0_12 = arith.constant 0 : index
    %c0_13 = arith.constant 0 : index
    %30 = vector.load %arg5[%c0_12, %c0_13] : memref<1x64xf32, #tpu.memory_space<vmem>>, vector<1x64xf32>
    %31 = vector.broadcast %30 : vector<1x64xf32> to vector<128x64xf32>
    %32 = arith.addf %29, %31 : vector<128x64xf32>
    %33 = arith.truncf %32 : vector<128x64xf32> to vector<128x64xbf16>
    %c0_14 = arith.constant 0 : index
    %c0_15 = arith.constant 0 : index
    %34 = vector.load %arg6[%c0_14, %c0_15] : memref<128x64xbf16, #tpu.memory_space<vmem>>, vector<128x64xbf16>
    tpu.vector_store %arg6[%c0_14, %c0_15], %33 {strides = array<i32>} : memref<128x64xbf16, #tpu.memory_space<vmem>>, vector<128x64xbf16>,
    return
  }
  func.func @transform_0(%arg0: i32) -> (i32, i32) {
    %c0_i32 = arith.constant 0 : i32
    %c0_i32_0 = arith.constant 0 : i32
    return %arg0, %c0_i32 : i32, i32
  }
  func.func @transform_1(%arg0: i32) -> (i32, i32) {
    %c0_i32 = arith.constant 0 : i32
    %c0_i32_0 = arith.constant 0 : i32
    %c0_i32_1 = arith.constant 0 : i32
    return %c0_i32, %c0_i32_0 : i32, i32
  }
  func.func @transform_2(%arg0: i32) -> (i32, i32) {
    %c0_i32 = arith.constant 0 : i32
    %c0_i32_0 = arith.constant 0 : i32
    %c0_i32_1 = arith.constant 0 : i32
    return %c0_i32, %c0_i32_0 : i32, i32
  }
  func.func @transform_3(%arg0: i32) -> (i32, i32) {
    %c0_i32 = arith.constant 0 : i32
    %c0_i32_0 = arith.constant 0 : i32
    %c0_i32_1 = arith.constant 0 : i32
    return %c0_i32, %c0_i32_0 : i32, i32
  }
  func.func @transform_4(%arg0: i32) -> (i32, i32) {
    %c0_i32 = arith.constant 0 : i32
    %c0_i32_0 = arith.constant 0 : i32
    %c0_i32_1 = arith.constant 0 : i32
    return %c0_i32, %c0_i32_0 : i32, i32
  }
  func.func @transform_5(%arg0: i32) -> (i32, i32) {
    %c0_i32 = arith.constant 0 : i32
    %c0_i32_0 = arith.constant 0 : i32
    return %arg0, %c0_i32 : i32, i32
  }
}

module attributes {stable_mosaic.version = 11 : i64} {
  func.func @_dwconv_kernel(%arg0: i32, %arg1: memref<1x8x8x64xbf16, #tpu.memory_space<vmem>>, %arg2: memref<3x3x64xf32, #tpu.memory_space<vmem>>, %arg3: memref<1x64xf32, #tpu.memory_space<vmem>>, %arg4: memref<1x8x8x64xbf16, #tpu.memory_space<vmem>>, %arg5: memref<10x10x64xf32, #tpu.memory_space<vmem>>) attributes {dimension_semantics = [#tpu.dimension_semantics<parallel>], iteration_bounds = array<i64: 2>, scalar_prefetch = 0 : i64, scratch_operands = 1 : i64, tpu.core_type = #tpu.core_type<tc>, window_params = [{transform_indices = @transform_0, window_bounds = array<i64: 1, 8, 8, 64>}, {pipeline_mode = #tpu.pipeline_mode<synchronous>, transform_indices = @transform_1, window_bounds = array<i64: 3, 3, 64>}, {pipeline_mode = #tpu.pipeline_mode<synchronous>, transform_indices = @transform_2, window_bounds = array<i64: 1, 64>}, {transform_indices = @transform_3, window_bounds = array<i64: 1, 8, 8, 64>}]} {
    %cst = arith.constant 0.000000e+00 : f32
    %0 = vector.broadcast %cst : f32 to vector<10x10x64xf32>
    %c0 = arith.constant 0 : index
    %c0_0 = arith.constant 0 : index
    %c0_1 = arith.constant 0 : index
    %1 = vector.load %arg5[%c0, %c0_0, %c0_1] : memref<10x10x64xf32, #tpu.memory_space<vmem>>, vector<10x10x64xf32>
    tpu.vector_store %arg5[%c0, %c0_0, %c0_1], %0 {strides = array<i32>} : memref<10x10x64xf32, #tpu.memory_space<vmem>>, vector<10x10x64xf32>,
    %c0_2 = arith.constant 0 : index
    %c0_3 = arith.constant 0 : index
    %c0_4 = arith.constant 0 : index
    %c0_5 = arith.constant 0 : index
    %2 = vector.load %arg1[%c0_2, %c0_3, %c0_4, %c0_5] : memref<1x8x8x64xbf16, #tpu.memory_space<vmem>>, vector<1x8x8x64xbf16>
    %3 = vector.shape_cast %2 : vector<1x8x8x64xbf16> to vector<8x8x64xbf16>
    %4 = arith.extf %3 : vector<8x8x64xbf16> to vector<8x8x64xf32>
    %c1 = arith.constant 1 : index
    %c1_6 = arith.constant 1 : index
    %c0_7 = arith.constant 0 : index
    %5 = vector.load %arg5[%c1, %c1_6, %c0_7] : memref<10x10x64xf32, #tpu.memory_space<vmem>>, vector<8x8x64xf32>
    tpu.vector_store %arg5[%c1, %c1_6, %c0_7], %4 {strides = array<i32>} : memref<10x10x64xf32, #tpu.memory_space<vmem>>, vector<8x8x64xf32>,
    %c0_8 = arith.constant 0 : index
    %c0_9 = arith.constant 0 : index
    %c0_10 = arith.constant 0 : index
    %6 = vector.load %arg2[%c0_8, %c0_9, %c0_10] : memref<3x3x64xf32, #tpu.memory_space<vmem>>, vector<3x3x64xf32>
    %cst_11 = arith.constant 0.000000e+00 : f32
    %7 = vector.broadcast %cst_11 : f32 to vector<8x8x64xf32>
    %c0_12 = arith.constant 0 : index
    %c0_13 = arith.constant 0 : index
    %c0_14 = arith.constant 0 : index
    %8 = vector.load %arg5[%c0_12, %c0_13, %c0_14] : memref<10x10x64xf32, #tpu.memory_space<vmem>>, vector<8x8x64xf32>
    %9 = vector.extract_strided_slice %6 {offsets = [0, 0, 0], sizes = [1, 1, 64], strides = [1, 1, 1]} : vector<3x3x64xf32> to vector<1x1x64xf32>
    %10 = vector.shape_cast %9 : vector<1x1x64xf32> to vector<64xf32>
    %11 = vector.shape_cast %10 : vector<64xf32> to vector<1x1x64xf32>
    %12 = vector.broadcast %11 : vector<1x1x64xf32> to vector<8x8x64xf32>
    %13 = arith.mulf %8, %12 : vector<8x8x64xf32>
    %14 = arith.addf %7, %13 : vector<8x8x64xf32>
    %c0_15 = arith.constant 0 : index
    %c1_16 = arith.constant 1 : index
    %c0_17 = arith.constant 0 : index
    %15 = vector.load %arg5[%c0_15, %c1_16, %c0_17] : memref<10x10x64xf32, #tpu.memory_space<vmem>>, vector<8x8x64xf32>
    %16 = vector.extract_strided_slice %6 {offsets = [0, 1, 0], sizes = [1, 1, 64], strides = [1, 1, 1]} : vector<3x3x64xf32> to vector<1x1x64xf32>
    %17 = vector.shape_cast %16 : vector<1x1x64xf32> to vector<64xf32>
    %18 = vector.shape_cast %17 : vector<64xf32> to vector<1x1x64xf32>
    %19 = vector.broadcast %18 : vector<1x1x64xf32> to vector<8x8x64xf32>
    %20 = arith.mulf %15, %19 : vector<8x8x64xf32>
    %21 = arith.addf %14, %20 : vector<8x8x64xf32>
    %c0_18 = arith.constant 0 : index
    %c2 = arith.constant 2 : index
    %c0_19 = arith.constant 0 : index
    %22 = vector.load %arg5[%c0_18, %c2, %c0_19] : memref<10x10x64xf32, #tpu.memory_space<vmem>>, vector<8x8x64xf32>
    %23 = vector.extract_strided_slice %6 {offsets = [0, 2, 0], sizes = [1, 1, 64], strides = [1, 1, 1]} : vector<3x3x64xf32> to vector<1x1x64xf32>
    %24 = vector.shape_cast %23 : vector<1x1x64xf32> to vector<64xf32>
    %25 = vector.shape_cast %24 : vector<64xf32> to vector<1x1x64xf32>
    %26 = vector.broadcast %25 : vector<1x1x64xf32> to vector<8x8x64xf32>
    %27 = arith.mulf %22, %26 : vector<8x8x64xf32>
    %28 = arith.addf %21, %27 : vector<8x8x64xf32>
    %c1_20 = arith.constant 1 : index
    %c0_21 = arith.constant 0 : index
    %c0_22 = arith.constant 0 : index
    %29 = vector.load %arg5[%c1_20, %c0_21, %c0_22] : memref<10x10x64xf32, #tpu.memory_space<vmem>>, vector<8x8x64xf32>
    %30 = vector.extract_strided_slice %6 {offsets = [1, 0, 0], sizes = [1, 1, 64], strides = [1, 1, 1]} : vector<3x3x64xf32> to vector<1x1x64xf32>
    %31 = vector.shape_cast %30 : vector<1x1x64xf32> to vector<64xf32>
    %32 = vector.shape_cast %31 : vector<64xf32> to vector<1x1x64xf32>
    %33 = vector.broadcast %32 : vector<1x1x64xf32> to vector<8x8x64xf32>
    %34 = arith.mulf %29, %33 : vector<8x8x64xf32>
    %35 = arith.addf %28, %34 : vector<8x8x64xf32>
    %c1_23 = arith.constant 1 : index
    %c1_24 = arith.constant 1 : index
    %c0_25 = arith.constant 0 : index
    %36 = vector.load %arg5[%c1_23, %c1_24, %c0_25] : memref<10x10x64xf32, #tpu.memory_space<vmem>>, vector<8x8x64xf32>
    %37 = vector.extract_strided_slice %6 {offsets = [1, 1, 0], sizes = [1, 1, 64], strides = [1, 1, 1]} : vector<3x3x64xf32> to vector<1x1x64xf32>
    %38 = vector.shape_cast %37 : vector<1x1x64xf32> to vector<64xf32>
    %39 = vector.shape_cast %38 : vector<64xf32> to vector<1x1x64xf32>
    %40 = vector.broadcast %39 : vector<1x1x64xf32> to vector<8x8x64xf32>
    %41 = arith.mulf %36, %40 : vector<8x8x64xf32>
    %42 = arith.addf %35, %41 : vector<8x8x64xf32>
    %c1_26 = arith.constant 1 : index
    %c2_27 = arith.constant 2 : index
    %c0_28 = arith.constant 0 : index
    %43 = vector.load %arg5[%c1_26, %c2_27, %c0_28] : memref<10x10x64xf32, #tpu.memory_space<vmem>>, vector<8x8x64xf32>
    %44 = vector.extract_strided_slice %6 {offsets = [1, 2, 0], sizes = [1, 1, 64], strides = [1, 1, 1]} : vector<3x3x64xf32> to vector<1x1x64xf32>
    %45 = vector.shape_cast %44 : vector<1x1x64xf32> to vector<64xf32>
    %46 = vector.shape_cast %45 : vector<64xf32> to vector<1x1x64xf32>
    %47 = vector.broadcast %46 : vector<1x1x64xf32> to vector<8x8x64xf32>
    %48 = arith.mulf %43, %47 : vector<8x8x64xf32>
    %49 = arith.addf %42, %48 : vector<8x8x64xf32>
    %c2_29 = arith.constant 2 : index
    %c0_30 = arith.constant 0 : index
    %c0_31 = arith.constant 0 : index
    %50 = vector.load %arg5[%c2_29, %c0_30, %c0_31] : memref<10x10x64xf32, #tpu.memory_space<vmem>>, vector<8x8x64xf32>
    %51 = vector.extract_strided_slice %6 {offsets = [2, 0, 0], sizes = [1, 1, 64], strides = [1, 1, 1]} : vector<3x3x64xf32> to vector<1x1x64xf32>
    %52 = vector.shape_cast %51 : vector<1x1x64xf32> to vector<64xf32>
    %53 = vector.shape_cast %52 : vector<64xf32> to vector<1x1x64xf32>
    %54 = vector.broadcast %53 : vector<1x1x64xf32> to vector<8x8x64xf32>
    %55 = arith.mulf %50, %54 : vector<8x8x64xf32>
    %56 = arith.addf %49, %55 : vector<8x8x64xf32>
    %c2_32 = arith.constant 2 : index
    %c1_33 = arith.constant 1 : index
    %c0_34 = arith.constant 0 : index
    %57 = vector.load %arg5[%c2_32, %c1_33, %c0_34] : memref<10x10x64xf32, #tpu.memory_space<vmem>>, vector<8x8x64xf32>
    %58 = vector.extract_strided_slice %6 {offsets = [2, 1, 0], sizes = [1, 1, 64], strides = [1, 1, 1]} : vector<3x3x64xf32> to vector<1x1x64xf32>
    %59 = vector.shape_cast %58 : vector<1x1x64xf32> to vector<64xf32>
    %60 = vector.shape_cast %59 : vector<64xf32> to vector<1x1x64xf32>
    %61 = vector.broadcast %60 : vector<1x1x64xf32> to vector<8x8x64xf32>
    %62 = arith.mulf %57, %61 : vector<8x8x64xf32>
    %63 = arith.addf %56, %62 : vector<8x8x64xf32>
    %c2_35 = arith.constant 2 : index
    %c2_36 = arith.constant 2 : index
    %c0_37 = arith.constant 0 : index
    %64 = vector.load %arg5[%c2_35, %c2_36, %c0_37] : memref<10x10x64xf32, #tpu.memory_space<vmem>>, vector<8x8x64xf32>
    %65 = vector.extract_strided_slice %6 {offsets = [2, 2, 0], sizes = [1, 1, 64], strides = [1, 1, 1]} : vector<3x3x64xf32> to vector<1x1x64xf32>
    %66 = vector.shape_cast %65 : vector<1x1x64xf32> to vector<64xf32>
    %67 = vector.shape_cast %66 : vector<64xf32> to vector<1x1x64xf32>
    %68 = vector.broadcast %67 : vector<1x1x64xf32> to vector<8x8x64xf32>
    %69 = arith.mulf %64, %68 : vector<8x8x64xf32>
    %70 = arith.addf %63, %69 : vector<8x8x64xf32>
    %c0_38 = arith.constant 0 : index
    %c0_39 = arith.constant 0 : index
    %71 = vector.load %arg3[%c0_38, %c0_39] : memref<1x64xf32, #tpu.memory_space<vmem>>, vector<1x64xf32>
    %72 = vector.shape_cast %71 : vector<1x64xf32> to vector<1x1x64xf32>
    %73 = vector.broadcast %72 : vector<1x1x64xf32> to vector<8x8x64xf32>
    %74 = arith.addf %70, %73 : vector<8x8x64xf32>
    %75 = arith.truncf %74 : vector<8x8x64xf32> to vector<8x8x64xbf16>
    %c0_40 = arith.constant 0 : index
    %c0_41 = arith.constant 0 : index
    %c0_42 = arith.constant 0 : index
    %c0_43 = arith.constant 0 : index
    %76 = vector.load %arg4[%c0_40, %c0_41, %c0_42, %c0_43] : memref<1x8x8x64xbf16, #tpu.memory_space<vmem>>, vector<1x8x8x64xbf16>
    %77 = vector.shape_cast %76 : vector<1x8x8x64xbf16> to vector<8x8x64xbf16>
    %78 = vector.shape_cast %75 : vector<8x8x64xbf16> to vector<1x8x8x64xbf16>
    tpu.vector_store %arg4[%c0_40, %c0_41, %c0_42, %c0_43], %78 {strides = array<i32>} : memref<1x8x8x64xbf16, #tpu.memory_space<vmem>>, vector<1x8x8x64xbf16>,
    return
  }
  func.func @transform_0(%arg0: i32) -> (i32, i32, i32, i32) {
    %c0_i32 = arith.constant 0 : i32
    %c0_i32_0 = arith.constant 0 : i32
    %c0_i32_1 = arith.constant 0 : i32
    %c0_i32_2 = arith.constant 0 : i32
    return %arg0, %c0_i32, %c0_i32_0, %c0_i32_1 : i32, i32, i32, i32
  }
  func.func @transform_1(%arg0: i32) -> (i32, i32, i32) {
    %c0_i32 = arith.constant 0 : i32
    %c0_i32_0 = arith.constant 0 : i32
    %c0_i32_1 = arith.constant 0 : i32
    %c0_i32_2 = arith.constant 0 : i32
    return %c0_i32, %c0_i32_0, %c0_i32_1 : i32, i32, i32
  }
  func.func @transform_2(%arg0: i32) -> (i32, i32) {
    %c0_i32 = arith.constant 0 : i32
    %c0_i32_0 = arith.constant 0 : i32
    %c0_i32_1 = arith.constant 0 : i32
    return %c0_i32, %c0_i32_0 : i32, i32
  }
  func.func @transform_3(%arg0: i32) -> (i32, i32, i32, i32) {
    %c0_i32 = arith.constant 0 : i32
    %c0_i32_0 = arith.constant 0 : i32
    %c0_i32_1 = arith.constant 0 : i32
    %c0_i32_2 = arith.constant 0 : i32
    return %arg0, %c0_i32, %c0_i32_0, %c0_i32_1 : i32, i32, i32, i32
  }
}

module attributes {stable_mosaic.version = 11 : i64} {
  func.func @_linear_res_kernel(%arg0: i32, %arg1: memref<128x64xbf16, #tpu.memory_space<vmem>>, %arg2: memref<64x32xf32, #tpu.memory_space<vmem>>, %arg3: memref<1x32xf32, #tpu.memory_space<vmem>>, %arg4: memref<128x32xbf16, #tpu.memory_space<vmem>>, %arg5: memref<128x32xbf16, #tpu.memory_space<vmem>>) attributes {dimension_semantics = [#tpu.dimension_semantics<parallel>], iteration_bounds = array<i64: 1>, scalar_prefetch = 0 : i64, scratch_operands = 0 : i64, tpu.core_type = #tpu.core_type<tc>, window_params = [{transform_indices = @transform_0, window_bounds = array<i64: 128, 64>}, {pipeline_mode = #tpu.pipeline_mode<synchronous>, transform_indices = @transform_1, window_bounds = array<i64: 64, 32>}, {pipeline_mode = #tpu.pipeline_mode<synchronous>, transform_indices = @transform_2, window_bounds = array<i64: 1, 32>}, {transform_indices = @transform_3, window_bounds = array<i64: 128, 32>}, {transform_indices = @transform_4, window_bounds = array<i64: 128, 32>}]} {
    %c0 = arith.constant 0 : index
    %c0_0 = arith.constant 0 : index
    %0 = vector.load %arg1[%c0, %c0_0] : memref<128x64xbf16, #tpu.memory_space<vmem>>, vector<128x64xbf16>
    %c0_1 = arith.constant 0 : index
    %c0_2 = arith.constant 0 : index
    %1 = vector.load %arg2[%c0_1, %c0_2] : memref<64x32xf32, #tpu.memory_space<vmem>>, vector<64x32xf32>
    %2 = arith.truncf %1 : vector<64x32xf32> to vector<64x32xbf16>
    %cst = arith.constant dense<0.000000e+00> : vector<128x32xf32>
    %3 = tpu.matmul %0, %2, %cst {dimension_numbers = #tpu.dot_dimension_numbers<[1], [0], [0], [1], [0, 0, 1, 1], [], []>} : vector<128x64xbf16>, vector<64x32xbf16>, vector<128x32xf32> -> vector<128x32xf32>
    %c0_3 = arith.constant 0 : index
    %c0_4 = arith.constant 0 : index
    %4 = vector.load %arg3[%c0_3, %c0_4] : memref<1x32xf32, #tpu.memory_space<vmem>>, vector<1x32xf32>
    %5 = vector.broadcast %4 : vector<1x32xf32> to vector<128x32xf32>
    %6 = arith.addf %3, %5 : vector<128x32xf32>
    %c0_5 = arith.constant 0 : index
    %c0_6 = arith.constant 0 : index
    %7 = vector.load %arg4[%c0_5, %c0_6] : memref<128x32xbf16, #tpu.memory_space<vmem>>, vector<128x32xbf16>
    %8 = arith.extf %7 : vector<128x32xbf16> to vector<128x32xf32>
    %9 = arith.addf %6, %8 : vector<128x32xf32>
    %10 = arith.truncf %9 : vector<128x32xf32> to vector<128x32xbf16>
    %c0_7 = arith.constant 0 : index
    %c0_8 = arith.constant 0 : index
    %11 = vector.load %arg5[%c0_7, %c0_8] : memref<128x32xbf16, #tpu.memory_space<vmem>>, vector<128x32xbf16>
    tpu.vector_store %arg5[%c0_7, %c0_8], %10 {strides = array<i32>} : memref<128x32xbf16, #tpu.memory_space<vmem>>, vector<128x32xbf16>,
    return
  }
  func.func @transform_0(%arg0: i32) -> (i32, i32) {
    %c0_i32 = arith.constant 0 : i32
    %c0_i32_0 = arith.constant 0 : i32
    return %arg0, %c0_i32 : i32, i32
  }
  func.func @transform_1(%arg0: i32) -> (i32, i32) {
    %c0_i32 = arith.constant 0 : i32
    %c0_i32_0 = arith.constant 0 : i32
    %c0_i32_1 = arith.constant 0 : i32
    return %c0_i32, %c0_i32_0 : i32, i32
  }
  func.func @transform_2(%arg0: i32) -> (i32, i32) {
    %c0_i32 = arith.constant 0 : i32
    %c0_i32_0 = arith.constant 0 : i32
    %c0_i32_1 = arith.constant 0 : i32
    return %c0_i32, %c0_i32_0 : i32, i32
  }
  func.func @transform_3(%arg0: i32) -> (i32, i32) {
    %c0_i32 = arith.constant 0 : i32
    %c0_i32_0 = arith.constant 0 : i32
    return %arg0, %c0_i32 : i32, i32
  }
  func.func @transform_4(%arg0: i32) -> (i32, i32) {
    %c0_i32 = arith.constant 0 : i32
    %c0_i32_0 = arith.constant 0 : i32
    return %arg0, %c0_i32 : i32, i32
  }
}

module attributes {stable_mosaic.version = 11 : i64} {
  func.func @_conv3x3_res_kernel(%arg0: i32, %arg1: memref<1x8x8x32xbf16, #tpu.memory_space<vmem>>, %arg2: memref<9x32x32xf32, #tpu.memory_space<vmem>>, %arg3: memref<1x32xf32, #tpu.memory_space<vmem>>, %arg4: memref<1x8x8x32xf32, #tpu.memory_space<vmem>>, %arg5: memref<1x8x8x32xf32, #tpu.memory_space<vmem>>, %arg6: memref<10x10x32xf32, #tpu.memory_space<vmem>>) attributes {dimension_semantics = [#tpu.dimension_semantics<parallel>], iteration_bounds = array<i64: 2>, scalar_prefetch = 0 : i64, scratch_operands = 1 : i64, tpu.core_type = #tpu.core_type<tc>, window_params = [{transform_indices = @transform_0, window_bounds = array<i64: 1, 8, 8, 32>}, {pipeline_mode = #tpu.pipeline_mode<synchronous>, transform_indices = @transform_1, window_bounds = array<i64: 9, 32, 32>}, {pipeline_mode = #tpu.pipeline_mode<synchronous>, transform_indices = @transform_2, window_bounds = array<i64: 1, 32>}, {transform_indices = @transform_3, window_bounds = array<i64: 1, 8, 8, 32>}, {transform_indices = @transform_4, window_bounds = array<i64: 1, 8, 8, 32>}]} {
    %cst = arith.constant 0.000000e+00 : f32
    %0 = vector.broadcast %cst : f32 to vector<10x10x32xf32>
    %c0 = arith.constant 0 : index
    %c0_0 = arith.constant 0 : index
    %c0_1 = arith.constant 0 : index
    %1 = vector.load %arg6[%c0, %c0_0, %c0_1] : memref<10x10x32xf32, #tpu.memory_space<vmem>>, vector<10x10x32xf32>
    tpu.vector_store %arg6[%c0, %c0_0, %c0_1], %0 {strides = array<i32>} : memref<10x10x32xf32, #tpu.memory_space<vmem>>, vector<10x10x32xf32>,
    %c0_2 = arith.constant 0 : index
    %c0_3 = arith.constant 0 : index
    %c0_4 = arith.constant 0 : index
    %c0_5 = arith.constant 0 : index
    %2 = vector.load %arg1[%c0_2, %c0_3, %c0_4, %c0_5] : memref<1x8x8x32xbf16, #tpu.memory_space<vmem>>, vector<1x8x8x32xbf16>
    %3 = vector.shape_cast %2 : vector<1x8x8x32xbf16> to vector<8x8x32xbf16>
    %4 = arith.extf %3 : vector<8x8x32xbf16> to vector<8x8x32xf32>
    %c1 = arith.constant 1 : index
    %c1_6 = arith.constant 1 : index
    %c0_7 = arith.constant 0 : index
    %5 = vector.load %arg6[%c1, %c1_6, %c0_7] : memref<10x10x32xf32, #tpu.memory_space<vmem>>, vector<8x8x32xf32>
    tpu.vector_store %arg6[%c1, %c1_6, %c0_7], %4 {strides = array<i32>} : memref<10x10x32xf32, #tpu.memory_space<vmem>>, vector<8x8x32xf32>,
    %cst_8 = arith.constant 0.000000e+00 : f32
    %6 = vector.broadcast %cst_8 : f32 to vector<64x32xf32>
    %c0_9 = arith.constant 0 : index
    %c0_10 = arith.constant 0 : index
    %c0_11 = arith.constant 0 : index
    %7 = vector.load %arg6[%c0_9, %c0_10, %c0_11] : memref<10x10x32xf32, #tpu.memory_space<vmem>>, vector<8x8x32xf32>
    %8 = arith.truncf %7 : vector<8x8x32xf32> to vector<8x8x32xbf16>
    %9 = vector.shape_cast %8 : vector<8x8x32xbf16> to vector<64x32xbf16>
    %c0_12 = arith.constant 0 : index
    %c0_13 = arith.constant 0 : index
    %c0_14 = arith.constant 0 : index
    %10 = vector.load %arg2[%c0_12, %c0_13, %c0_14] : memref<9x32x32xf32, #tpu.memory_space<vmem>>, vector<1x32x32xf32>
    %11 = vector.shape_cast %10 : vector<1x32x32xf32> to vector<32x32xf32>
    %12 = arith.truncf %11 : vector<32x32xf32> to vector<32x32xbf16>
    %cst_15 = arith.constant dense<0.000000e+00> : vector<64x32xf32>
    %13 = tpu.matmul %9, %12, %cst_15 {dimension_numbers = #tpu.dot_dimension_numbers<[1], [0], [0], [1], [0, 0, 1, 1], [], []>} : vector<64x32xbf16>, vector<32x32xbf16>, vector<64x32xf32> -> vector<64x32xf32>
    %14 = arith.addf %6, %13 : vector<64x32xf32>
    %c0_16 = arith.constant 0 : index
    %c1_17 = arith.constant 1 : index
    %c0_18 = arith.constant 0 : index
    %15 = vector.load %arg6[%c0_16, %c1_17, %c0_18] : memref<10x10x32xf32, #tpu.memory_space<vmem>>, vector<8x8x32xf32>
    %16 = arith.truncf %15 : vector<8x8x32xf32> to vector<8x8x32xbf16>
    %17 = vector.shape_cast %16 : vector<8x8x32xbf16> to vector<64x32xbf16>
    %c1_19 = arith.constant 1 : index
    %c0_20 = arith.constant 0 : index
    %c0_21 = arith.constant 0 : index
    %18 = vector.load %arg2[%c1_19, %c0_20, %c0_21] : memref<9x32x32xf32, #tpu.memory_space<vmem>>, vector<1x32x32xf32>
    %19 = vector.shape_cast %18 : vector<1x32x32xf32> to vector<32x32xf32>
    %20 = arith.truncf %19 : vector<32x32xf32> to vector<32x32xbf16>
    %cst_22 = arith.constant dense<0.000000e+00> : vector<64x32xf32>
    %21 = tpu.matmul %17, %20, %cst_22 {dimension_numbers = #tpu.dot_dimension_numbers<[1], [0], [0], [1], [0, 0, 1, 1], [], []>} : vector<64x32xbf16>, vector<32x32xbf16>, vector<64x32xf32> -> vector<64x32xf32>
    %22 = arith.addf %14, %21 : vector<64x32xf32>
    %c0_23 = arith.constant 0 : index
    %c2 = arith.constant 2 : index
    %c0_24 = arith.constant 0 : index
    %23 = vector.load %arg6[%c0_23, %c2, %c0_24] : memref<10x10x32xf32, #tpu.memory_space<vmem>>, vector<8x8x32xf32>
    %24 = arith.truncf %23 : vector<8x8x32xf32> to vector<8x8x32xbf16>
    %25 = vector.shape_cast %24 : vector<8x8x32xbf16> to vector<64x32xbf16>
    %c2_25 = arith.constant 2 : index
    %c0_26 = arith.constant 0 : index
    %c0_27 = arith.constant 0 : index
    %26 = vector.load %arg2[%c2_25, %c0_26, %c0_27] : memref<9x32x32xf32, #tpu.memory_space<vmem>>, vector<1x32x32xf32>
    %27 = vector.shape_cast %26 : vector<1x32x32xf32> to vector<32x32xf32>
    %28 = arith.truncf %27 : vector<32x32xf32> to vector<32x32xbf16>
    %cst_28 = arith.constant dense<0.000000e+00> : vector<64x32xf32>
    %29 = tpu.matmul %25, %28, %cst_28 {dimension_numbers = #tpu.dot_dimension_numbers<[1], [0], [0], [1], [0, 0, 1, 1], [], []>} : vector<64x32xbf16>, vector<32x32xbf16>, vector<64x32xf32> -> vector<64x32xf32>
    %30 = arith.addf %22, %29 : vector<64x32xf32>
    %c1_29 = arith.constant 1 : index
    %c0_30 = arith.constant 0 : index
    %c0_31 = arith.constant 0 : index
    %31 = vector.load %arg6[%c1_29, %c0_30, %c0_31] : memref<10x10x32xf32, #tpu.memory_space<vmem>>, vector<8x8x32xf32>
    %32 = arith.truncf %31 : vector<8x8x32xf32> to vector<8x8x32xbf16>
    %33 = vector.shape_cast %32 : vector<8x8x32xbf16> to vector<64x32xbf16>
    %c3 = arith.constant 3 : index
    %c0_32 = arith.constant 0 : index
    %c0_33 = arith.constant 0 : index
    %34 = vector.load %arg2[%c3, %c0_32, %c0_33] : memref<9x32x32xf32, #tpu.memory_space<vmem>>, vector<1x32x32xf32>
    %35 = vector.shape_cast %34 : vector<1x32x32xf32> to vector<32x32xf32>
    %36 = arith.truncf %35 : vector<32x32xf32> to vector<32x32xbf16>
    %cst_34 = arith.constant dense<0.000000e+00> : vector<64x32xf32>
    %37 = tpu.matmul %33, %36, %cst_34 {dimension_numbers = #tpu.dot_dimension_numbers<[1], [0], [0], [1], [0, 0, 1, 1], [], []>} : vector<64x32xbf16>, vector<32x32xbf16>, vector<64x32xf32> -> vector<64x32xf32>
    %38 = arith.addf %30, %37 : vector<64x32xf32>
    %c1_35 = arith.constant 1 : index
    %c1_36 = arith.constant 1 : index
    %c0_37 = arith.constant 0 : index
    %39 = vector.load %arg6[%c1_35, %c1_36, %c0_37] : memref<10x10x32xf32, #tpu.memory_space<vmem>>, vector<8x8x32xf32>
    %40 = arith.truncf %39 : vector<8x8x32xf32> to vector<8x8x32xbf16>
    %41 = vector.shape_cast %40 : vector<8x8x32xbf16> to vector<64x32xbf16>
    %c4 = arith.constant 4 : index
    %c0_38 = arith.constant 0 : index
    %c0_39 = arith.constant 0 : index
    %42 = vector.load %arg2[%c4, %c0_38, %c0_39] : memref<9x32x32xf32, #tpu.memory_space<vmem>>, vector<1x32x32xf32>
    %43 = vector.shape_cast %42 : vector<1x32x32xf32> to vector<32x32xf32>
    %44 = arith.truncf %43 : vector<32x32xf32> to vector<32x32xbf16>
    %cst_40 = arith.constant dense<0.000000e+00> : vector<64x32xf32>
    %45 = tpu.matmul %41, %44, %cst_40 {dimension_numbers = #tpu.dot_dimension_numbers<[1], [0], [0], [1], [0, 0, 1, 1], [], []>} : vector<64x32xbf16>, vector<32x32xbf16>, vector<64x32xf32> -> vector<64x32xf32>
    %46 = arith.addf %38, %45 : vector<64x32xf32>
    %c1_41 = arith.constant 1 : index
    %c2_42 = arith.constant 2 : index
    %c0_43 = arith.constant 0 : index
    %47 = vector.load %arg6[%c1_41, %c2_42, %c0_43] : memref<10x10x32xf32, #tpu.memory_space<vmem>>, vector<8x8x32xf32>
    %48 = arith.truncf %47 : vector<8x8x32xf32> to vector<8x8x32xbf16>
    %49 = vector.shape_cast %48 : vector<8x8x32xbf16> to vector<64x32xbf16>
    %c5 = arith.constant 5 : index
    %c0_44 = arith.constant 0 : index
    %c0_45 = arith.constant 0 : index
    %50 = vector.load %arg2[%c5, %c0_44, %c0_45] : memref<9x32x32xf32, #tpu.memory_space<vmem>>, vector<1x32x32xf32>
    %51 = vector.shape_cast %50 : vector<1x32x32xf32> to vector<32x32xf32>
    %52 = arith.truncf %51 : vector<32x32xf32> to vector<32x32xbf16>
    %cst_46 = arith.constant dense<0.000000e+00> : vector<64x32xf32>
    %53 = tpu.matmul %49, %52, %cst_46 {dimension_numbers = #tpu.dot_dimension_numbers<[1], [0], [0], [1], [0, 0, 1, 1], [], []>} : vector<64x32xbf16>, vector<32x32xbf16>, vector<64x32xf32> -> vector<64x32xf32>
    %54 = arith.addf %46, %53 : vector<64x32xf32>
    %c2_47 = arith.constant 2 : index
    %c0_48 = arith.constant 0 : index
    %c0_49 = arith.constant 0 : index
    %55 = vector.load %arg6[%c2_47, %c0_48, %c0_49] : memref<10x10x32xf32, #tpu.memory_space<vmem>>, vector<8x8x32xf32>
    %56 = arith.truncf %55 : vector<8x8x32xf32> to vector<8x8x32xbf16>
    %57 = vector.shape_cast %56 : vector<8x8x32xbf16> to vector<64x32xbf16>
    %c6 = arith.constant 6 : index
    %c0_50 = arith.constant 0 : index
    %c0_51 = arith.constant 0 : index
    %58 = vector.load %arg2[%c6, %c0_50, %c0_51] : memref<9x32x32xf32, #tpu.memory_space<vmem>>, vector<1x32x32xf32>
    %59 = vector.shape_cast %58 : vector<1x32x32xf32> to vector<32x32xf32>
    %60 = arith.truncf %59 : vector<32x32xf32> to vector<32x32xbf16>
    %cst_52 = arith.constant dense<0.000000e+00> : vector<64x32xf32>
    %61 = tpu.matmul %57, %60, %cst_52 {dimension_numbers = #tpu.dot_dimension_numbers<[1], [0], [0], [1], [0, 0, 1, 1], [], []>} : vector<64x32xbf16>, vector<32x32xbf16>, vector<64x32xf32> -> vector<64x32xf32>
    %62 = arith.addf %54, %61 : vector<64x32xf32>
    %c2_53 = arith.constant 2 : index
    %c1_54 = arith.constant 1 : index
    %c0_55 = arith.constant 0 : index
    %63 = vector.load %arg6[%c2_53, %c1_54, %c0_55] : memref<10x10x32xf32, #tpu.memory_space<vmem>>, vector<8x8x32xf32>
    %64 = arith.truncf %63 : vector<8x8x32xf32> to vector<8x8x32xbf16>
    %65 = vector.shape_cast %64 : vector<8x8x32xbf16> to vector<64x32xbf16>
    %c7 = arith.constant 7 : index
    %c0_56 = arith.constant 0 : index
    %c0_57 = arith.constant 0 : index
    %66 = vector.load %arg2[%c7, %c0_56, %c0_57] : memref<9x32x32xf32, #tpu.memory_space<vmem>>, vector<1x32x32xf32>
    %67 = vector.shape_cast %66 : vector<1x32x32xf32> to vector<32x32xf32>
    %68 = arith.truncf %67 : vector<32x32xf32> to vector<32x32xbf16>
    %cst_58 = arith.constant dense<0.000000e+00> : vector<64x32xf32>
    %69 = tpu.matmul %65, %68, %cst_58 {dimension_numbers = #tpu.dot_dimension_numbers<[1], [0], [0], [1], [0, 0, 1, 1], [], []>} : vector<64x32xbf16>, vector<32x32xbf16>, vector<64x32xf32> -> vector<64x32xf32>
    %70 = arith.addf %62, %69 : vector<64x32xf32>
    %c2_59 = arith.constant 2 : index
    %c2_60 = arith.constant 2 : index
    %c0_61 = arith.constant 0 : index
    %71 = vector.load %arg6[%c2_59, %c2_60, %c0_61] : memref<10x10x32xf32, #tpu.memory_space<vmem>>, vector<8x8x32xf32>
    %72 = arith.truncf %71 : vector<8x8x32xf32> to vector<8x8x32xbf16>
    %73 = vector.shape_cast %72 : vector<8x8x32xbf16> to vector<64x32xbf16>
    %c8 = arith.constant 8 : index
    %c0_62 = arith.constant 0 : index
    %c0_63 = arith.constant 0 : index
    %74 = vector.load %arg2[%c8, %c0_62, %c0_63] : memref<9x32x32xf32, #tpu.memory_space<vmem>>, vector<1x32x32xf32>
    %75 = vector.shape_cast %74 : vector<1x32x32xf32> to vector<32x32xf32>
    %76 = arith.truncf %75 : vector<32x32xf32> to vector<32x32xbf16>
    %cst_64 = arith.constant dense<0.000000e+00> : vector<64x32xf32>
    %77 = tpu.matmul %73, %76, %cst_64 {dimension_numbers = #tpu.dot_dimension_numbers<[1], [0], [0], [1], [0, 0, 1, 1], [], []>} : vector<64x32xbf16>, vector<32x32xbf16>, vector<64x32xf32> -> vector<64x32xf32>
    %78 = arith.addf %70, %77 : vector<64x32xf32>
    %c0_65 = arith.constant 0 : index
    %c0_66 = arith.constant 0 : index
    %79 = vector.load %arg3[%c0_65, %c0_66] : memref<1x32xf32, #tpu.memory_space<vmem>>, vector<1x32xf32>
    %80 = vector.broadcast %79 : vector<1x32xf32> to vector<64x32xf32>
    %81 = arith.addf %78, %80 : vector<64x32xf32>
    %c0_67 = arith.constant 0 : index
    %c0_68 = arith.constant 0 : index
    %c0_69 = arith.constant 0 : index
    %c0_70 = arith.constant 0 : index
    %82 = vector.load %arg4[%c0_67, %c0_68, %c0_69, %c0_70] : memref<1x8x8x32xf32, #tpu.memory_space<vmem>>, vector<1x8x8x32xf32>
    %83 = vector.shape_cast %82 : vector<1x8x8x32xf32> to vector<8x8x32xf32>
    %84 = vector.shape_cast %83 : vector<8x8x32xf32> to vector<64x32xf32>
    %85 = arith.addf %81, %84 : vector<64x32xf32>
    %86 = vector.shape_cast %85 : vector<64x32xf32> to vector<8x8x32xf32>
    %c0_71 = arith.constant 0 : index
    %c0_72 = arith.constant 0 : index
    %c0_73 = arith.constant 0 : index
    %c0_74 = arith.constant 0 : index
    %87 = vector.load %arg5[%c0_71, %c0_72, %c0_73, %c0_74] : memref<1x8x8x32xf32, #tpu.memory_space<vmem>>, vector<1x8x8x32xf32>
    %88 = vector.shape_cast %87 : vector<1x8x8x32xf32> to vector<8x8x32xf32>
    %89 = vector.shape_cast %86 : vector<8x8x32xf32> to vector<1x8x8x32xf32>
    tpu.vector_store %arg5[%c0_71, %c0_72, %c0_73, %c0_74], %89 {strides = array<i32>} : memref<1x8x8x32xf32, #tpu.memory_space<vmem>>, vector<1x8x8x32xf32>,
    return
  }
  func.func @transform_0(%arg0: i32) -> (i32, i32, i32, i32) {
    %c0_i32 = arith.constant 0 : i32
    %c0_i32_0 = arith.constant 0 : i32
    %c0_i32_1 = arith.constant 0 : i32
    %c0_i32_2 = arith.constant 0 : i32
    return %arg0, %c0_i32, %c0_i32_0, %c0_i32_1 : i32, i32, i32, i32
  }
  func.func @transform_1(%arg0: i32) -> (i32, i32, i32) {
    %c0_i32 = arith.constant 0 : i32
    %c0_i32_0 = arith.constant 0 : i32
    %c0_i32_1 = arith.constant 0 : i32
    %c0_i32_2 = arith.constant 0 : i32
    return %c0_i32, %c0_i32_0, %c0_i32_1 : i32, i32, i32
  }
  func.func @transform_2(%arg0: i32) -> (i32, i32) {
    %c0_i32 = arith.constant 0 : i32
    %c0_i32_0 = arith.constant 0 : i32
    %c0_i32_1 = arith.constant 0 : i32
    return %c0_i32, %c0_i32_0 : i32, i32
  }
  func.func @transform_3(%arg0: i32) -> (i32, i32, i32, i32) {
    %c0_i32 = arith.constant 0 : i32
    %c0_i32_0 = arith.constant 0 : i32
    %c0_i32_1 = arith.constant 0 : i32
    %c0_i32_2 = arith.constant 0 : i32
    return %arg0, %c0_i32, %c0_i32_0, %c0_i32_1 : i32, i32, i32, i32
  }
  func.func @transform_4(%arg0: i32) -> (i32, i32, i32, i32) {
    %c0_i32 = arith.constant 0 : i32
    %c0_i32_0 = arith.constant 0 : i32
    %c0_i32_1 = arith.constant 0 : i32
    %c0_i32_2 = arith.constant 0 : i32
    return %arg0, %c0_i32, %c0_i32_0, %c0_i32_1 : i32, i32, i32, i32
  }
}

</mosaic_0001>

<bundles_post_ra>
// kernel: cswinir_forward.13
= control target key start
LH: loop header
LB: loop body
LE: loop exit
PB: predicated region body
PF: predicated region fallthrough
CT: control target
= control target key end

     0   :  { %s632_s12 = smov 0   ;;  %s824_s0 = inlined_call_operand.vmem [shape: bf16[2,8,8,64], index: 0, kind: input, shape index: {}]   ;;  %s825_s1 = inlined_call_operand.vmem [shape: f32[3,3,64], index: 1, kind: input, shape index: {}]   ;;  %s826_s2 = inlined_call_operand.vmem [shape: f32[1,64], index: 2, kind: input, shape index: {}]   ;;  %s827_s3 = inlined_call_operand.vmem [shape: bf16[2,8,8,64], index: 3, kind: output, shape index: {}]  }
   0x1 LB: > { %s561_s13 = sadd.s32 4294967295, %s609_s12   ;;  %p565_p0 = scmp.ge.s32.totalorder %s609_s12, 1  ;;  %s609_s12 = sphi %s632_s12, %s13_s12  }
   0x2   : > { %p137_p1 = scmp.lt.s32.totalorder %s609_s12, 3 }
   0x4   : > { %p138_p2 = pnand %p565_p0, %p137_p1 }
   0x5   : > { %vm171_vm0 = vcmask (!%p138_p2), 523264   ;;  %vm173_vm1 = vcmask (!%p138_p2), 517120   ;;  %p642_p3 = scmp.lt.s32.totalorder (!%p138_p2), %s561_s13, 1  ;;  %v229_v0 = vlaneseq (!%p138_p2)  ;;  %v611_v1 = vmov (!%p138_p2), 0.0   ;;  %v218_v3 = vld [vmem:[%s825_s1] sm:$0x7] (!%p138_p2) }
   0x6   : > { %141 = sbr.rel (%p138_p2) target bundleno = 76 (0x4c), region = 32  ;;  %172 = vst.msk [vmem:[#allocation2] sm:$0xff] (!%p138_p2), %vm171_vm0, %v611_v1  ;;  %175 = vst.msk [vmem:[#allocation2 + $0x10] sm:$0xff] (!%p138_p2), %vm171_vm0, %v611_v1  ;;  %v219_v27 = vld [vmem:[%s825_s1 + $0x4] sm:$0x7] (!%p138_p2)  ;;  %vm497_vm2 = vcmask (!%p138_p2), 519168  }
   0x7   : > { %177 = vst.msk [vmem:[#allocation2 + $0x20] sm:$0xff] (!%p138_p2), %vm171_vm0, %v611_v1  ;;  %179 = vst.msk [vmem:[#allocation2 + $0x30] sm:$0xff] (!%p138_p2), %vm171_vm0, %v611_v1  ;;  %v230_v2 = vshrl.u32 (!%p138_p2), %v229_v0, 7  ;;  %v220_v30 = vld [vmem:[%s825_s1 + $0x8] sm:$0x7] (!%p138_p2) }
   0x8   : > { %181 = vst.msk [vmem:[#allocation2 + $0x40] sm:$0xff] (!%p138_p2), %vm171_vm0, %v611_v1  ;;  %183 = vst.msk [vmem:[#allocation2 + $0x50] sm:$0xff] (!%p138_p2), %vm171_vm0, %v611_v1 }
   0x9   : > { %185 = vst.msk [vmem:[#allocation2 + $0x60] sm:$0xff] (!%p138_p2), %vm171_vm0, %v611_v1  ;;  %187 = vst.msk [vmem:[#allocation2 + $0x70] sm:$0xff] (!%p138_p2), %vm171_vm0, %v611_v1  ;;  %v231_v4 = vsub.s32 (!%p138_p2), 0, %v230_v2  ;;  %v259_v5 = vsub.s32 (!%p138_p2), 1, %v230_v2  ;;  %v287_v6 = vsub.s32 (!%p138_p2), 2, %v230_v2 }
   0xa   : > { %189 = vst.msk [vmem:[#allocation2 + $0x80] sm:$0xff] (!%p138_p2), %vm171_vm0, %v611_v1  ;;  %191 = vst.msk [vmem:[#allocation2 + $0x90] sm:$0xff] (!%p138_p2), %vm171_vm0, %v611_v1 }
   0xb   : > { %174 = vst.msk [vmem:[#allocation2 + $0x8] sm:$0x3] (!%p138_p2), %vm173_vm1, %v611_v1  ;;  %176 = vst.msk [vmem:[#allocation2 + $0x18] sm:$0x3] (!%p138_p2), %vm173_vm1, %v611_v1  ;;  %v681_v10 = vrot.slane (!%p138_p2), %v218_v3, %v231_v4  ;;  %v683_v11 = vrot.slane (!%p138_p2), %v218_v3, %v259_v5  ;;  %v685_v12 = vrot.slane (!%p138_p2), %v218_v3, %v287_v6 }
   0xc   : > { %178 = vst.msk [vmem:[#allocation2 + $0x28] sm:$0x3] (!%p138_p2), %vm173_vm1, %v611_v1  ;;  %180 = vst.msk [vmem:[#allocation2 + $0x38] sm:$0x3] (!%p138_p2), %vm173_vm1, %v611_v1  ;;  %v704_v31 = vrot.slane (!%p138_p2), %v219_v27, %v231_v4  ;;  %v706_v33 = vrot.slane (!%p138_p2), %v219_v27, %v259_v5  ;;  %v708_v36 = vrot.slane (!%p138_p2), %v219_v27, %v287_v6 }
   0xd   : > { %182 = vst.msk [vmem:[#allocation2 + $0x48] sm:$0x3] %vm173_vm1, %v611_v1  ;;  %184 = vst.msk [vmem:[#allocation2 + $0x58] sm:$0x3] %vm173_vm1, %v611_v1  ;;  %s830_s13 = smov (!%p642_p3, %s561_s13), 1  ;;  %v221_v22 = vld [vmem:[#allocation2] sm:$0xff]  ;;  %v710_v37 = vrot.slane %v220_v30, %v231_v4  ;;  %v713_v41 = vrot.slane %v220_v30, %v259_v5  ;;  %v716_v44 = vrot.slane %v220_v30, %v287_v6 }
   0xe   : > { %186 = vst.msk [vmem:[#allocation2 + $0x68] sm:$0x3] %vm173_vm1, %v611_v1  ;;  %188 = vst.msk [vmem:[#allocation2 + $0x78] sm:$0x3] %vm173_vm1, %v611_v1  ;;  %s573_s17 = sshll.u32 %s830_s13, 5  ;;  %v233_v25 = vmul.f32 %v681_v10, %v221_v22 }
   0xf   : > { %190 = vst.msk [vmem:[#allocation2 + $0x88] sm:$0x3] %vm173_vm1, %v611_v1  ;;  %192 = vst.msk [vmem:[#allocation2 + $0x98] sm:$0x3] %vm173_vm1, %v611_v1  ;;  %s165_s20 = scalar_lea.vmem %s824_s0, %s573_s17  ;;  %s758_s29 = scalar_lea.vmem %s827_s3, %s573_s17 }
  0x10   : > { %v576_v7 = vld [vmem:[%s165_s20] sm:$0xff]   ;;  %v591_v8 = vld [vmem:[%s165_s20 + $0x8] sm:$0xff]   ;;  %v592_v9 = vld [vmem:[%s165_s20 + $0x10] sm:$0xff]  }
  0x11   : > { %v577_v13 = vunpack.c.l.bf16 %v576_v7  ;;  %v578_v14 = vunpack.c.h.bf16 %v576_v7  ;;  %v581_v15 = vunpack.c.l.bf16 %v591_v8  ;;  %v582_v16 = vunpack.c.h.bf16 %v591_v8  ;;  %v593_v17 = vld [vmem:[%s165_s20 + $0x18] sm:$0xff]  }
  0x12   : > { %v585_v18 = vunpack.c.l.bf16 %v592_v9  ;;  %v586_v19 = vunpack.c.h.bf16 %v592_v9  ;;  %v589_v20 = vunpack.c.l.bf16 %v593_v17  ;;  %v590_v21 = vunpack.c.h.bf16 %v593_v17  ;;  %v249_v23 = vld [vmem:[#allocation2 + $0x1] sm:$0xff] }
  0x13   : > { %v277_v24 = vld [vmem:[#allocation2 + $0x2] sm:$0xff]  ;;  %210 = vst.msk [vmem:[#allocation2 + $0x11] sm:$0xff] %vm171_vm0, %v577_v13  ;;  %211 = vst.msk [vmem:[#allocation2 + $0x21] sm:$0xff] %vm171_vm0, %v578_v14  ;;  %v261_v26 = vmul.f32 %v683_v11, %v249_v23 }
  0x14   : > { %212 = vst.msk [vmem:[#allocation2 + $0x31] sm:$0xff] %vm171_vm0, %v581_v15  ;;  %213 = vst.msk [vmem:[#allocation2 + $0x41] sm:$0xff] %vm171_vm0, %v582_v16  ;;  %v289_v29 = vmul.f32 %v685_v12, %v277_v24 }
  0x15   : > { %214 = vst.msk [vmem:[#allocation2 + $0x51] sm:$0xff] %vm171_vm0, %v585_v18  ;;  %215 = vst.msk [vmem:[#allocation2 + $0x61] sm:$0xff] %vm171_vm0, %v586_v19  ;;  %v269_v28 = vadd.f32 %v261_v26, %v233_v25  ;;  %v743_v26 = vld [vmem:[%s826_s2] ss:$0 sm:$0xff] }
  0x16   : > { %216 = vst.msk [vmem:[#allocation2 + $0x71] sm:$0xff] %vm171_vm0, %v589_v20  ;;  %217 = vst.msk [vmem:[#allocation2 + $0x81] sm:$0xff] %vm171_vm0, %v590_v21 }
  0x17   : > { %v297_v32 = vadd.f32 %v289_v29, %v269_v28 }
  0x1a   : > { %v305_v34 = vld [vmem:[#allocation2 + $0x10] sm:$0xff]  ;;  %v390_v40 = vld [vmem:[#allocation2 + $0x20] sm:$0xff] }
  0x1b   : > { %v333_v35 = vld [vmem:[#allocation2 + $0x11] sm:$0xff]  ;;  %v317_v38 = vmul.f32 %v704_v31, %v305_v34  ;;  %v234_v42 = vmul.f32 %v305_v34, %v681_v10  ;;  %v418_v43 = vld [vmem:[#allocation2 + $0x21] sm:$0xff]  ;;  %v402_v50 = vmul.f32 %v710_v37, %v390_v40  ;;  %v235_v57 = vmul.f32 %v390_v40, %v681_v10 }
  0x1c   : > { %v361_v39 = vld [vmem:[#allocation2 + $0x12] sm:$0xff]  ;;  %v262_v45 = vmul.f32 %v333_v35, %v683_v11  ;;  %v345_v47 = vmul.f32 %v706_v33, %v333_v35  ;;  %v446_v48 = vld [vmem:[#allocation2 + $0x22] sm:$0xff]  ;;  %v430_v54 = vmul.f32 %v713_v41, %v418_v43  ;;  %v263_v58 = vmul.f32 %v418_v43, %v683_v11 }
  0x1d   : > { %v325_v46 = vadd.f32 %v317_v38, %v297_v32  ;;  %v373_v49 = vmul.f32 %v708_v36, %v361_v39  ;;  %v290_v52 = vmul.f32 %v361_v39, %v685_v12  ;;  %v391_v55 = vld [vmem:[#allocation2 + $0x30] sm:$0xff]  ;;  %v458_v59 = vmul.f32 %v716_v44, %v446_v48  ;;  %v392_v14 = vld [vmem:[#allocation2 + $0x40] sm:$0xff] }
  0x1e   : > { %v270_v51 = vadd.f32 %v262_v45, %v234_v42  ;;  %v419_v56 = vld [vmem:[#allocation2 + $0x31] sm:$0xff]  ;;  %v318_v61 = vmul.f32 %v390_v40, %v704_v31  ;;  %v346_v62 = vmul.f32 %v418_v43, %v706_v33  ;;  %v374_v0 = vmul.f32 %v446_v48, %v708_v36  ;;  %v420_v20 = vld [vmem:[#allocation2 + $0x41] sm:$0xff] }
  0x1f   : > { %v353_v53 = vadd.f32 %v345_v47, %v325_v46  ;;  %v447_v1 = vld [vmem:[#allocation2 + $0x32] sm:$0xff]  ;;  %v271_v2 = vadd.f32 %v263_v58, %v235_v57  ;;  %v291_v3 = vmul.f32 %v446_v48, %v685_v12  ;;  %v403_v5 = vmul.f32 %v710_v37, %v391_v55  ;;  %v448_v23 = vld [vmem:[#allocation2 + $0x42] sm:$0xff] }
  0x20   : > { %v298_v60 = vadd.f32 %v290_v52, %v270_v51  ;;  %v431_v6 = vmul.f32 %v713_v41, %v419_v56  ;;  %v236_v7 = vmul.f32 %v391_v55, %v681_v10  ;;  %v319_v13 = vmul.f32 %v391_v55, %v704_v31  ;;  %v393_v38 = vld [vmem:[#allocation2 + $0x50] sm:$0xff] }
  0x21   : > { %v381_v63 = vadd.f32 %v373_v49, %v353_v53  ;;  %v299_v9 = vadd.f32 %v291_v3, %v271_v2  ;;  %v264_v15 = vmul.f32 %v419_v56, %v683_v11  ;;  %v459_v17 = vmul.f32 %v716_v44, %v447_v1  ;;  %v421_v49 = vld [vmem:[#allocation2 + $0x51] sm:$0xff] }
  0x22   : > { %v326_v4 = vadd.f32 %v318_v61, %v298_v60  ;;  %v347_v18 = vmul.f32 %v419_v56, %v706_v33  ;;  %v375_v19 = vmul.f32 %v447_v1, %v708_v36  ;;  %v292_v25 = vmul.f32 %v447_v1, %v685_v12  ;;  %v449_v58 = vld [vmem:[#allocation2 + $0x52] sm:$0xff] }
  0x23   : > { %v410_v8 = vadd.f32 %v402_v50, %v381_v63  ;;  %v327_v22 = vadd.f32 %v319_v13, %v299_v9  ;;  %v272_v24 = vadd.f32 %v264_v15, %v236_v7  ;;  %v404_v28 = vmul.f32 %v710_v37, %v392_v14 }
  0x24   : > { %v354_v16 = vadd.f32 %v346_v62, %v326_v4  ;;  %v320_v29 = vmul.f32 %v392_v14, %v704_v31  ;;  %v237_v30 = vmul.f32 %v392_v14, %v681_v10  ;;  %v265_v39 = vmul.f32 %v420_v20, %v683_v11  ;;  %v394_v4 = vld [vmem:[#allocation2 + $0x60] sm:$0xff] }
  0x25   : > { %v438_v21 = vadd.f32 %v430_v54, %v410_v8  ;;  %v355_v34 = vadd.f32 %v347_v18, %v327_v22  ;;  %v300_v35 = vadd.f32 %v292_v25, %v272_v24  ;;  %v432_v42 = vmul.f32 %v713_v41, %v420_v20  ;;  %v450_v25 = vld [vmem:[#allocation2 + $0x62] sm:$0xff] }
  0x26   : > { %v382_v27 = vadd.f32 %v374_v0, %v354_v16  ;;  %v348_v43 = vmul.f32 %v420_v20, %v706_v33  ;;  %v293_v45 = vmul.f32 %v448_v23, %v685_v12  ;;  %v273_v50 = vadd.f32 %v265_v39, %v237_v30  ;;  %v422_v16 = vld [vmem:[#allocation2 + $0x61] sm:$0xff] }
  0x27   : > { %v466_v32 = vadd.f32 %v458_v59, %v438_v21  ;;  %v383_v47 = vadd.f32 %v375_v19, %v355_v34  ;;  %v328_v48 = vadd.f32 %v320_v29, %v300_v35  ;;  %v460_v52 = vmul.f32 %v716_v44, %v448_v23  ;;  %v395_v29 = vld [vmem:[#allocation2 + $0x70] sm:$0xff] }
  0x28   : > { %v411_v40 = vadd.f32 %v403_v5, %v382_v27  ;;  %v376_v53 = vmul.f32 %v448_v23, %v708_v36  ;;  %v321_v54 = vmul.f32 %v393_v38, %v704_v31  ;;  %v301_v59 = vadd.f32 %v293_v45, %v273_v50 }
  0x29   : > { %v481_v46 = vadd.f32 %v743_v26, %v466_v32  ;;  %v412_v56 = vadd.f32 %v404_v28, %v383_v47  ;;  %v356_v57 = vadd.f32 %v348_v43, %v328_v48  ;;  %v405_v61 = vmul.f32 %v710_v37, %v393_v38  ;;  %v423_v43 = vld [vmem:[#allocation2 + $0x71] sm:$0xff] }
  0x2a   : > { %v439_v51 = vadd.f32 %v431_v6, %v411_v40  ;;  %v238_v62 = vmul.f32 %v393_v38, %v681_v10  ;;  %v266_v63 = vmul.f32 %v421_v49, %v683_v11  ;;  %v329_v2 = vadd.f32 %v321_v54, %v301_v59 }
  0x2b   : > { %v489_v55 = vpack.c.bf16 %v481_v46, %v481_v46  ;;  %v440_v0 = vadd.f32 %v432_v42, %v412_v56  ;;  %v384_v1 = vadd.f32 %v376_v53, %v356_v57  ;;  %v349_v3 = vmul.f32 %v421_v49, %v706_v33 }
  0x2c   : > { %v467_v60 = vadd.f32 %v459_v17, %v439_v51  ;;  %v433_v6 = vmul.f32 %v713_v41, %v421_v49  ;;  %v274_v7 = vadd.f32 %v266_v63, %v238_v62  ;;  %v294_v8 = vmul.f32 %v449_v58, %v685_v12 }
  0x2d   : > { %498 = vst.msk [vmem:[%s758_s29] sm:$0xf] %vm497_vm2, %v489_v55  ;;  %v468_v9 = vadd.f32 %v460_v52, %v440_v0  ;;  %v413_v13 = vadd.f32 %v405_v61, %v384_v1  ;;  %v357_v14 = vadd.f32 %v349_v3, %v329_v2  ;;  %v377_v15 = vmul.f32 %v449_v58, %v708_v36  ;;  %v451_v52 = vld [vmem:[#allocation2 + $0x72] sm:$0xff]  ;;  %v396_v55 = vld [vmem:[#allocation2 + $0x80] sm:$0xff] }
  0x2e   : > { %v482_v5 = vadd.f32 %v743_v26, %v467_v60  ;;  %v461_v18 = vmul.f32 %v716_v44, %v449_v58  ;;  %v302_v19 = vadd.f32 %v294_v8, %v274_v7  ;;  %v322_v20 = vmul.f32 %v394_v4, %v704_v31 }
  0x2f   : > { %v483_v21 = vadd.f32 %v743_v26, %v468_v9  ;;  %v441_v22 = vadd.f32 %v433_v6, %v413_v13  ;;  %v385_v23 = vadd.f32 %v377_v15, %v357_v14  ;;  %v406_v24 = vmul.f32 %v710_v37, %v394_v4  ;;  %v424_v6 = vld [vmem:[#allocation2 + $0x81] sm:$0xff] }
  0x30   : > { %v490_v17 = vpack.c.bf16 %v482_v5, %v482_v5  ;;  %v330_v27 = vadd.f32 %v322_v20, %v302_v19  ;;  %v350_v28 = vmul.f32 %v422_v16, %v706_v33  ;;  %v239_v30 = vmul.f32 %v394_v4, %v681_v10  ;;  %v452_v15 = vld [vmem:[#allocation2 + $0x82] sm:$0xff] }
  0x31   : > { %v267_v32 = vmul.f32 %v422_v16, %v683_v11  ;;  %v491_v34 = vpack.c.bf16 %v483_v21, %v483_v21  ;;  %v469_v35 = vadd.f32 %v461_v18, %v441_v22  ;;  %v414_v38 = vadd.f32 %v406_v24, %v385_v23 }
  0x32   : > { %499 = vst.msk [vmem:[%s758_s29 + $0x4] sm:$0xf] %vm497_vm2, %v490_v17  ;;  %v434_v39 = vmul.f32 %v713_v41, %v422_v16  ;;  %v358_v40 = vadd.f32 %v350_v28, %v330_v27  ;;  %v378_v42 = vmul.f32 %v450_v25, %v708_v36  ;;  %v295_v46 = vmul.f32 %v450_v25, %v685_v12  ;;  %v397_v16 = vld [vmem:[#allocation2 + $0x90] sm:$0xff] }
  0x33   : > { %v275_v45 = vadd.f32 %v267_v32, %v239_v30  ;;  %500 = vst.msk [vmem:[%s758_s29 + $0x8] sm:$0xf] %vm497_vm2, %v491_v34  ;;  %v484_v47 = vadd.f32 %v743_v26, %v469_v35  ;;  %v462_v49 = vmul.f32 %v716_v44, %v450_v25  ;;  %v407_v50 = vmul.f32 %v710_v37, %v395_v29  ;;  %v425_v27 = vld [vmem:[#allocation2 + $0x91] sm:$0xff] }
  0x34   : > { %v442_v48 = vadd.f32 %v434_v39, %v414_v38  ;;  %v386_v51 = vadd.f32 %v378_v42, %v358_v40  ;;  %v323_v54 = vmul.f32 %v395_v29, %v704_v31  ;;  %v240_v56 = vmul.f32 %v395_v29, %v681_v10  ;;  %v453_v29 = vld [vmem:[#allocation2 + $0x92] sm:$0xff] }
  0x35   : > { %v303_v53 = vadd.f32 %v295_v46, %v275_v45  ;;  %v492_v57 = vpack.c.bf16 %v484_v47, %v484_v47  ;;  %v268_v59 = vmul.f32 %v423_v43, %v683_v11  ;;  %v435_v61 = vmul.f32 %v713_v41, %v423_v43 }
  0x36   : > { %v470_v58 = vadd.f32 %v462_v49, %v442_v48  ;;  %v415_v60 = vadd.f32 %v407_v50, %v386_v51  ;;  %v351_v63 = vmul.f32 %v423_v43, %v706_v33  ;;  %v296_v2 = vmul.f32 %v451_v52, %v685_v12 }
  0x37   : > { %v331_v62 = vadd.f32 %v323_v54, %v303_v53  ;;  %501 = vst.msk [vmem:[%s758_s29 + $0xc] sm:$0xf] %vm497_vm2, %v492_v57  ;;  %v276_v1 = vadd.f32 %v268_v59, %v240_v56  ;;  %v324_v10 = vmul.f32 %v396_v55, %v704_v31  ;;  %v463_v4 = vmul.f32 %v716_v44, %v451_v52 }
  0x38   : > { %v485_v0 = vadd.f32 %v743_v26, %v470_v58  ;;  %v443_v3 = vadd.f32 %v435_v61, %v415_v60  ;;  %v379_v5 = vmul.f32 %v451_v52, %v708_v36  ;;  %v408_v14 = vmul.f32 %v710_v37, %v396_v55 }
  0x39   : > { %v359_v11 = vadd.f32 %v351_v63, %v331_v62  ;;  %v304_v8 = vadd.f32 %v296_v2, %v276_v1  ;;  %v352_v31 = vmul.f32 %v424_v6, %v706_v33  ;;  %v436_v19 = vmul.f32 %v713_v41, %v424_v6 }
  0x3a   : > { %v493_v7 = vpack.c.bf16 %v485_v0, %v485_v0  ;;  %v471_v9 = vadd.f32 %v463_v4, %v443_v3  ;;  %v380_v21 = vmul.f32 %v452_v15, %v708_v36  ;;  %v409_v22 = vmul.f32 %v710_v37, %v397_v16 }
  0x3b   : > { %v387_v13 = vadd.f32 %v379_v5, %v359_v11  ;;  %v332_v12 = vadd.f32 %v324_v10, %v304_v8  ;;  %v464_v25 = vmul.f32 %v716_v44, %v452_v15  ;;  %v437_v32 = vmul.f32 %v713_v41, %v425_v27 }
  0x3c   : > { %502 = vst.msk [vmem:[%s758_s29 + $0x10] sm:$0xf] %vm497_vm2, %v493_v7  ;;  %v486_v17 = vadd.f32 %v743_v26, %v471_v9  ;;  %v465_v37 = vmul.f32 %v716_v44, %v453_v29 }
  0x3d   : > { %v416_v18 = vadd.f32 %v408_v14, %v387_v13  ;;  %v360_v20 = vadd.f32 %v352_v31, %v332_v12 }
  0x3e   : > { %v494_v23 = vpack.c.bf16 %v486_v17, %v486_v17 }
  0x3f   : > { %v444_v24 = vadd.f32 %v436_v19, %v416_v18  ;;  %v388_v28 = vadd.f32 %v380_v21, %v360_v20 }
  0x40   : > { %503 = vst.msk [vmem:[%s758_s29 + $0x14] sm:$0xf] %vm497_vm2, %v494_v23 }
  0x41   : > { %v472_v33 = vadd.f32 %v464_v25, %v444_v24  ;;  %v417_v30 = vadd.f32 %v409_v22, %v388_v28 }
  0x43   : > { %v487_v34 = vadd.f32 %v743_v26, %v472_v33  ;;  %v445_v36 = vadd.f32 %v437_v32, %v417_v30 }
  0x45   : > { %v495_v35 = vpack.c.bf16 %v487_v34, %v487_v34  ;;  %v473_v38 = vadd.f32 %v465_v37, %v445_v36 }
  0x47   : > { %504 = vst.msk [vmem:[%s758_s29 + $0x18] sm:$0xf] %vm497_vm2, %v495_v35  ;;  %v488_v39 = vadd.f32 %v743_v26, %v473_v38 }
  0x49   : > { %v496_v40 = vpack.c.bf16 %v488_v39, %v488_v39 }
  0x4b   : > { %505 = vst.msk [vmem:[%s758_s29 + $0x1c] sm:$0xf] %vm497_vm2, %v496_v40 }
  0x4c PF: > { %s13_s12 = sadd.s32 1, %s609_s12  }
  0x4d   : > { %p10_p4 = scmp.ge.s32.totalorder %s13_s12, 4  }
  0x4f   :  { %12 = sbr.rel (!%p10_p4) target bundleno = 1 (0x1), region = 64 }

// kernel: cswinir_forward.12
= control target key start
LH: loop header
LB: loop body
LE: loop exit
PB: predicated region body
PF: predicated region fallthrough
CT: control target
= control target key end

     0   :  { %vm53_vm0 = vcmask 261120   ;;  %vm515_vm1 = vcmask 519168   ;;  %s1067_s0 = inlined_call_operand.vmem [shape: bf16[128,32], index: 0, kind: input, shape index: {}]   ;;  %s1068_s3 = inlined_call_operand.vmem [shape: f32[32,64], index: 3, kind: input, shape index: {}]   ;;  %s1069_s1 = inlined_call_operand.vmem [shape: f32[1,32], index: 1, kind: input, shape index: {}]   ;;  %s1070_s2 = inlined_call_operand.vmem [shape: f32[1,32], index: 2, kind: input, shape index: {}]   ;;  %s1071_s4 = inlined_call_operand.vmem [shape: f32[1,64], index: 4, kind: input, shape index: {}]   ;;  %s1072_s5 = inlined_call_operand.vmem [shape: bf16[128,64], index: 5, kind: output, shape index: {}]  }
   0x1   :  { %v717_v0 = vld [vmem:[%s1067_s0] sm:$0xff]   ;;  %v731_v6 = vld [vmem:[%s1067_s0 + $0x8] sm:$0xff]   ;;  %v759_v18 = vld [vmem:[%s1067_s0 + $0x10] sm:$0xff]  }
   0x2   :  { %v722_v1 = vld [vmem:[%s1067_s0 + $0x20] sm:$0xff]   ;;  %v581_v2 = vunpack.c.l.bf16 %v717_v0  ;;  %v582_v4 = vunpack.c.h.bf16 %v717_v0  ;;  %v585_v11 = vunpack.c.l.bf16 %v731_v6  ;;  %v586_v12 = vunpack.c.h.bf16 %v731_v6  ;;  %v746_v13 = vld [vmem:[%s1067_s0 + $0x28] sm:$0xff]   ;;  %v772_v23 = vld [vmem:[%s1067_s0 + $0x30] sm:$0xff]  }
   0x3   :  { %v597_v3 = vunpack.c.l.bf16 %v722_v1  ;;  %v598_v5 = vunpack.c.h.bf16 %v722_v1  ;;  %v601_v16 = vunpack.c.l.bf16 %v746_v13  ;;  %v602_v17 = vunpack.c.h.bf16 %v746_v13  ;;  %v785_v28 = vld [vmem:[%s1067_s0 + $0x18] sm:$0xff]  }
   0x4   :  { %v54_v7 = vsel %vm53_vm0, %v581_v2, 0.0  ;;  %v57_v9 = vsel %vm53_vm0, %v582_v4, 0.0  ;;  %v60_v14 = vsel %vm53_vm0, %v585_v11, 0.0  ;;  %v63_v15 = vsel %vm53_vm0, %v586_v12, 0.0  ;;  %v798_v33 = vld [vmem:[%s1067_s0 + $0x38] sm:$0xff]  }
   0x5   :  { %v78_v8 = vsel %vm53_vm0, %v597_v3, 0.0  ;;  %55 = vadd.xlane.f32.xlu0 %v54_v7  ;;  %v81_v10 = vsel %vm53_vm0, %v598_v5, 0.0  ;;  %v84_v19 = vsel %vm53_vm0, %v601_v16, 0.0  ;;  %v87_v20 = vsel %vm53_vm0, %v602_v17, 0.0 }
   0x6   :  { %79 = vadd.xlane.f32.xlu1 %v78_v8  ;;  %v589_v21 = vunpack.c.l.bf16 %v759_v18  ;;  %v590_v22 = vunpack.c.h.bf16 %v759_v18  ;;  %v605_v26 = vunpack.c.l.bf16 %v772_v23  ;;  %v606_v27 = vunpack.c.h.bf16 %v772_v23 }
   0x7   :  { %v593_v31 = vunpack.c.l.bf16 %v785_v28  ;;  %v594_v32 = vunpack.c.h.bf16 %v785_v28  ;;  %v609_v36 = vunpack.c.l.bf16 %v798_v33  ;;  %v610_v37 = vunpack.c.h.bf16 %v798_v33 }
   0x8   :  { %v66_v24 = vsel %vm53_vm0, %v589_v21, 0.0  ;;  %v69_v25 = vsel %vm53_vm0, %v590_v22, 0.0  ;;  %v90_v29 = vsel %vm53_vm0, %v605_v26, 0.0  ;;  %v93_v30 = vsel %vm53_vm0, %v606_v27, 0.0 }
   0x9   :  { %58 = vadd.xlane.f32.xlu0 %v57_v9  ;;  %v72_v34 = vsel %vm53_vm0, %v593_v31, 0.0  ;;  %v75_v35 = vsel %vm53_vm0, %v594_v32, 0.0  ;;  %v96_v38 = vsel %vm53_vm0, %v609_v36, 0.0  ;;  %v99_v39 = vsel %vm53_vm0, %v610_v37, 0.0 }
   0xa   :  { %82 = vadd.xlane.f32.xlu1 %v81_v10 }
   0xd   :  { %61 = vadd.xlane.f32.xlu0 %v60_v14 }
   0xe   :  { %64 = vadd.xlane.f32.xlu1 %v63_v15 }
  0x11   :  { %85 = vadd.xlane.f32.xlu0 %v84_v19 }
  0x12   :  { %88 = vadd.xlane.f32.xlu1 %v87_v20 }
  0x15   :  { %67 = vadd.xlane.f32.xlu0 %v66_v24 }
  0x16   :  { %70 = vadd.xlane.f32.xlu1 %v69_v25 }
  0x19   :  { %91 = vadd.xlane.f32.xlu0 %v90_v29 }
  0x1a   :  { %94 = vadd.xlane.f32.xlu1 %v93_v30 }
  0x1d   :  { %73 = vadd.xlane.f32.xlu0 %v72_v34 }
  0x1e   :  { %76 = vadd.xlane.f32.xlu1 %v75_v35 }
  0x21   :  { %97 = vadd.xlane.f32.xlu0 %v96_v38 }
  0x22   :  { %100 = vadd.xlane.f32.xlu1 %v99_v39 }
  0x92   :  { %v56_v40 = vpop.xlane.xlu0 %55 }
  0x93   :  { %v80_v41 = vpop.xlane.xlu1 %79  ;;  %v103_v42 = vmul.f32 0.03125, %v56_v40 }
  0x94   :  { %v111_v43 = vmul.f32 0.03125, %v80_v41 }
  0x95   :  { %v814_v44 = vsub.f32 %v581_v2, %v103_v42 }
  0x96   :  { %v816_v45 = vsub.f32 %v597_v3, %v111_v43  ;;  %v59_v46 = vpop.xlane.xlu0 %58 }
  0x97   :  { %v83_v47 = vpop.xlane.xlu1 %82  ;;  %v104_v48 = vmul.f32 0.03125, %v59_v46  ;;  %v135_v50 = vmul.f32 %v814_v44, %v814_v44 }
  0x98   :  { %v112_v49 = vmul.f32 0.03125, %v83_v47  ;;  %v143_v51 = vmul.f32 %v816_v45, %v816_v45 }
  0x99   :  { %v824_v52 = vsub.f32 %v582_v4, %v104_v48  ;;  %v151_v54 = vsel %vm53_vm0, %v135_v50, 0.0 }
  0x9a   :  { %v828_v53 = vsub.f32 %v598_v5, %v112_v49  ;;  %152 = vadd.xlane.f32.xlu0 %v151_v54  ;;  %v62_v55 = vpop.xlane.xlu0 %61  ;;  %v175_v57 = vsel %vm53_vm0, %v143_v51, 0.0 }
  0x9b   :  { %v65_v56 = vpop.xlane.xlu1 %64  ;;  %v105_v58 = vmul.f32 0.03125, %v62_v55  ;;  %v136_v60 = vmul.f32 %v824_v52, %v824_v52 }
  0x9c   :  { %v106_v59 = vmul.f32 0.03125, %v65_v56  ;;  %v144_v61 = vmul.f32 %v828_v53, %v828_v53 }
  0x9d   :  { %v838_v62 = vsub.f32 %v585_v11, %v105_v58  ;;  %v154_v0 = vsel %vm53_vm0, %v136_v60, 0.0 }
  0x9e   :  { %v842_v63 = vsub.f32 %v586_v12, %v106_v59  ;;  %176 = vadd.xlane.f32.xlu0 %v175_v57  ;;  %155 = vadd.xlane.f32.xlu1 %v154_v0  ;;  %v86_v1 = vpop.xlane.xlu0 %85  ;;  %v178_v3 = vsel %vm53_vm0, %v144_v61, 0.0 }
  0x9f   :  { %v89_v2 = vpop.xlane.xlu1 %88  ;;  %v113_v4 = vmul.f32 0.03125, %v86_v1  ;;  %v137_v7 = vmul.f32 %v838_v62, %v838_v62  ;;  %v319_v1 = vld [vmem:[%s1068_s3 + $0x10] sm:$0xff] }
  0xa0   :  { %v114_v5 = vmul.f32 0.03125, %v89_v2  ;;  %v138_v8 = vmul.f32 %v842_v63, %v842_v63  ;;  %v320_v2 = vld [vmem:[%s1068_s3 + $0x18] sm:$0xff] }
  0xa1   :  { %v852_v6 = vsub.f32 %v601_v16, %v113_v4  ;;  %v157_v10 = vsel %vm53_vm0, %v137_v7, 0.0 }
  0xa2   :  { %v856_v9 = vsub.f32 %v602_v17, %v114_v5  ;;  %179 = vadd.xlane.f32.xlu1 %v178_v3  ;;  %158 = vadd.xlane.f32.xlu0 %v157_v10  ;;  %v68_v11 = vpop.xlane.xlu0 %67  ;;  %v160_v14 = vsel %vm53_vm0, %v138_v8, 0.0  ;;  %v322_v3 = vpack.c.bf16 %v320_v2, %v319_v1 }
  0xa3   :  { %v71_v12 = vpop.xlane.xlu1 %70  ;;  %v107_v15 = vmul.f32 0.03125, %v68_v11  ;;  %v145_v20 = vmul.f32 %v852_v6, %v852_v6 }
  0xa4   :  { %v108_v19 = vmul.f32 0.03125, %v71_v12  ;;  %v146_v16 = vmul.f32 %v856_v9, %v856_v9 }
  0xa5   :  { %v866_v13 = vsub.f32 %v589_v21, %v107_v15  ;;  %v181_v24 = vsel %vm53_vm0, %v145_v20, 0.0 }
  0xa6   :  { %v870_v17 = vsub.f32 %v590_v22, %v108_v19  ;;  %161 = vadd.xlane.f32.xlu1 %v160_v14  ;;  %182 = vadd.xlane.f32.xlu0 %v181_v24  ;;  %v92_v25 = vpop.xlane.xlu0 %91  ;;  %v184_v30 = vsel %vm53_vm0, %v146_v16, 0.0 }
  0xa7   :  { %v95_v29 = vpop.xlane.xlu1 %94  ;;  %v115_v34 = vmul.f32 0.03125, %v92_v25  ;;  %v139_v38 = vmul.f32 %v866_v13, %v866_v13 }
  0xa8   :  { %v116_v35 = vmul.f32 0.03125, %v95_v29  ;;  %v140_v21 = vmul.f32 %v870_v17, %v870_v17 }
  0xa9   :  { %v880_v18 = vsub.f32 %v605_v26, %v115_v34  ;;  %v163_v39 = vsel %vm53_vm0, %v139_v38, 0.0 }
  0xaa   :  { %v884_v22 = vsub.f32 %v606_v27, %v116_v35  ;;  %185 = vadd.xlane.f32.xlu1 %v184_v30  ;;  %164 = vadd.xlane.f32.xlu0 %v163_v39  ;;  %v74_v40 = vpop.xlane.xlu0 %73  ;;  %v166_v42 = vsel %vm53_vm0, %v140_v21, 0.0 }
  0xab   :  { %v77_v41 = vpop.xlane.xlu1 %76  ;;  %v109_v43 = vmul.f32 0.03125, %v74_v40  ;;  %v147_v47 = vmul.f32 %v880_v18, %v880_v18 }
  0xac   :  { %v110_v46 = vmul.f32 0.03125, %v77_v41  ;;  %v148_v26 = vmul.f32 %v884_v22, %v884_v22 }
  0xad   :  { %v894_v23 = vsub.f32 %v593_v31, %v109_v43  ;;  %v187_v48 = vsel %vm53_vm0, %v147_v47, 0.0 }
  0xae   :  { %v898_v27 = vsub.f32 %v594_v32, %v110_v46  ;;  %167 = vadd.xlane.f32.xlu1 %v166_v42  ;;  %188 = vadd.xlane.f32.xlu0 %v187_v48  ;;  %v98_v49 = vpop.xlane.xlu0 %97  ;;  %v190_v51 = vsel %vm53_vm0, %v148_v26, 0.0  ;;  %v938_v26 = vld [vmem:[%s1069_s1] ss:$0 sm:$0xff] }
  0xaf   :  { %v101_v50 = vpop.xlane.xlu1 %100  ;;  %v117_v54 = vmul.f32 0.03125, %v98_v49  ;;  %v141_v56 = vmul.f32 %v894_v23, %v894_v23 }
  0xb0   :  { %v118_v55 = vmul.f32 0.03125, %v101_v50  ;;  %v142_v31 = vmul.f32 %v898_v27, %v898_v27 }
  0xb1   :  { %v908_v28 = vsub.f32 %v609_v36, %v117_v54  ;;  %v169_v57 = vsel %vm53_vm0, %v141_v56, 0.0  ;;  %v317_v36 = vld [vmem:[%s1068_s3] sm:$0xff] }
  0xb2   :  { %v912_v32 = vsub.f32 %v610_v37, %v118_v55  ;;  %191 = vadd.xlane.f32.xlu1 %v190_v51  ;;  %170 = vadd.xlane.f32.xlu0 %v169_v57  ;;  %v172_v58 = vsel %vm53_vm0, %v142_v31, 0.0  ;;  %v318_v37 = vld [vmem:[%s1068_s3 + $0x8] sm:$0xff] }
  0xb3   :  { %v149_v59 = vmul.f32 %v908_v28, %v908_v28  ;;  %v321_v0 = vpack.c.bf16 %v318_v37, %v317_v36 }
  0xb4   :  { %v150_v60 = vmul.f32 %v912_v32, %v912_v32 }
  0xb5   :  { %v193_v61 = vsel %vm53_vm0, %v149_v59, 0.0  ;;  %628 = vmatprep.subr.bf16.mxu0 %v321_v0  ;;  %648 = vmatprep.subr.bf16.mxu1 %v321_v0 }
  0xb6   :  { %173 = vadd.xlane.f32.xlu1 %v172_v58  ;;  %194 = vadd.xlane.f32.xlu0 %v193_v61  ;;  %v196_v33 = vsel %vm53_vm0, %v150_v60, 0.0  ;;  %v945_v58 = vld [vmem:[%s1070_s2] ss:$0 sm:$0xff] }
  0xb7   :  { %629 = vmatpush3.bf16.msra.mxu0 %v321_v0  ;;  %650 = vmatpush3.bf16.msra.mxu1 %v321_v0 }
  0xb8   :  { %630 = vmatprep.subr.bf16.mxu0 %v322_v3  ;;  %649 = vmatprep.subr.bf16.mxu1 %v322_v3 }
  0xba   :  { %197 = vadd.xlane.f32.xlu1 %v196_v33 }
  0xbb   :  { %631 = vmatpush3.bf16.msra.mxu0 %v322_v3  ;;  %651 = vmatpush3.bf16.msra.mxu1 %v322_v3 }
 0x127   :  { %v153_v4 = vpop.xlane.xlu0 %152 }
 0x128   :  { %v199_v5 = vmul.f32 0.03125, %v153_v4 }
 0x12a   :  { %v215_v7 = vadd.f32 1e-05, %v199_v5 }
 0x12b   :  { %v156_v8 = vpop.xlane.xlu1 %155  ;;  %v177_v10 = vpop.xlane.xlu0 %176 }
 0x12c   :  { %652 = vrsqrt.f32 %v215_v7  ;;  %v200_v11 = vmul.f32 0.03125, %v156_v8  ;;  %v207_v12 = vmul.f32 0.03125, %v177_v10 }
 0x12e   :  { %v216_v14 = vadd.f32 1e-05, %v200_v11  ;;  %v223_v15 = vadd.f32 1e-05, %v207_v12 }
 0x12f   :  { %v180_v19 = vpop.xlane.xlu1 %179  ;;  %v159_v20 = vpop.xlane.xlu0 %158 }
 0x130   :  { %654 = vrsqrt.f32 %v216_v14  ;;  %v208_v16 = vmul.f32 0.03125, %v180_v19  ;;  %v201_v24 = vmul.f32 0.03125, %v159_v20 }
 0x131   :  { %656 = vrsqrt.f32 %v223_v15 }
 0x132   :  { %v224_v25 = vadd.f32 1e-05, %v208_v16  ;;  %v217_v29 = vadd.f32 1e-05, %v201_v24 }
 0x133   :  { %v162_v30 = vpop.xlane.xlu1 %161  ;;  %v183_v34 = vpop.xlane.xlu0 %182 }
 0x134   :  { %658 = vrsqrt.f32 %v224_v25  ;;  %v202_v35 = vmul.f32 0.03125, %v162_v30  ;;  %v209_v38 = vmul.f32 0.03125, %v183_v34 }
 0x135   :  { %660 = vrsqrt.f32 %v217_v29 }
 0x136   :  { %v653_v21 = vpop.eup %652  ;;  %v218_v39 = vadd.f32 1e-05, %v202_v35  ;;  %v225_v40 = vadd.f32 1e-05, %v209_v38 }
 0x137   :  { %v186_v41 = vpop.xlane.xlu1 %185  ;;  %v165_v42 = vpop.xlane.xlu0 %164  ;;  %v247_v43 = vmul.f32 %v653_v21, %v814_v44 }
 0x138   :  { %662 = vrsqrt.f32 %v218_v39  ;;  %v210_v46 = vmul.f32 0.03125, %v186_v41  ;;  %v203_v47 = vmul.f32 0.03125, %v165_v42 }
 0x139   :  { %664 = vrsqrt.f32 %v225_v40  ;;  %v270_v31 = vmul.f32 %v938_v26, %v247_v43 }
 0x13a   :  { %v655_v48 = vpop.eup %654  ;;  %v226_v49 = vadd.f32 1e-05, %v210_v46  ;;  %v219_v50 = vadd.f32 1e-05, %v203_v47 }
 0x13b   :  { %v657_v51 = vpop.eup %656  ;;  %v168_v54 = vpop.xlane.xlu1 %167  ;;  %v248_v56 = vmul.f32 %v655_v48, %v824_v52  ;;  %v293_v1 = vadd.f32 %v945_v58, %v270_v31 }
 0x13c   :  { %v189_v55 = vpop.xlane.xlu0 %188  ;;  %666 = vrsqrt.f32 %v226_v49  ;;  %v204_v44 = vmul.f32 0.03125, %v168_v54  ;;  %v255_v59 = vmul.f32 %v657_v51, %v816_v45 }
 0x13d   :  { %v211_v57 = vmul.f32 0.03125, %v189_v55  ;;  %668 = vrsqrt.f32 %v219_v50  ;;  %v271_v60 = vmul.f32 %v938_v26, %v248_v56 }
 0x13e   :  { %v659_v61 = vpop.eup %658  ;;  %v220_v33 = vadd.f32 1e-05, %v204_v44  ;;  %v278_v4 = vmul.f32 %v938_v26, %v255_v59 }
 0x13f   :  { %v227_v36 = vadd.f32 1e-05, %v211_v57  ;;  %v661_v37 = vpop.eup %660  ;;  %v192_v52 = vpop.xlane.xlu1 %191  ;;  %v294_v2 = vadd.f32 %v945_v58, %v271_v60  ;;  %v256_v3 = vmul.f32 %v659_v61, %v828_v53 }
 0x140   :  { %v171_v0 = vpop.xlane.xlu0 %170  ;;  %v249_v5 = vmul.f32 %v661_v37, %v838_v62  ;;  %670 = vrsqrt.f32 %v220_v33  ;;  %v212_v45 = vmul.f32 0.03125, %v192_v52  ;;  %v301_v16 = vadd.f32 %v945_v58, %v278_v4 }
 0x141   :  { %v205_v7 = vmul.f32 0.03125, %v171_v0  ;;  %672 = vrsqrt.f32 %v227_v36  ;;  %v309_v8 = vpack.c.bf16 %v294_v2, %v293_v1  ;;  %v279_v10 = vmul.f32 %v938_v26, %v256_v3 }
 0x142   :  { %v663_v11 = vpop.eup %662  ;;  %v228_v12 = vadd.f32 1e-05, %v212_v45  ;;  %v272_v24 = vmul.f32 %v938_v26, %v249_v5 }
 0x143   :  { %v221_v14 = vadd.f32 1e-05, %v205_v7  ;;  %v665_v15 = vpop.eup %664  ;;  %v250_v19 = vmul.f32 %v663_v11, %v842_v63  ;;  %v174_v20 = vpop.xlane.xlu1 %173  ;;  %632 = vmatprep.mubr.msk.bf16.mxu0 %vm53_vm0, %v309_v8  ;;  %v302_v62 = vadd.f32 %v945_v58, %v279_v10 }
 0x144   :  { %v195_v53 = vpop.xlane.xlu0 %194  ;;  %v257_v25 = vmul.f32 %v665_v15, %v852_v6  ;;  %674 = vrsqrt.f32 %v228_v12  ;;  %v206_v29 = vmul.f32 0.03125, %v174_v20  ;;  %v295_v42 = vadd.f32 %v945_v58, %v272_v24 }
 0x145   :  { %v213_v30 = vmul.f32 0.03125, %v195_v53  ;;  %676 = vrsqrt.f32 %v221_v14  ;;  %v313_v34 = vpack.c.bf16 %v302_v62, %v301_v16  ;;  %v273_v35 = vmul.f32 %v938_v26, %v250_v19 }
 0x146   :  { %v667_v63 = vpop.eup %666  ;;  %v222_v38 = vadd.f32 1e-05, %v206_v29  ;;  %v280_v43 = vmul.f32 %v938_v26, %v257_v25 }
 0x147   :  { %v229_v21 = vadd.f32 1e-05, %v213_v30  ;;  %v669_v39 = vpop.eup %668  ;;  %v258_v40 = vmul.f32 %v667_v63, %v856_v9  ;;  %v198_v41 = vpop.xlane.xlu1 %197  ;;  %640 = vmatprep.mubr.msk.bf16.mxu1 %vm53_vm0, %v313_v34  ;;  %v296_v6 = vadd.f32 %v945_v58, %v273_v35 }
 0x148   :  { %v251_v46 = vmul.f32 %v669_v39, %v866_v13  ;;  %678 = vrsqrt.f32 %v222_v38  ;;  %v214_v47 = vmul.f32 0.03125, %v198_v41  ;;  %v303_v55 = vadd.f32 %v945_v58, %v280_v43 }
 0x149   :  { %680 = vrsqrt.f32 %v229_v21  ;;  %v310_v48 = vpack.c.bf16 %v296_v6, %v295_v42  ;;  %v281_v49 = vmul.f32 %v938_v26, %v258_v40 }
 0x14a   :  { %v671_v50 = vpop.eup %670  ;;  %v230_v51 = vadd.f32 1e-05, %v214_v47  ;;  %v274_v31 = vmul.f32 %v938_v26, %v251_v46 }
 0x14b   :  { %v673_v9 = vpop.eup %672  ;;  %v252_v54 = vmul.f32 %v671_v50, %v870_v17  ;;  %633 = vmatmul.mubr.msk.bf16.vlgmr.msra.gmra.mrb[0].mxu0 %vm53_vm0, %v310_v48  ;;  %v304_v56 = vadd.f32 %v945_v58, %v281_v49 }
 0x14c   :  { %v259_v13 = vmul.f32 %v673_v9, %v880_v18  ;;  %682 = vrsqrt.f32 %v230_v51  ;;  %v297_v17 = vadd.f32 %v945_v58, %v274_v31 }
 0x14d   :  { %v314_v44 = vpack.c.bf16 %v304_v56, %v303_v55  ;;  %v275_v57 = vmul.f32 %v938_v26, %v252_v54 }
 0x14e   :  { %v675_v59 = vpop.eup %674  ;;  %v282_v36 = vmul.f32 %v938_v26, %v259_v13 }
 0x14f   :  { %v677_v60 = vpop.eup %676  ;;  %v260_v61 = vmul.f32 %v675_v59, %v884_v22  ;;  %641 = vmatmul.mubr.msk.bf16.vlgmr.msra.gmra.mrb[0].mxu1 %vm53_vm0, %v314_v44  ;;  %v298_v33 = vadd.f32 %v945_v58, %v275_v57 }
 0x150   :  { %v253_v37 = vmul.f32 %v677_v60, %v894_v23  ;;  %v305_v22 = vadd.f32 %v945_v58, %v282_v36 }
 0x151   :  { %v311_v52 = vpack.c.bf16 %v298_v33, %v297_v17  ;;  %v283_v18 = vmul.f32 %v938_v26, %v260_v61 }
 0x152   :  { %v679_v0 = vpop.eup %678  ;;  %v276_v4 = vmul.f32 %v938_v26, %v253_v37 }
 0x153   :  { %v681_v1 = vpop.eup %680  ;;  %v254_v2 = vmul.f32 %v679_v0, %v898_v27  ;;  %636 = vmatprep.mubr.msk.bf16.mxu0 %vm53_vm0, %v311_v52  ;;  %v306_v3 = vadd.f32 %v945_v58, %v283_v18 }
 0x154   :  { %v261_v5 = vmul.f32 %v681_v1, %v908_v28  ;;  %v299_v27 = vadd.f32 %v945_v58, %v276_v4 }
 0x155   :  { %v315_v45 = vpack.c.bf16 %v306_v3, %v305_v22  ;;  %v277_v23 = vmul.f32 %v938_v26, %v254_v2 }
 0x156   :  { %v683_v7 = vpop.eup %682  ;;  %v284_v11 = vmul.f32 %v938_v26, %v261_v5 }
 0x157   :  { %v262_v8 = vmul.f32 %v683_v7, %v912_v32  ;;  %644 = vmatprep.mubr.msk.bf16.mxu1 %vm53_vm0, %v315_v45  ;;  %v300_v10 = vadd.f32 %v945_v58, %v277_v23  ;;  %v538_v32 = vld [vmem:[%s1071_s4] ss:$0 sm:$0xff] }
 0x158   :  { %v307_v28 = vadd.f32 %v945_v58, %v284_v11 }
 0x159   :  { %v312_v12 = vpack.c.bf16 %v300_v10, %v299_v27  ;;  %v285_v14 = vmul.f32 %v938_v26, %v262_v8 }
 0x15b   :  { %637 = vmatmul.mubr.msk.bf16.gmra.mrb[4].mxu0 %vm53_vm0, %v312_v12  ;;  %v308_v15 = vadd.f32 %v945_v58, %v285_v14 }
 0x15d   :  { %v316_v19 = vpack.c.bf16 %v308_v15, %v307_v28 }
 0x15f   :  { %645 = vmatmul.mubr.msk.bf16.gmra.mrb[4].mxu1 %vm53_vm0, %v316_v19 }
 0x21e   :  { %v634_v20 = vpop.f32.mrb[0].mxu0 }
 0x21f   :  { %v397_v53 = vadd.f32 %v634_v20, %v538_v32  ;;  %v388_v16 = vpop.f32.mrb[1].mxu0 }
 0x220   :  { %v389_v62 = vadd.f32 %v538_v32, %v388_v16  ;;  %v635_v24 = vpop.f32.mrb[2].mxu0 }
 0x221   :  { %v565_v26 = vpack.c.bf16 %v397_v53, %v397_v53  ;;  %v400_v25 = vadd.f32 %v635_v24, %v538_v32  ;;  %v391_v29 = vpop.f32.mrb[3].mxu0 }
 0x222   :  { %v563_v30 = vpack.c.bf16 %v389_v62, %v389_v62  ;;  %v392_v34 = vadd.f32 %v538_v32, %v391_v29  ;;  %v642_v35 = vpop.f32.mrb[0].mxu1 }
 0x223   :  { %518 = vst.msk [vmem:[%s1072_s5 + $0x8] sm:$0xf] %vm515_vm1, %v565_v26  ;;  %v566_v58 = vpack.c.bf16 %v400_v25, %v400_v25  ;;  %v429_v63 = vadd.f32 %v642_v35, %v538_v32  ;;  %v420_v38 = vpop.f32.mrb[1].mxu1 }
 0x224   :  { %516 = vst.msk [vmem:[%s1072_s5] sm:$0xf] %vm515_vm1, %v563_v30  ;;  %v564_v21 = vpack.c.bf16 %v392_v34, %v392_v34  ;;  %v421_v39 = vadd.f32 %v538_v32, %v420_v38  ;;  %v643_v40 = vpop.f32.mrb[2].mxu1 }
 0x225   :  { %519 = vst.msk [vmem:[%s1072_s5 + $0xc] sm:$0xf] %vm515_vm1, %v566_v58  ;;  %v573_v41 = vpack.c.bf16 %v429_v63, %v429_v63  ;;  %v432_v42 = vadd.f32 %v643_v40, %v538_v32  ;;  %v423_v6 = vpop.f32.mrb[3].mxu1 }
 0x226   :  { %517 = vst.msk [vmem:[%s1072_s5 + $0x4] sm:$0xf] %vm515_vm1, %v564_v21  ;;  %v571_v43 = vpack.c.bf16 %v421_v39, %v421_v39  ;;  %v424_v46 = vadd.f32 %v538_v32, %v423_v6 }
 0x227   :  { %526 = vst.msk [vmem:[%s1072_s5 + $0x28] sm:$0xf] %vm515_vm1, %v573_v41  ;;  %v574_v47 = vpack.c.bf16 %v432_v42, %v432_v42 }
 0x228   :  { %524 = vst.msk [vmem:[%s1072_s5 + $0x20] sm:$0xf] %vm515_vm1, %v571_v43  ;;  %v572_v48 = vpack.c.bf16 %v424_v46, %v424_v46 }
 0x229   :  { %527 = vst.msk [vmem:[%s1072_s5 + $0x2c] sm:$0xf] %vm515_vm1, %v574_v47 }
 0x22a   :  { %525 = vst.msk [vmem:[%s1072_s5 + $0x24] sm:$0xf] %vm515_vm1, %v572_v48 }
 0x22e   :  { %v638_v49 = vpop.f32.mrb[4].mxu0 }
 0x22f   :  { %v413_v50 = vadd.f32 %v638_v49, %v538_v32  ;;  %v404_v51 = vpop.f32.mrb[5].mxu0 }
 0x230   :  { %v405_v9 = vadd.f32 %v538_v32, %v404_v51  ;;  %v639_v54 = vpop.f32.mrb[6].mxu0 }
 0x231   :  { %v569_v55 = vpack.c.bf16 %v413_v50, %v413_v50  ;;  %v416_v56 = vadd.f32 %v639_v54, %v538_v32  ;;  %v407_v31 = vpop.f32.mrb[7].mxu0 }
 0x232   :  { %v567_v13 = vpack.c.bf16 %v405_v9, %v405_v9  ;;  %v408_v44 = vadd.f32 %v538_v32, %v407_v31  ;;  %v646_v57 = vpop.f32.mrb[4].mxu1 }
 0x233   :  { %522 = vst.msk [vmem:[%s1072_s5 + $0x18] sm:$0xf] %vm515_vm1, %v569_v55  ;;  %v570_v59 = vpack.c.bf16 %v416_v56, %v416_v56  ;;  %v445_v60 = vadd.f32 %v646_v57, %v538_v32  ;;  %v436_v61 = vpop.f32.mrb[5].mxu1 }
 0x234   :  { %520 = vst.msk [vmem:[%s1072_s5 + $0x10] sm:$0xf] %vm515_vm1, %v567_v13  ;;  %v568_v17 = vpack.c.bf16 %v408_v44, %v408_v44  ;;  %v437_v33 = vadd.f32 %v538_v32, %v436_v61  ;;  %v647_v36 = vpop.f32.mrb[6].mxu1 }
 0x235   :  { %523 = vst.msk [vmem:[%s1072_s5 + $0x1c] sm:$0xf] %vm515_vm1, %v570_v59  ;;  %v577_v37 = vpack.c.bf16 %v445_v60, %v445_v60  ;;  %v448_v52 = vadd.f32 %v647_v36, %v538_v32  ;;  %v439_v18 = vpop.f32.mrb[7].mxu1 }
 0x236   :  { %521 = vst.msk [vmem:[%s1072_s5 + $0x14] sm:$0xf] %vm515_vm1, %v568_v17  ;;  %v575_v0 = vpack.c.bf16 %v437_v33, %v437_v33  ;;  %v440_v1 = vadd.f32 %v538_v32, %v439_v18 }
 0x237   :  { %530 = vst.msk [vmem:[%s1072_s5 + $0x38] sm:$0xf] %vm515_vm1, %v577_v37  ;;  %v578_v2 = vpack.c.bf16 %v448_v52, %v448_v52 }
 0x238   :  { %528 = vst.msk [vmem:[%s1072_s5 + $0x30] sm:$0xf] %vm515_vm1, %v575_v0  ;;  %v576_v22 = vpack.c.bf16 %v440_v1, %v440_v1 }
 0x239   :  { %531 = vst.msk [vmem:[%s1072_s5 + $0x3c] sm:$0xf] %vm515_vm1, %v578_v2 }
 0x23a   :  { %529 = vst.msk [vmem:[%s1072_s5 + $0x34] sm:$0xf] %vm515_vm1, %v576_v22 }

// kernel: cswinir_forward.10
= control target key start
LH: loop header
LB: loop body
LE: loop exit
PB: predicated region body
PF: predicated region fallthrough
CT: control target
= control target key end

     0   :  { %s709_s12 = smov 0   ;;  %s1015_s0 = inlined_call_operand.vmem [shape: f32[2,8,8,32], index: 0, kind: input, shape index: {}]   ;;  %s1016_s1 = inlined_call_operand.vmem [shape: f32[3,3,32], index: 1, kind: input, shape index: {}]   ;;  %s1017_s2 = inlined_call_operand.vmem [shape: f32[1,32], index: 2, kind: input, shape index: {}]   ;;  %s1018_s3 = inlined_call_operand.vmem [shape: bf16[2,8,8,32], index: 3, kind: output, shape index: {}]  }
   0x1 LB: > { %s617_s13 = sadd.s32 4294967295, %s686_s12   ;;  %p621_p0 = scmp.ge.s32.totalorder %s686_s12, 1  ;;  %s686_s12 = sphi %s709_s12, %s13_s12  }
   0x2   : > { %p137_p1 = scmp.lt.s32.totalorder %s686_s12, 3 }
   0x4   : > { %p138_p2 = pnand %p621_p0, %p137_p1 }
   0x6   : > { %141 = sbr.rel (%p138_p2) target bundleno = 110 (0x6e), region = 32 }
   0xd   : > { %vm171_vm0 = vcmask 261120   ;;  %v221_v0 = vlaneseq  ;;  %vm173_vm1 = vcmask 254976   ;;  %p719_p3 = scmp.lt.s32.totalorder %s617_s13, 1  ;;  %v688_v1 = vmov 0.0   ;;  %v210_v3 = vld [vmem:[%s1016_s1] sm:$0x7] }
   0xe   : > { %172 = vst.msk [vmem:[#allocation2] sm:$0xff] %vm171_vm0, %v688_v1  ;;  %175 = vst.msk [vmem:[#allocation2 + $0x10] sm:$0xff] %vm171_vm0, %v688_v1  ;;  %v211_v23 = vld [vmem:[%s1016_s1 + $0x4] sm:$0x7]  ;;  %v212_v26 = vld [vmem:[%s1016_s1 + $0x8] sm:$0x7] }
   0xf   : > { %177 = vst.msk [vmem:[#allocation2 + $0x20] sm:$0xff] %vm171_vm0, %v688_v1  ;;  %179 = vst.msk [vmem:[#allocation2 + $0x30] sm:$0xff] %vm171_vm0, %v688_v1  ;;  %v222_v2 = vshrl.u32 %v221_v0, 7  ;;  %s1030_s13 = smov (!%p719_p3, %s617_s13), 1  ;;  %vm553_vm2 = vcmask 257024  }
  0x10   : > { %181 = vst.msk [vmem:[#allocation2 + $0x40] sm:$0xff] %vm171_vm0, %v688_v1  ;;  %183 = vst.msk [vmem:[#allocation2 + $0x50] sm:$0xff] %vm171_vm0, %v688_v1  ;;  %s637_s17 = sshll.u32 %s1030_s13, 6  ;;  %s638_s27 = sshll.u32 %s1030_s13, 5 }
  0x11   : > { %185 = vst.msk [vmem:[#allocation2 + $0x60] sm:$0xff] %vm171_vm0, %v688_v1  ;;  %187 = vst.msk [vmem:[#allocation2 + $0x70] sm:$0xff] %vm171_vm0, %v688_v1  ;;  %v223_v4 = vsub.s32 0, %v222_v2  ;;  %v251_v5 = vsub.s32 1, %v222_v2  ;;  %v279_v6 = vsub.s32 2, %v222_v2  ;;  %s165_s20 = scalar_lea.vmem %s1015_s0, %s637_s17  ;;  %s987_s30 = scalar_lea.vmem %s1018_s3, %s638_s27 }
  0x12   : > { %189 = vst.msk [vmem:[#allocation2 + $0x80] sm:$0xff] %vm171_vm0, %v688_v1  ;;  %191 = vst.msk [vmem:[#allocation2 + $0x90] sm:$0xff] %vm171_vm0, %v688_v1  ;;  %v760_v9 = vld [vmem:[%s165_s20] sm:$0xff]  ;;  %v762_v10 = vld [vmem:[%s165_s20 + $0x8] sm:$0xff] }
  0x13   : > { %174 = vst.msk [vmem:[#allocation2 + $0x8] sm:$0x3] %vm173_vm1, %v688_v1  ;;  %176 = vst.msk [vmem:[#allocation2 + $0x18] sm:$0x3] %vm173_vm1, %v688_v1  ;;  %v756_v7 = vrot.slane %v210_v3, %v223_v4  ;;  %v758_v8 = vrot.slane %v210_v3, %v251_v5  ;;  %v764_v11 = vld [vmem:[%s165_s20 + $0x10] sm:$0xff]  ;;  %v772_v12 = vld [vmem:[%s165_s20 + $0x18] sm:$0xff]  ;;  %v778_v17 = vrot.slane %v210_v3, %v279_v6 }
  0x14   : > { %178 = vst.msk [vmem:[#allocation2 + $0x28] sm:$0x3] %vm173_vm1, %v688_v1  ;;  %180 = vst.msk [vmem:[#allocation2 + $0x38] sm:$0x3] %vm173_vm1, %v688_v1  ;;  %v774_v13 = vld [vmem:[%s165_s20 + $0x20] sm:$0xff]  ;;  %v776_v14 = vld [vmem:[%s165_s20 + $0x28] sm:$0xff]  ;;  %v803_v27 = vrot.slane %v211_v23, %v223_v4  ;;  %v805_v31 = vrot.slane %v211_v23, %v251_v5  ;;  %v807_v32 = vrot.slane %v211_v23, %v279_v6 }
  0x15   : > { %182 = vst.msk [vmem:[#allocation2 + $0x48] sm:$0x3] %vm173_vm1, %v688_v1  ;;  %184 = vst.msk [vmem:[#allocation2 + $0x58] sm:$0x3] %vm173_vm1, %v688_v1  ;;  %v213_v15 = vld [vmem:[#allocation2] sm:$0xff]  ;;  %v788_v21 = vld [vmem:[%s165_s20 + $0x30] sm:$0xff]  ;;  %v813_v38 = vrot.slane %v212_v26, %v223_v4  ;;  %v815_v39 = vrot.slane %v212_v26, %v251_v5  ;;  %v823_v46 = vrot.slane %v212_v26, %v279_v6 }
  0x16   : > { %186 = vst.msk [vmem:[#allocation2 + $0x68] sm:$0x3] %vm173_vm1, %v688_v1  ;;  %188 = vst.msk [vmem:[#allocation2 + $0x78] sm:$0x3] %vm173_vm1, %v688_v1  ;;  %v225_v18 = vmul.f32 %v756_v7, %v213_v15  ;;  %v790_v22 = vld [vmem:[%s165_s20 + $0x38] sm:$0xff] }
  0x17   : > { %190 = vst.msk [vmem:[#allocation2 + $0x88] sm:$0x3] %vm173_vm1, %v688_v1  ;;  %192 = vst.msk [vmem:[#allocation2 + $0x98] sm:$0x3] %vm173_vm1, %v688_v1 }
  0x18   : > { %202 = vst.msk [vmem:[#allocation2 + $0x11] sm:$0xff] %vm171_vm0, %v760_v9  ;;  %203 = vst.msk [vmem:[#allocation2 + $0x21] sm:$0xff] %vm171_vm0, %v762_v10 }
  0x19   : > { %204 = vst.msk [vmem:[#allocation2 + $0x31] sm:$0xff] %vm171_vm0, %v764_v11  ;;  %1023 = vst [vmem:[#allocation3_spill] sm:$0xff] %v776_v14 }
  0x1a   : > { %v241_v16 = vld [vmem:[#allocation2 + $0x1] sm:$0xff]  ;;  %205 = vst.msk [vmem:[#allocation2 + $0x41] sm:$0xff] %vm171_vm0, %v772_v12  ;;  %206 = vst.msk [vmem:[#allocation2 + $0x51] sm:$0xff] %vm171_vm0, %v774_v13 }
  0x1b   : > { %207 = vst.msk [vmem:[#allocation2 + $0x61] sm:$0xff] %vm171_vm0, %v776_v14  ;;  %v253_v19 = vmul.f32 %v758_v8, %v241_v16  ;;  %v269_v20 = vld [vmem:[#allocation2 + $0x2] sm:$0xff]  ;;  %1024 = vst [vmem:[#allocation4_spill] sm:$0xff] %v788_v21 }
  0x1c   : > { %1025 = vst [vmem:[#allocation5_spill] sm:$0xff] %v790_v22  ;;  %208 = vst.msk [vmem:[#allocation2 + $0x71] sm:$0xff] %vm171_vm0, %v788_v21  ;;  %v281_v25 = vmul.f32 %v778_v17, %v269_v20 }
  0x1d   : > { %209 = vst.msk [vmem:[#allocation2 + $0x81] sm:$0xff] %vm171_vm0, %v790_v22  ;;  %v261_v24 = vadd.f32 %v253_v19, %v225_v18 }
  0x1f   : > { %v214_v28 = vld [vmem:[#allocation2 + $0x10] sm:$0xff]  ;;  %v215_v35 = vld [vmem:[#allocation2 + $0x20] sm:$0xff]  ;;  %v289_v45 = vadd.f32 %v281_v25, %v261_v24 }
  0x20   : > { %v242_v29 = vld [vmem:[#allocation2 + $0x11] sm:$0xff]  ;;  %v226_v33 = vmul.f32 %v756_v7, %v214_v28  ;;  %v243_v36 = vld [vmem:[#allocation2 + $0x21] sm:$0xff]  ;;  %v227_v40 = vmul.f32 %v756_v7, %v215_v35  ;;  %v309_v48 = vmul.f32 %v803_v27, %v214_v28  ;;  %v310_v55 = vmul.f32 %v803_v27, %v215_v35 }
  0x21   : > { %v270_v30 = vld [vmem:[#allocation2 + $0x12] sm:$0xff]  ;;  %v254_v34 = vmul.f32 %v758_v8, %v242_v29  ;;  %v811_v37 = vld [vmem:[#allocation2 + $0x22] sm:$0xff]  ;;  %v255_v41 = vmul.f32 %v758_v8, %v243_v36  ;;  %v394_v22 = vmul.f32 %v813_v38, %v215_v35 }
  0x22   : > { %v216_v42 = vld [vmem:[#allocation2 + $0x30] sm:$0xff]  ;;  %v282_v47 = vmul.f32 %v778_v17, %v270_v30  ;;  %v217_v51 = vld [vmem:[#allocation2 + $0x40] sm:$0xff]  ;;  %v283_v54 = vmul.f32 %v778_v17, %v811_v37  ;;  %v366_v14 = vmul.f32 %v807_v32, %v811_v37 }
  0x23   : > { %v819_v43 = vld [vmem:[#allocation2 + $0x31] sm:$0xff]  ;;  %v228_v49 = vmul.f32 %v756_v7, %v216_v42  ;;  %v830_v52 = vld [vmem:[#allocation2 + $0x41] sm:$0xff]  ;;  %v229_v56 = vmul.f32 %v756_v7, %v217_v51  ;;  %v262_v60 = vadd.f32 %v254_v34, %v226_v33  ;;  %v263_v61 = vadd.f32 %v255_v41, %v227_v40 }
  0x24   : > { %v821_v44 = vld [vmem:[#allocation2 + $0x32] sm:$0xff]  ;;  %v256_v50 = vmul.f32 %v758_v8, %v819_v43  ;;  %v832_v53 = vld [vmem:[#allocation2 + $0x42] sm:$0xff]  ;;  %v257_v57 = vmul.f32 %v758_v8, %v830_v52  ;;  %v311_v4 = vmul.f32 %v803_v27, %v216_v42  ;;  %v312_v20 = vmul.f32 %v803_v27, %v217_v51 }
  0x25   : > { %v840_v58 = vld [vmem:[#allocation2 + $0x50] sm:$0xff]  ;;  %v284_v62 = vmul.f32 %v778_v17, %v821_v44  ;;  %v850_v1 = vld [vmem:[#allocation2 + $0x60] sm:$0xff]  ;;  %v285_v5 = vmul.f32 %v778_v17, %v832_v53  ;;  %v290_v21 = vadd.f32 %v282_v47, %v262_v60  ;;  %v451_v35 = vmul.f32 %v823_v46, %v821_v44 }
  0x26   : > { %v842_v59 = vld [vmem:[#allocation2 + $0x51] sm:$0xff]  ;;  %v230_v63 = vmul.f32 %v756_v7, %v840_v58  ;;  %v852_v2 = vld [vmem:[#allocation2 + $0x61] sm:$0xff]  ;;  %v264_v3 = vadd.f32 %v256_v50, %v228_v49  ;;  %v265_v19 = vadd.f32 %v257_v57, %v229_v56  ;;  %v231_v23 = vmul.f32 %v756_v7, %v850_v1 }
  0x27   : > { %v848_v0 = vld [vmem:[#allocation2 + $0x52] sm:$0xff]  ;;  %v258_v6 = vmul.f32 %v758_v8, %v842_v59  ;;  %v859_v15 = vld [vmem:[#allocation2 + $0x62] sm:$0xff]  ;;  %v259_v24 = vmul.f32 %v758_v8, %v852_v2  ;;  %v313_v28 = vmul.f32 %v803_v27, %v840_v58  ;;  %v314_v49 = vmul.f32 %v803_v27, %v850_v1 }
  0x28   : > { %v861_v16 = vld [vmem:[#allocation2 + $0x70] sm:$0xff]  ;;  %v286_v26 = vmul.f32 %v778_v17, %v848_v0  ;;  %v882_v41 = vmul.f32 %v778_v17, %v859_v15  ;;  %v317_v50 = vadd.f32 %v309_v48, %v289_v45  ;;  %v422_v48 = vmul.f32 %v815_v39, %v243_v36 }
  0x29   : > { %v863_v18 = vld [vmem:[#allocation2 + $0x71] sm:$0xff]  ;;  %v232_v33 = vmul.f32 %v756_v7, %v861_v16  ;;  %v266_v40 = vadd.f32 %v258_v6, %v230_v63  ;;  %v886_v56 = vadd.f32 %v259_v24, %v231_v23  ;;  %v894_v7 = vmul.f32 %v803_v27, %v861_v16 }
  0x2a   : > { %v870_v25 = vld [vmem:[#allocation2 + $0x72] sm:$0xff]  ;;  %v260_v34 = vmul.f32 %v758_v8, %v863_v18  ;;  %v337_v8 = vmul.f32 %v805_v31, %v242_v29  ;;  %v365_v6 = vmul.f32 %v807_v32, %v270_v30  ;;  %v338_v23 = vmul.f32 %v805_v31, %v243_v36 }
  0x2b   : > { %v890_v57 = vmul.f32 %v778_v17, %v870_v25  ;;  %v450_v17 = vmul.f32 %v823_v46, %v811_v37  ;;  %v318_v24 = vadd.f32 %v310_v55, %v290_v21  ;;  %v395_v29 = vmul.f32 %v813_v38, %v216_v42 }
  0x2c   : > { %v897_v63 = vadd.f32 %v260_v34, %v232_v33  ;;  %v345_v45 = vadd.f32 %v337_v8, %v317_v50  ;;  %v291_v33 = vadd.f32 %v283_v54, %v263_v61  ;;  %v423_v30 = vmul.f32 %v815_v39, %v819_v43 }
  0x2d   : > { %v339_v47 = vmul.f32 %v805_v31, %v819_v43  ;;  %v346_v60 = vadd.f32 %v338_v23, %v318_v24  ;;  %v367_v21 = vmul.f32 %v807_v32, %v821_v44  ;;  %v292_v36 = vadd.f32 %v284_v62, %v264_v3  ;;  %v930_v62 = vld [vmem:[%s1017_s2] ss:$0 sm:$0xff] }
  0x2e   : > { %v373_v34 = vadd.f32 %v365_v6, %v345_v45  ;;  %v319_v50 = vadd.f32 %v311_v4, %v291_v33  ;;  %v396_v42 = vmul.f32 %v813_v38, %v217_v51  ;;  %v424_v54 = vmul.f32 %v815_v39, %v830_v52 }
  0x2f   : > { %v452_v55 = vmul.f32 %v823_v46, %v832_v53  ;;  %v374_v61 = vadd.f32 %v366_v14, %v346_v60  ;;  %v320_v6 = vadd.f32 %v312_v20, %v292_v36  ;;  %v340_v43 = vmul.f32 %v805_v31, %v830_v52 }
  0x30   : > { %v402_v37 = vadd.f32 %v394_v22, %v373_v34  ;;  %v347_v8 = vadd.f32 %v339_v47, %v319_v50  ;;  %v368_v44 = vmul.f32 %v807_v32, %v832_v53  ;;  %v397_v22 = vmul.f32 %v813_v38, %v840_v58 }
  0x31   : > { %v293_v51 = vadd.f32 %v285_v5, %v265_v19  ;;  %v403_v3 = vadd.f32 %v395_v29, %v374_v61  ;;  %v348_v45 = vadd.f32 %v340_v43, %v320_v6  ;;  %v425_v20 = vmul.f32 %v815_v39, %v842_v59 }
  0x32   : > { %v430_v4 = vadd.f32 %v422_v48, %v402_v37  ;;  %v375_v14 = vadd.f32 %v367_v21, %v347_v8  ;;  %v453_v48 = vmul.f32 %v823_v46, %v848_v0  ;;  %v341_v58 = vmul.f32 %v805_v31, %v842_v59 }
  0x33   : > { %v321_v53 = vadd.f32 %v313_v28, %v293_v51  ;;  %v431_v5 = vadd.f32 %v423_v30, %v403_v3  ;;  %v376_v23 = vadd.f32 %v368_v44, %v348_v45  ;;  %v369_v24 = vmul.f32 %v807_v32, %v848_v0 }
  0x34   : > { %v458_v52 = vadd.f32 %v450_v17, %v430_v4  ;;  %v404_v19 = vadd.f32 %v396_v42, %v375_v14  ;;  %v398_v34 = vmul.f32 %v813_v38, %v850_v1  ;;  %v294_v17 = vadd.f32 %v286_v26, %v266_v40 }
  0x35   : > { %v349_v33 = vadd.f32 %v341_v58, %v321_v53  ;;  %v459_v47 = vadd.f32 %v451_v35, %v431_v5  ;;  %v405_v50 = vadd.f32 %v397_v22, %v376_v23  ;;  %v426_v28 = vmul.f32 %v815_v39, %v852_v2  ;;  %v389_v53 = vld [vmem:[#allocation2 + $0x90] sm:$0xff]  ;;  %v444_v5 = vld [vmem:[#allocation2 + $0x82] sm:$0xff] }
  0x36   : > { %v473_v29 = vadd.f32 %v930_v62, %v458_v52  ;;  %v432_v60 = vadd.f32 %v424_v54, %v404_v19  ;;  %v322_v21 = vadd.f32 %v314_v49, %v294_v17  ;;  %v342_v36 = vmul.f32 %v805_v31, %v852_v2  ;;  %v304_v54 = vld [vmem:[#allocation2 + $0x80] sm:$0xff] }
  0x37   : > { %v377_v30 = vadd.f32 %v369_v24, %v349_v33  ;;  %v474_v0 = vadd.f32 %v930_v62, %v459_v47  ;;  %v433_v42 = vadd.f32 %v425_v20, %v405_v50  ;;  %v454_v1 = vmul.f32 %v823_v46, %v859_v15 }
  0x38   : > { %v627_v59 = vmul.f32 -1.442695, %v473_v29  ;;  %v460_v37 = vadd.f32 %v452_v55, %v432_v60  ;;  %v350_v40 = vadd.f32 %v342_v36, %v322_v21  ;;  %v370_v35 = vmul.f32 %v807_v32, %v859_v15 }
  0x39   : > { %v406_v26 = vadd.f32 %v398_v34, %v377_v30  ;;  %v628_v61 = vmul.f32 -1.442695, %v474_v0  ;;  %v461_v8 = vadd.f32 %v453_v48, %v433_v42  ;;  %v295_v2 = vadd.f32 %v882_v41, %v886_v56  ;;  %v332_v56 = vld [vmem:[#allocation2 + $0x81] sm:$0xff]  ;;  %v445_v0 = vld [vmem:[#allocation2 + $0x92] sm:$0xff] }
  0x3a   : > { %648 = vpow2.f32 %v627_v59  ;;  %v475_v49 = vadd.f32 %v930_v62, %v460_v37  ;;  %v378_v55 = vadd.f32 %v370_v35, %v350_v40  ;;  %v399_v43 = vmul.f32 %v813_v38, %v861_v16  ;;  %v417_v59 = vld [vmem:[#allocation2 + $0x91] sm:$0xff] }
  0x3b   : > { %v434_v6 = vadd.f32 %v426_v28, %v406_v26  ;;  %v343_v4 = vmul.f32 %v805_v31, %v863_v18  ;;  %650 = vpow2.f32 %v628_v61  ;;  %v476_v15 = vadd.f32 %v930_v62, %v461_v8 }
  0x3c   : > { %v629_v44 = vmul.f32 -1.442695, %v475_v49  ;;  %v323_v22 = vadd.f32 %v894_v7, %v295_v2  ;;  %v316_v51 = vmul.f32 %v803_v27, %v304_v54  ;;  %v407_v14 = vadd.f32 %v399_v43, %v378_v55 }
  0x3d   : > { %v462_v3 = vadd.f32 %v454_v1, %v434_v6  ;;  %v427_v41 = vmul.f32 %v815_v39, %v863_v18  ;;  %v630_v45 = vmul.f32 -1.442695, %v476_v15  ;;  %v371_v20 = vmul.f32 %v807_v32, %v870_v25 }
  0x3e   : > { %652 = vpow2.f32 %v629_v44  ;;  %v351_v16 = vadd.f32 %v343_v4, %v323_v22  ;;  %v455_v7 = vmul.f32 %v823_v46, %v870_v25  ;;  %v296_v27 = vadd.f32 %v890_v57, %v897_v63 }
  0x3f   : > { %v477_v52 = vadd.f32 %v930_v62, %v462_v3  ;;  %v435_v48 = vadd.f32 %v427_v41, %v407_v14  ;;  %654 = vpow2.f32 %v630_v45  ;;  %v400_v18 = vmul.f32 %v813_v38, %v304_v54 }
  0x40   : > { %v379_v58 = vadd.f32 %v371_v20, %v351_v16  ;;  %v324_v24 = vadd.f32 %v316_v51, %v296_v27  ;;  %v344_v29 = vmul.f32 %v805_v31, %v332_v56  ;;  %v428_v34 = vmul.f32 %v815_v39, %v332_v56 }
  0x41   : > { %v631_v19 = vmul.f32 -1.442695, %v477_v52  ;;  %v463_v23 = vadd.f32 %v455_v7, %v435_v48  ;;  %v401_v17 = vmul.f32 %v813_v38, %v389_v53  ;;  %v372_v47 = vmul.f32 %v444_v5, %v807_v32 }
  0x42   : > { %v408_v33 = vadd.f32 %v400_v18, %v379_v58  ;;  %v352_v63 = vadd.f32 %v344_v29, %v324_v24  ;;  %v456_v28 = vmul.f32 %v823_v46, %v444_v5  ;;  %v429_v42 = vmul.f32 %v815_v39, %v417_v59  ;;  %v1027_v5 = vld [vmem:[#allocation4_spill] sm:$0xff] }
  0x43   : > { %656 = vpow2.f32 %v631_v19  ;;  %v478_v57 = vadd.f32 %v930_v62, %v463_v23  ;;  %v457_v35 = vmul.f32 %v823_v46, %v445_v0 }
  0x44   : > { %v649_v25 = vpop.eup %648  ;;  %v436_v50 = vadd.f32 %v428_v34, %v408_v33  ;;  %v380_v21 = vadd.f32 %v372_v47, %v352_v63 }
  0x45   : > { %v513_v60 = vadd.f32 1.0, %v649_v25  ;;  %v632_v30 = vmul.f32 -1.442695, %v478_v57  ;;  %v651_v31 = vpop.eup %650 }
  0x46   : > { %v464_v36 = vadd.f32 %v456_v28, %v436_v50  ;;  %v514_v37 = vadd.f32 1.0, %v651_v31  ;;  %v409_v38 = vadd.f32 %v401_v17, %v380_v21 }
  0x47   : > { %658 = vrcp.f32 %v513_v60 }
  0x48   : > { %660 = vpow2.f32 %v632_v30  ;;  %v653_v1 = vpop.eup %652  ;;  %v479_v32 = vadd.f32 %v930_v62, %v464_v36  ;;  %v437_v40 = vadd.f32 %v429_v42, %v409_v38 }
  0x49   : > { %662 = vrcp.f32 %v514_v37  ;;  %v515_v26 = vadd.f32 1.0, %v653_v1  ;;  %v655_v54 = vpop.eup %654 }
  0x4a   : > { %v633_v61 = vmul.f32 -1.442695, %v479_v32  ;;  %v516_v49 = vadd.f32 1.0, %v655_v54  ;;  %v465_v8 = vadd.f32 %v457_v35, %v437_v40 }
  0x4b   : > { %664 = vrcp.f32 %v515_v26 }
  0x4c   : > { %666 = vpow2.f32 %v633_v61  ;;  %v480_v6 = vadd.f32 %v930_v62, %v465_v8 }
  0x4d   : > { %v657_v2 = vpop.eup %656  ;;  %668 = vrcp.f32 %v516_v49 }
  0x4e   : > { %v517_v39 = vadd.f32 1.0, %v657_v2  ;;  %v634_v55 = vmul.f32 -1.442695, %v480_v6 }
  0x50   : > { %670 = vrcp.f32 %v517_v39 }
  0x51   : > { %v659_v43 = vpop.eup %658  ;;  %672 = vpow2.f32 %v634_v55 }
  0x52   : > { %v661_v4 = vpop.eup %660  ;;  %v537_v44 = vmul.f32 %v659_v43, %v760_v9 }
  0x53   : > { %v518_v46 = vadd.f32 1.0, %v661_v4  ;;  %v663_v15 = vpop.eup %662 }
  0x54   : > { %v545_v62 = vpack.c.bf16 %v537_v44, %v537_v44  ;;  %v538_v22 = vmul.f32 %v663_v15, %v762_v10 }
  0x55   : > { %674 = vrcp.f32 %v518_v46  ;;  %v665_v51 = vpop.eup %664 }
  0x56   : > { %554 = vst.msk [vmem:[%s987_s30] sm:$0xf] %vm553_vm2, %v545_v62  ;;  %v667_v9 = vpop.eup %666  ;;  %v546_v3 = vpack.c.bf16 %v538_v22, %v538_v22  ;;  %v539_v14 = vmul.f32 %v665_v51, %v764_v11 }
  0x57   : > { %v669_v41 = vpop.eup %668  ;;  %v519_v56 = vadd.f32 1.0, %v667_v9 }
  0x58   : > { %555 = vst.msk [vmem:[%s987_s30 + $0x4] sm:$0xf] %vm553_vm2, %v546_v3  ;;  %v547_v45 = vpack.c.bf16 %v539_v14, %v539_v14  ;;  %v540_v16 = vmul.f32 %v669_v41, %v772_v12  ;;  %v1026_v12 = vld [vmem:[#allocation3_spill] sm:$0xff] }
  0x59   : > { %676 = vrcp.f32 %v519_v56 }
  0x5a   : > { %v671_v10 = vpop.eup %670  ;;  %556 = vst.msk [vmem:[%s987_s30 + $0x8] sm:$0xf] %vm553_vm2, %v547_v45  ;;  %v548_v20 = vpack.c.bf16 %v540_v16, %v540_v16 }
  0x5b   : > { %v673_v52 = vpop.eup %672  ;;  %v541_v48 = vmul.f32 %v671_v10, %v774_v13  ;;  %v1028_v13 = vld [vmem:[#allocation5_spill] sm:$0xff] }
  0x5c   : > { %557 = vst.msk [vmem:[%s987_s30 + $0xc] sm:$0xf] %vm553_vm2, %v548_v20  ;;  %v520_v11 = vadd.f32 1.0, %v673_v52 }
  0x5d   : > { %v549_v7 = vpack.c.bf16 %v541_v48, %v541_v48 }
  0x5e   : > { %678 = vrcp.f32 %v520_v11 }
  0x5f   : > { %v675_v27 = vpop.eup %674  ;;  %558 = vst.msk [vmem:[%s987_s30 + $0x10] sm:$0xf] %vm553_vm2, %v549_v7 }
  0x60   : > { %v542_v53 = vmul.f32 %v675_v27, %v1026_v12 }
  0x62   : > { %v550_v58 = vpack.c.bf16 %v542_v53, %v542_v53 }
  0x63   : > { %v677_v18 = vpop.eup %676 }
  0x64   : > { %559 = vst.msk [vmem:[%s987_s30 + $0x14] sm:$0xf] %vm553_vm2, %v550_v58  ;;  %v543_v19 = vmul.f32 %v677_v18, %v1027_v5 }
  0x66   : > { %v551_v23 = vpack.c.bf16 %v543_v19, %v543_v19 }
  0x68   : > { %v679_v24 = vpop.eup %678  ;;  %560 = vst.msk [vmem:[%s987_s30 + $0x18] sm:$0xf] %vm553_vm2, %v551_v23 }
  0x69   : > { %v544_v29 = vmul.f32 %v679_v24, %v1028_v13 }
  0x6b   : > { %v552_v33 = vpack.c.bf16 %v544_v29, %v544_v29 }
  0x6d   : > { %561 = vst.msk [vmem:[%s987_s30 + $0x1c] sm:$0xf] %vm553_vm2, %v552_v33 }
  0x6e PF: > { %s13_s12 = sadd.s32 1, %s686_s12  }
  0x6f   : > { %p10_p4 = scmp.ge.s32.totalorder %s13_s12, 4  }
  0x71   :  { %12 = sbr.rel (!%p10_p4) target bundleno = 1 (0x1), region = 64 }

// kernel: cswinir_forward.11
= control target key start
LH: loop header
LB: loop body
LE: loop exit
PB: predicated region body
PF: predicated region fallthrough
CT: control target
= control target key end

     0   :  { %s3859_s13 = smov 0   ;;  %s4736_s0 = inlined_call_operand.vmem [shape: bf16[2,8,8,32], index: 0, kind: input, shape index: {}]   ;;  %s4737_s1 = inlined_call_operand.vmem [shape: f32[1,32], index: 1, kind: input, shape index: {}]   ;;  %s4738_s2 = inlined_call_operand.vmem [shape: f32[1,32], index: 2, kind: input, shape index: {}]   ;;  %s4739_s3 = inlined_call_operand.vmem [shape: f32[32,48], index: 3, kind: input, shape index: {}]   ;;  %s4740_s4 = inlined_call_operand.vmem [shape: f32[1,48], index: 4, kind: input, shape index: {}]   ;;  %s4741_s5 = inlined_call_operand.vmem [shape: f32[32,48], index: 5, kind: input, shape index: {}]   ;;  %s4742_s6 = inlined_call_operand.vmem [shape: f32[1,48], index: 6, kind: input, shape index: {}]   ;;  %s4743_s7 = inlined_call_operand.vmem [shape: f32[16,32], index: 7, kind: input, shape index: {}]   ;;  %s4744_s8 = inlined_call_operand.vmem [shape: f32[16,32], index: 8, kind: input, shape index: {}]   ;;  %s4745_s9 = inlined_call_operand.vmem [shape: f32[1,32], index: 9, kind: input, shape index: {}]   ;;  %s4746_s10 = inlined_call_operand.vmem [shape: bf16[2,8,8,32], index: 10, kind: output, shape index: {}]  }
   0x1 LB: > { %s3217_s14 = sadd.s32 4294967295, %s3796_s13   ;;  %p3221_p0 = scmp.ge.s32.totalorder %s3796_s13, 1  ;;  %s3796_s13 = sphi %s3859_s13, %s20_s13  }
   0x2   : > { %p312_p1 = scmp.lt.s32.totalorder %s3796_s13, 3 }
   0x4   : > { %p313_p2 = pnand %p3221_p0, %p312_p1 }
   0x6   : > { %316 = sbr.rel (%p313_p2) target bundleno = 3512 (0xdb8), region = 60 }
   0xd   : > { %p350_p3 = scmp.lt.s32.totalorder %s3217_s14, 1  ;;  %vm377_vm0 = vcmask 261120   ;;  %v517_v60 = vld [vmem:[%s4739_s3] sm:$0xff]  ;;  %v518_v61 = vld [vmem:[%s4739_s3 + $0x8] sm:$0xff]  ;;  %v519_v63 = vld [vmem:[%s4739_s3 + $0x10] sm:$0xff]  ;;  %s3800_s26 = smov 112  }
   0xe   : > { %v521_v62 = vpack.c.bf16 %v518_v61, %v517_v60  ;;  %vm3802_vm5 = vmmov 0   ;;  %vm855_vm6 = vcmask 130048   ;;  %s3803_s27 = smov 96   ;;  %vm3153_vm7 = vcmask 257024  }
   0xf   : > { %s4760_s14 = smov (!%p350_p3, %s3217_s14), 1 }
  0x10   : > { %s3281_s15 = sshll.u32 %s4760_s14, 5  ;;  %3388 = vmatprep.subr.bf16.mxu1 %v521_v62 }
  0x11   : > { %s354_s18 = scalar_lea.vmem %s4736_s0, %s3281_s15  ;;  %3389 = vmatpush3.bf16.msra.mxu1 %v521_v62  ;;  %s4708_s23 = scalar_lea.vmem %s4746_s10, %s3281_s15 }
  0x12   : > { %v3284_v0 = vld [vmem:[%s354_s18] sm:$0xff]   ;;  %v3299_v1 = vld [vmem:[%s354_s18 + $0x8] sm:$0xff]   ;;  %v3300_v6 = vld [vmem:[%s354_s18 + $0x10] sm:$0xff]  }
  0x13   : > { %v3875_v2 = vunpack.c.l.bf16 %v3284_v0  ;;  %v3877_v3 = vunpack.c.l.bf16 %v3299_v1  ;;  %v3879_v4 = vunpack.c.h.bf16 %v3284_v0  ;;  %v3881_v5 = vunpack.c.h.bf16 %v3299_v1  ;;  %v3301_v13 = vld [vmem:[%s354_s18 + $0x18] sm:$0xff]  }
  0x14   : > { %v3891_v11 = vunpack.c.l.bf16 %v3300_v6  ;;  %v3893_v12 = vunpack.c.h.bf16 %v3300_v6  ;;  %v3899_v16 = vunpack.c.l.bf16 %v3301_v13  ;;  %v3901_v17 = vunpack.c.h.bf16 %v3301_v13  ;;  %v520_v0 = vld [vmem:[%s4739_s3 + $0x18] sm:$0xff]  ;;  %v607_v6 = vld [vmem:[%s4741_s5] sm:$0xff] }
  0x15   : > { %v378_v7 = vsel %vm377_vm0, %v3875_v2, 0.0  ;;  %v384_v8 = vsel %vm377_vm0, %v3877_v3, 0.0  ;;  %v381_v9 = vsel %vm377_vm0, %v3879_v4, 0.0  ;;  %v387_v10 = vsel %vm377_vm0, %v3881_v5, 0.0 }
  0x16   : > { %379 = vadd.xlane.f32.xlu0 %v378_v7  ;;  %385 = vadd.xlane.f32.xlu1 %v384_v8  ;;  %4750 = vst [vmem:[#allocation2_spill] sm:$0xff] %v3893_v12  ;;  %v390_v14 = vsel %vm377_vm0, %v3891_v11, 0.0  ;;  %v393_v15 = vsel %vm377_vm0, %v3893_v12, 0.0  ;;  %v396_v18 = vsel %vm377_vm0, %v3899_v16, 0.0  ;;  %v399_v19 = vsel %vm377_vm0, %v3901_v17, 0.0  ;;  %v608_v7 = vld [vmem:[%s4741_s5 + $0x8] sm:$0xff] }
  0x17   : > { %v522_v1 = vpack.c.bf16 %v520_v0, %v519_v63  ;;  %v3973_v8 = vpack.c.bf16 %v608_v7, %v607_v6  ;;  %v610_v63 = vld [vmem:[%s4741_s5 + $0x18] sm:$0xff] }
  0x19   : > { %3390 = vmatprep.subr.bf16.mxu1 %v522_v1 }
  0x1a   : > { %382 = vadd.xlane.f32.xlu0 %v381_v9  ;;  %388 = vadd.xlane.f32.xlu1 %v387_v10 }
  0x1b   : > { %3391 = vmatpush3.bf16.msra.mxu1 %v522_v1 }
  0x1c   : > { %3400 = vmatprep.subr.bf16.mxu1 %v3973_v8 }
  0x1e   : > { %391 = vadd.xlane.f32.xlu0 %v390_v14  ;;  %394 = vadd.xlane.f32.xlu1 %v393_v15 }
  0x22   : > { %397 = vadd.xlane.f32.xlu0 %v396_v18  ;;  %400 = vadd.xlane.f32.xlu1 %v399_v19 }
  0xa3   : > { %v380_v20 = vpop.xlane.xlu0 %379  ;;  %v386_v21 = vpop.xlane.xlu1 %385 }
  0xa4   : > { %v403_v22 = vmul.f32 0.03125, %v380_v20  ;;  %v405_v23 = vmul.f32 0.03125, %v386_v21 }
  0xa6   : > { %v3908_v24 = vsub.f32 %v3875_v2, %v403_v22  ;;  %v3911_v25 = vsub.f32 %v3877_v3, %v405_v23 }
  0xa7   : > { %v383_v26 = vpop.xlane.xlu0 %382  ;;  %v389_v27 = vpop.xlane.xlu1 %388 }
  0xa8   : > { %v404_v28 = vmul.f32 0.03125, %v383_v26  ;;  %v406_v29 = vmul.f32 0.03125, %v389_v27  ;;  %v419_v30 = vmul.f32 %v3908_v24, %v3908_v24  ;;  %v421_v31 = vmul.f32 %v3911_v25, %v3911_v25 }
  0xaa   : > { %v3918_v32 = vsub.f32 %v3879_v4, %v404_v28  ;;  %v3921_v33 = vsub.f32 %v3881_v5, %v406_v29  ;;  %v427_v34 = vsel %vm377_vm0, %v419_v30, 0.0  ;;  %v433_v37 = vsel %vm377_vm0, %v421_v31, 0.0 }
  0xab   : > { %428 = vadd.xlane.f32.xlu0 %v427_v34  ;;  %v392_v35 = vpop.xlane.xlu0 %391  ;;  %v395_v36 = vpop.xlane.xlu1 %394 }
  0xac   : > { %v407_v38 = vmul.f32 0.03125, %v392_v35  ;;  %v408_v39 = vmul.f32 0.03125, %v395_v36  ;;  %v420_v40 = vmul.f32 %v3918_v32, %v3918_v32  ;;  %v422_v41 = vmul.f32 %v3921_v33, %v3921_v33 }
  0xae   : > { %v3930_v42 = vsub.f32 %v3891_v11, %v407_v38  ;;  %v3933_v43 = vsub.f32 %v3893_v12, %v408_v39  ;;  %v430_v44 = vsel %vm377_vm0, %v420_v40, 0.0  ;;  %v436_v47 = vsel %vm377_vm0, %v422_v41, 0.0 }
  0xaf   : > { %434 = vadd.xlane.f32.xlu0 %v433_v37  ;;  %431 = vadd.xlane.f32.xlu1 %v430_v44  ;;  %v398_v45 = vpop.xlane.xlu0 %397  ;;  %v401_v46 = vpop.xlane.xlu1 %400  ;;  %v3226_v44 = vld [vmem:[%s4737_s1] ss:$0 sm:$0xff] }
  0xb0   : > { %v409_v48 = vmul.f32 0.03125, %v398_v45  ;;  %v410_v49 = vmul.f32 0.03125, %v401_v46  ;;  %v423_v50 = vmul.f32 %v3930_v42, %v3930_v42  ;;  %v424_v51 = vmul.f32 %v3933_v43, %v3933_v43 }
  0xb2   : > { %v3942_v52 = vsub.f32 %v3899_v16, %v409_v48  ;;  %v3945_v53 = vsub.f32 %v3901_v17, %v410_v49  ;;  %v439_v54 = vsel %vm377_vm0, %v423_v50, 0.0  ;;  %v442_v55 = vsel %vm377_vm0, %v424_v51, 0.0 }
  0xb3   : > { %437 = vadd.xlane.f32.xlu1 %v436_v47  ;;  %440 = vadd.xlane.f32.xlu0 %v439_v54 }
  0xb4   : > { %v425_v56 = vmul.f32 %v3942_v52, %v3942_v52  ;;  %v426_v57 = vmul.f32 %v3945_v53, %v3945_v53 }
  0xb6   : > { %v445_v58 = vsel %vm377_vm0, %v425_v56, 0.0  ;;  %v448_v59 = vsel %vm377_vm0, %v426_v57, 0.0 }
  0xb7   : > { %443 = vadd.xlane.f32.xlu1 %v442_v55  ;;  %446 = vadd.xlane.f32.xlu0 %v445_v58 }
  0xbb   : > { %449 = vadd.xlane.f32.xlu1 %v448_v59 }
 0x138   : > { %v429_v9 = vpop.xlane.xlu0 %428 }
 0x139   : > { %v451_v10 = vmul.f32 0.03125, %v429_v9 }
 0x13b   : > { %v459_v13 = vadd.f32 1e-05, %v451_v10 }
 0x13c   : > { %v432_v14 = vpop.xlane.xlu1 %431  ;;  %v435_v15 = vpop.xlane.xlu0 %434 }
 0x13d   : > { %3646 = vrsqrt.f32 %v459_v13  ;;  %v452_v18 = vmul.f32 0.03125, %v432_v14  ;;  %v453_v19 = vmul.f32 0.03125, %v435_v15 }
 0x13f   : > { %v460_v20 = vadd.f32 1e-05, %v452_v18  ;;  %v461_v21 = vadd.f32 1e-05, %v453_v19 }
 0x140   : > { %v438_v22 = vpop.xlane.xlu1 %437  ;;  %v441_v23 = vpop.xlane.xlu0 %440 }
 0x141   : > { %3648 = vrsqrt.f32 %v460_v20  ;;  %v454_v26 = vmul.f32 0.03125, %v438_v22  ;;  %v455_v27 = vmul.f32 0.03125, %v441_v23 }
 0x142   : > { %3650 = vrsqrt.f32 %v461_v21 }
 0x143   : > { %v462_v28 = vadd.f32 1e-05, %v454_v26  ;;  %v463_v29 = vadd.f32 1e-05, %v455_v27  ;;  %v690_v26 = vlaneseq  ;;  %v3228_v27 = vld [vmem:[%s4740_s4] ss:$0 sm:$0xff] }
 0x144   : > { %v444_v30 = vpop.xlane.xlu1 %443  ;;  %v447_v31 = vpop.xlane.xlu0 %446 }
 0x145   : > { %3652 = vrsqrt.f32 %v462_v28  ;;  %v456_v34 = vmul.f32 0.03125, %v444_v30  ;;  %v457_v35 = vmul.f32 0.03125, %v447_v31  ;;  %v691_v30 = vshrl.u32 %v690_v26, 7 }
 0x146   : > { %3654 = vrsqrt.f32 %v463_v29 }
 0x147   : > { %v3647_v36 = vpop.eup %3646  ;;  %v464_v37 = vadd.f32 1e-05, %v456_v34  ;;  %v465_v38 = vadd.f32 1e-05, %v457_v35 }
 0x148   : > { %v450_v39 = vpop.xlane.xlu1 %449  ;;  %v475_v40 = vmul.f32 %v3647_v36, %v3908_v24  ;;  %v3227_v24 = vld [vmem:[%s4738_s2] ss:$0 sm:$0xff] }
 0x149   : > { %3656 = vrsqrt.f32 %v464_v37  ;;  %v458_v41 = vmul.f32 0.03125, %v450_v39 }
 0x14a   : > { %3658 = vrsqrt.f32 %v465_v38  ;;  %v490_v49 = vmul.f32 %v3226_v44, %v475_v40 }
 0x14b   : > { %v3649_v45 = vpop.eup %3648  ;;  %v466_v46 = vadd.f32 1e-05, %v458_v41 }
 0x14c   : > { %v3651_v47 = vpop.eup %3650  ;;  %v476_v48 = vmul.f32 %v3649_v45, %v3918_v32  ;;  %v505_v57 = vadd.f32 %v3227_v24, %v490_v49  ;;  %v3799_v45 = vmov 1934713408  }
 0x14d   : > { %v477_v50 = vmul.f32 %v3651_v47, %v3911_v25  ;;  %3660 = vrsqrt.f32 %v466_v46  ;;  %v609_v25 = vld [vmem:[%s4741_s5 + $0x10] sm:$0xff]  ;;  %v752_v46 = vunpack.c.l.s4 %v3799_v45 }
 0x14e   : > { %v491_v51 = vmul.f32 %v3226_v44, %v476_v48  ;;  %v612_v13 = vpack.c.bf16 %v610_v63, %v609_v25 }
 0x14f   : > { %v3653_v54 = vpop.eup %3652  ;;  %v492_v59 = vmul.f32 %v3226_v44, %v477_v50 }
 0x150   : > { %v3655_v55 = vpop.eup %3654  ;;  %v478_v56 = vmul.f32 %v3653_v54, %v3921_v33  ;;  %v506_v58 = vadd.f32 %v3227_v24, %v491_v51 }
 0x151   : > { %v479_v60 = vmul.f32 %v3655_v55, %v3930_v42  ;;  %v507_v33 = vadd.f32 %v3227_v24, %v492_v59 }
 0x152   : > { %v513_v61 = vpack.c.bf16 %v506_v58, %v505_v57  ;;  %v493_v32 = vmul.f32 %v3226_v44, %v478_v56  ;;  %v753_v57 = vunpack.c.0.s8 %v752_v46 }
 0x153   : > { %v3657_v62 = vpop.eup %3656  ;;  %v494_v7 = vmul.f32 %v3226_v44, %v479_v60 }
 0x154   : > { %v3659_v0 = vpop.eup %3658  ;;  %v480_v1 = vmul.f32 %v3657_v62, %v3933_v43  ;;  %3392 = vmatprep.mubr.msk.bf16.mxu1 %vm377_vm0, %v513_v61  ;;  %v508_v6 = vadd.f32 %v3227_v24, %v493_v32  ;;  %v4014_v62 = vand.u32 127, %v690_v26 }
 0x155   : > { %v481_v42 = vmul.f32 %v3659_v0, %v3942_v52  ;;  %v509_v18 = vadd.f32 %v3227_v24, %v494_v7  ;;  %v4016_v7 = vsub.s32 %v753_v57, %v691_v30 }
 0x156   : > { %v514_v9 = vpack.c.bf16 %v508_v6, %v507_v33  ;;  %v495_v10 = vmul.f32 %v3226_v44, %v480_v1  ;;  %vm836_vm1 = vcmp.lt.s32.totalorder %v4014_v62, 8  ;;  %vm1349_vm2 = vcmp.ge.s32.totalorder %v4014_v62, 8 }
 0x157   : > { %v3661_v14 = vpop.eup %3660  ;;  %v496_v20 = vmul.f32 %v3226_v44, %v481_v42  ;;  %vm1350_vm3 = vcmp.lt.s32.totalorder %v4014_v62, 16  ;;  %v3278_v62 = vld [vmem:[%s4745_s9] ss:$0 sm:$0xff] }
 0x158   : > { %v482_v15 = vmul.f32 %v3661_v14, %v3945_v53  ;;  %3393 = vmatmul.mubr.msk.bf16.vlgmr.msra.gmra.mrb[0].mxu1 %vm377_vm0, %v514_v9  ;;  %v510_v19 = vadd.f32 %v3227_v24, %v495_v10  ;;  %v3798_v53 = vmov 1983009808   ;;  %v4021_v10 = vld [vmem:[%s4742_s6] ss:$0 sm:$0xff]  ;;  %vm4040_vm4 = vmand %vm1349_vm2, %vm1350_vm3 }
 0x159   : > { %3401 = vmatpush3.bf16.msra.mxu1 %v3973_v8  ;;  %v511_v22 = vadd.f32 %v3227_v24, %v496_v20  ;;  %v688_v8 = vunpack.c.l.s4 %v3798_v53 }
 0x15a   : > { %v515_v43 = vpack.c.bf16 %v510_v19, %v509_v18  ;;  %v497_v21 = vmul.f32 %v3226_v44, %v482_v15  ;;  %3402 = vmatprep.subr.bf16.mxu1 %v612_v13 }
 0x15b   : > { %v689_v29 = vunpack.c.0.s8 %v688_v8 }
 0x15c   : > { %3396 = vmatprep.mubr.msk.bf16.mxu1 %vm377_vm0, %v515_v43  ;;  %v512_v52 = vadd.f32 %v3227_v24, %v497_v21 }
 0x15d   : > { %3403 = vmatpush3.bf16.msra.mxu1 %v612_v13  ;;  %v4008_v41 = vsub.s32 %v689_v29, %v691_v30 }
 0x15e   : > { %v516_v23 = vpack.c.bf16 %v512_v52, %v511_v22 }
 0x160   : > { %3397 = vmatmul.mubr.msk.bf16.gmra.mrb[4].mxu1 %vm377_vm0, %v516_v23 }
 0x161   : > { %3404 = vmatprep.mubr.msk.bf16.mxu1 %vm377_vm0, %v513_v61 }
 0x168   : > { %3405 = vmatmul.mubr.msk.bf16.vlgmr.msra.gmra.mrb[8].mxu1 %vm377_vm0, %v514_v9 }
 0x169   : > { %3408 = vmatprep.mubr.msk.bf16.mxu1 %vm377_vm0, %v515_v43 }
 0x170   : > { %3409 = vmatmul.mubr.msk.bf16.gmra.mrb[12].mxu1 %vm377_vm0, %v516_v23 }
 0x22b   : > { %v3394_v28 = vpop.f32.mrb[0].mxu1 }
 0x22c   : > { %v585_v31 = vadd.f32 %v3394_v28, %v3228_v27  ;;  %v576_v34 = vpop.f32.mrb[1].mxu1 }
 0x22d   : > { %v577_v35 = vadd.f32 %v3228_v27, %v576_v34  ;;  %v3395_v36 = vpop.f32.mrb[2].mxu1 }
 0x22e   : > { %v588_v37 = vadd.f32 %v3395_v36, %v3228_v27  ;;  %v579_v38 = vpop.f32.mrb[3].mxu1 }
 0x22f   : > { %v685_v39 = vcombine.low %v577_v35, %v585_v31  ;;  %v686_v40 = vcombine.high %v577_v35, %v585_v31  ;;  %v580_v44 = vadd.f32 %v3228_v27, %v579_v38 }
 0x231   : > { %v701_v47 = vcombine.low %v580_v44, %v588_v37  ;;  %v702_v48 = vcombine.high %v580_v44, %v588_v37  ;;  %v693_v49 = vrot.slane %v685_v39, %v4008_v41  ;;  %v700_v50 = vrot.slane %v686_v40, %v4008_v41 }
 0x233   : > { %v709_v24 = vrot.slane %v701_v47, %v4008_v41  ;;  %v716_v51 = vrot.slane %v702_v48, %v4008_v41  ;;  %v3398_v54 = vpop.f32.mrb[4].mxu1 }
 0x234   : > { %v601_v55 = vadd.f32 %v3398_v54, %v3228_v27  ;;  %v592_v56 = vpop.f32.mrb[5].mxu1 }
 0x235   : > { %v749_v58 = vcombine.low %v693_v49, %v709_v24  ;;  %v750_v59 = vcombine.high %v693_v49, %v709_v24  ;;  %v765_v60 = vcombine.low %v700_v50, %v716_v51  ;;  %v766_v61 = vcombine.high %v700_v50, %v716_v51  ;;  %v3399_v32 = vpop.f32.mrb[6].mxu1 }
 0x236   : > { %v593_v25 = vadd.f32 %v3228_v27, %v592_v56  ;;  %v604_v63 = vadd.f32 %v3399_v32, %v3228_v27  ;;  %v595_v0 = vpop.f32.mrb[7].mxu1 }
 0x237   : > { %v596_v1 = vadd.f32 %v3228_v27, %v595_v0  ;;  %v764_v21 = vrot.slane %v750_v59, %v4016_v7  ;;  %v757_v22 = vrot.slane %v749_v58, %v4016_v7  ;;  %v4038_v52 = vrot.slane %v765_v60, %v4016_v7 }
 0x238   : > { %v717_v33 = vcombine.low %v593_v25, %v601_v55  ;;  %v718_v6 = vcombine.high %v593_v25, %v601_v55  ;;  %v4051_v35 = vrot.slane %v766_v61, %v4016_v7 }
 0x239   : > { %v733_v42 = vcombine.low %v596_v1, %v604_v63  ;;  %v734_v9 = vcombine.high %v596_v1, %v604_v63 }
 0x23a   : > { %v725_v13 = vrot.slane %v717_v33, %v4008_v41  ;;  %v4028_v14 = vrot.slane %v718_v6, %v4008_v41 }
 0x23b   : > { %v741_v15 = vrot.slane %v733_v42, %v4008_v41  ;;  %v4032_v18 = vrot.slane %v734_v9, %v4008_v41  ;;  %v3406_v19 = vpop.f32.mrb[8].mxu1 }
 0x23c   : > { %v663_v20 = vadd.f32 %v3406_v19, %v4021_v10  ;;  %v654_v43 = vpop.f32.mrb[9].mxu1 }
 0x23d   : > { %v781_v53 = vcombine.low %v725_v13, %v741_v15  ;;  %v782_v8 = vcombine.high %v725_v13, %v741_v15  ;;  %v797_v26 = vcombine.low %v4028_v14, %v4032_v18  ;;  %v798_v27 = vcombine.high %v4028_v14, %v4032_v18  ;;  %v3407_v28 = vpop.f32.mrb[10].mxu1 }
 0x23e   : > { %v1964_v29 = vmul.f32 0.35355338, %v663_v20  ;;  %v655_v30 = vadd.f32 %v4021_v10, %v654_v43  ;;  %v666_v31 = vadd.f32 %v3407_v28, %v4021_v10  ;;  %v657_v34 = vpop.f32.mrb[11].mxu1 }
 0x23f   : > { %v658_v36 = vadd.f32 %v4021_v10, %v657_v34  ;;  %v796_v37 = vrot.slane %v782_v8, %v4016_v7  ;;  %v789_v38 = vrot.slane %v781_v53, %v4016_v7  ;;  %v805_v39 = vrot.slane %v797_v26, %v4016_v7 }
 0x240   : > { %v4059_v40 = vsel %vm836_vm1, %v1964_v29, 0.0  ;;  %v2484_v44 = vsel %vm4040_vm4, %v1964_v29, 0.0  ;;  %v1962_v45 = vmul.f32 0.35355338, %v655_v30  ;;  %v1965_v46 = vmul.f32 0.35355338, %v666_v31 }
 0x241   : > { %v4063_v47 = vpack.c.bf16 %v666_v31, %v663_v20  ;;  %v1963_v48 = vmul.f32 0.35355338, %v658_v36  ;;  %v4065_v49 = vpack.c.bf16 %v658_v36, %v655_v30  ;;  %v815_v50 = vcombine.low %v764_v21, %v796_v37 }
 0x242   : > { %v4069_v24 = vsel %vm836_vm1, %v1962_v45, 0.0  ;;  %v2482_v51 = vsel %vm4040_vm4, %v1962_v45, 0.0  ;;  %v4075_v54 = vsel %vm836_vm1, %v1965_v46, 0.0  ;;  %v2485_v55 = vsel %vm4040_vm4, %v1965_v46, 0.0 }
 0x243   : > { %v4081_v57 = vpack.c.bf16 %v2485_v55, %v2484_v44  ;;  %v4085_v58 = vsel %vm836_vm1, %v1963_v48, 0.0  ;;  %v2483_v59 = vsel %vm4040_vm4, %v1963_v48, 0.0  ;;  %v3410_v60 = vpop.f32.mrb[12].mxu1  ;;  %v816_v0 = vcombine.high %v764_v21, %v796_v37 }
 0x244   : > { %v4091_v32 = vpack.c.bf16 %v2483_v59, %v2482_v51  ;;  %v679_v25 = vadd.f32 %v3410_v60, %v4021_v10  ;;  %v670_v63 = vpop.f32.mrb[13].mxu1  ;;  %v823_v6 = vmul.f32 0.35355338, %v815_v50  ;;  %v813_v42 = vcombine.low %v757_v22, %v789_v38 }
 0x245   : > { %v671_v1 = vadd.f32 %v4021_v10, %v670_v63  ;;  %v3411_v33 = vpop.f32.mrb[14].mxu1  ;;  %v814_v9 = vcombine.high %v757_v22, %v789_v38  ;;  %v824_v19 = vmul.f32 0.35355338, %v816_v0  ;;  %v4096_v20 = vpack.c.bf16 %v816_v0, %v815_v50 }
 0x246   : > { %v1968_v13 = vmul.f32 0.35355338, %v679_v25  ;;  %v682_v15 = vadd.f32 %v3411_v33, %v4021_v10  ;;  %v673_v43 = vpop.f32.mrb[15].mxu1  ;;  %v4100_v8 = vsel %vm836_vm1, %v823_v6, 0.0  ;;  %v1356_v21 = vsel %vm4040_vm4, %v823_v6, 0.0 }
 0x247   : > { %v1966_v53 = vmul.f32 0.35355338, %v671_v1  ;;  %v822_v26 = vmul.f32 0.35355338, %v814_v9  ;;  %904 = vrot.lane.b32.xlu1 %v4096_v20, %s3800_s26  ;;  %v4122_v36 = vsel %vm836_vm1, %v824_v19, 0.0  ;;  %v1357_v37 = vsel %vm4040_vm4, %v824_v19, 0.0 }
 0x248   : > { %v4106_v28 = vsel %vm836_vm1, %v1968_v13, 0.0  ;;  %v2488_v22 = vsel %vm4040_vm4, %v1968_v13, 0.0  ;;  %v1969_v29 = vmul.f32 0.35355338, %v682_v15  ;;  %v4110_v30 = vpack.c.bf16 %v682_v15, %v679_v25 }
 0x249   : > { %v4116_v31 = vsel %vm836_vm1, %v1966_v53, 0.0  ;;  %v2486_v34 = vsel %vm4040_vm4, %v1966_v53, 0.0  ;;  %v849_v45 = vpack.c.bf16 %v4122_v36, %v4100_v8  ;;  %v4134_v46 = vpack.c.bf16 %v1357_v37, %v1356_v21 }
 0x24a   : > { %v4128_v38 = vsel %vm836_vm1, %v1969_v29, 0.0  ;;  %v2489_v44 = vsel %vm4040_vm4, %v1969_v29, 0.0  ;;  %v4140_v51 = vpack.c.bf16 %v814_v9, %v813_v42  ;;  %v1355_v55 = vsel %vm4040_vm4, %v822_v26, 0.0 }
 0x24b   : > { %v4138_v50 = vpack.c.bf16 %v2489_v44, %v2488_v22  ;;  %v821_v59 = vmul.f32 0.35355338, %v813_v42  ;;  %v674_v60 = vadd.f32 %v4021_v10, %v673_v43  ;;  %v817_v25 = vcombine.low %v4038_v52, %v805_v39 }
 0x24c   : > { %v818_v63 = vcombine.high %v4038_v52, %v805_v39  ;;  %853 = vrot.lane.b32.xlu0 %v4140_v51, %s3800_s26  ;;  %v812_v0 = vrot.slane %v798_v27, %v4016_v7  ;;  %v841_v33 = vsel %vm836_vm1, %v822_v26, 0.0  ;;  %v4747_v13 = vmov 0.0  }
 0x24d   : > { %v1354_v6 = vsel %vm4040_vm4, %v821_v59, 0.0  ;;  %v1967_v42 = vmul.f32 0.35355338, %v674_v60  ;;  %v4157_v10 = vpack.c.bf16 %v674_v60, %v671_v1  ;;  %v825_v9 = vmul.f32 0.35355338, %v817_v25  ;;  %3412 = vmatprep.subr.bf16.mxu0 %v4747_v13  ;;  %3418 = vmatprep.subr.bf16.mxu1 %v4747_v13 }
 0x24e   : > { %v4161_v52 = vpack.c.bf16 %v1355_v55, %v1354_v6  ;;  %v826_v39 = vmul.f32 0.35355338, %v818_v63  ;;  %v4163_v14 = vpack.c.bf16 %v818_v63, %v817_v25  ;;  %v819_v18 = vcombine.low %v4051_v35, %v812_v0  ;;  %3414 = vmatprep.mubr.msk.bf16.mxu0 %vm3802_vm5, %v4747_v13  ;;  %3420 = vmatprep.mubr.msk.bf16.mxu1 %vm3802_vm5, %v4747_v13 }
 0x24f   : > { %v4172_v27 = vsel %vm836_vm1, %v1967_v42, 0.0  ;;  %v2487_v1 = vsel %vm4040_vm4, %v1967_v42, 0.0  ;;  %v844_v15 = vsel %vm836_vm1, %v825_v9, 0.0  ;;  %v1358_v19 = vsel %vm4040_vm4, %v825_v9, 0.0 }
 0x250   : > { %v4182_v53 = vpack.c.bf16 %v2487_v1, %v2486_v34  ;;  %v845_v8 = vsel %vm836_vm1, %v826_v39, 0.0  ;;  %v1359_v21 = vsel %vm4040_vm4, %v826_v39, 0.0  ;;  %954 = vrot.lane.b32.xlu1 %v4163_v14, %s3800_s26  ;;  %v820_v29 = vcombine.high %v4051_v35, %v812_v0 }
 0x251   : > { %v850_v26 = vpack.c.bf16 %v845_v8, %v844_v15  ;;  %v4190_v22 = vpack.c.bf16 %v1359_v21, %v1358_v19  ;;  %v827_v36 = vmul.f32 0.35355338, %v819_v18  ;;  %v840_v37 = vsel %vm836_vm1, %v821_v59, 0.0 }
 0x252   : > { %v828_v34 = vmul.f32 0.35355338, %v820_v29  ;;  %v4195_v44 = vpack.c.bf16 %v820_v29, %v819_v18  ;;  %v848_v25 = vpack.c.bf16 %v841_v33, %v840_v37 }
 0x253   : > { %v846_v55 = vsel %vm836_vm1, %v827_v36, 0.0  ;;  %v1360_v60 = vsel %vm4040_vm4, %v827_v36, 0.0 }
 0x254   : > { %v847_v63 = vsel %vm836_vm1, %v828_v34, 0.0  ;;  %v1361_v35 = vsel %vm4040_vm4, %v828_v34, 0.0  ;;  %1004 = vrot.lane.b32.xlu1 %v4195_v44, %s3800_s26 }
 0x255   : > { %v851_v59 = vpack.c.bf16 %v847_v63, %v846_v55  ;;  %v4207_v0 = vpack.c.bf16 %v1361_v35, %v1360_v60 }
 0x2b9   : > { %v905_v6 = vpop.permute.xlu1 %904 }
 0x2ba   : > { %v4210_v42 = vsel %vm855_vm6, %v905_v6, 0 }
 0x2bb   : > { %3419 = vmatpush3.bf16.xpose.msra.mxu1 %v4210_v42 }
 0x2bc   : > { %3430 = vmatprep.subr.bf16.mxu1 %v4747_v13 }
 0x2be   : > { %v854_v33 = vpop.permute.xlu0 %853 }
 0x2bf   : > { %v4215_v9 = vsel %vm855_vm6, %v854_v33, 0 }
 0x2c0   : > { %3413 = vmatpush3.bf16.xpose.msra.mxu0 %v4215_v9 }
 0x2c1   : > { %3424 = vmatprep.subr.bf16.mxu0 %v4747_v13 }
 0x2c2   : > { %v955_v39 = vpop.permute.xlu1 %954  ;;  %3421 = vmatmul.mubr.msk.bf16.vlgmr.msra.gmra.mrb[16].mxu1 %vm855_vm6, %v849_v45 }
 0x2c3   : > { %3432 = vmatprep.mubr.msk.bf16.mxu1 %vm3802_vm5, %v4747_v13  ;;  %v4223_v18 = vsel %vm855_vm6, %v955_v39, 0 }
 0x2c6   : > { %v1005_v1 = vpop.permute.xlu1 %1004 }
 0x2c7   : > { %3415 = vmatmul.mubr.msk.bf16.vlgmr.msra.gmra.mrb[0].mxu0 %vm855_vm6, %v848_v25  ;;  %v4227_v15 = vsel %vm855_vm6, %v1005_v1, 0 }
 0x2c8   : > { %3425 = vmatpush3.bf16.xpose.msra.mxu0 %v4223_v18  ;;  %3426 = vmatprep.mubr.msk.bf16.mxu0 %vm3802_vm5, %v4747_v13 }
 0x2c9   : > { %3431 = vmatpush3.bf16.xpose.msra.mxu1 %v4227_v15  ;;  %3436 = vmatprep.subr.bf16.mxu0 %v4747_v13 }
 0x2ca   : > { %3442 = vmatprep.subr.bf16.mxu1 %v4747_v13 }
 0x2cf   : > { %3427 = vmatmul.mubr.msk.bf16.vlgmr.msra.gmra.mrb[4].mxu0 %vm855_vm6, %v850_v26 }
 0x2d0   : > { %3433 = vmatmul.mubr.msk.bf16.vlgmr.msra.gmra.mrb[20].mxu1 %vm855_vm6, %v851_v59  ;;  %3438 = vmatprep.mubr.msk.bf16.mxu0 %vm3802_vm5, %v4747_v13 }
 0x2d1   : > { %3444 = vmatprep.mubr.msk.bf16.mxu1 %vm3802_vm5, %v4747_v13 }
 0x395   : > { %v946_v45 = vpop.f32.mrb[16].mxu1 }
 0x396   : > { %v3422_v19 = vpop.f32.mrb[17].mxu1  ;;  %v1059_v60 = vsel %vm855_vm6, %v946_v45, -inf }
 0x397   : > { %v949_v8 = vpop.f32.mrb[18].mxu1 }
 0x398   : > { %v3423_v21 = vpop.f32.mrb[19].mxu1  ;;  %v1062_v59 = vsel %vm855_vm6, %v949_v8, -inf }
 0x39a   : > { %v896_v29 = vpop.f32.mrb[0].mxu0 }
 0x39b   : > { %v3416_v36 = vpop.f32.mrb[1].mxu0  ;;  %v1053_v37 = vsel %vm855_vm6, %v896_v29, -inf }
 0x39c   : > { %1054 = vmax.xlane.f32.xlu0 %v1053_v37  ;;  %v899_v34 = vpop.f32.mrb[2].mxu0 }
 0x39d   : > { %v3417_v55 = vpop.f32.mrb[3].mxu0  ;;  %v1056_v26 = vsel %vm855_vm6, %v899_v34, -inf }
 0x39e   : > { %1057 = vmax.xlane.f32.xlu1 %v1056_v26 }
 0x3a0   : > { %1060 = vmax.xlane.f32.xlu0 %v1059_v60 }
 0x3a2   : > { %v996_v25 = vpop.f32.mrb[4].mxu0 }
 0x3a3   : > { %v1046_v63 = vpop.f32.mrb[20].mxu1  ;;  %v3428_v35 = vpop.f32.mrb[5].mxu0  ;;  %v1065_v36 = vsel %vm855_vm6, %v996_v25, -inf }
 0x3a4   : > { %v3434_v6 = vpop.f32.mrb[21].mxu1  ;;  %1063 = vmax.xlane.f32.xlu0 %v1062_v59  ;;  %v999_v33 = vpop.f32.mrb[6].mxu0  ;;  %v1071_v55 = vsel %vm855_vm6, %v1046_v63, -inf }
 0x3a5   : > { %v4245_v39 = vpop.f32.mrb[22].mxu1  ;;  %v3429_v1 = vpop.f32.mrb[7].mxu0  ;;  %v1068_v19 = vsel %vm855_vm6, %v999_v33, -inf }
 0x3a6   : > { %v3435_v21 = vpop.f32.mrb[23].mxu1  ;;  %1069 = vmax.xlane.f32.xlu1 %v1068_v19  ;;  %v1074_v37 = vsel %vm855_vm6, %v4245_v39, -inf }
 0x3a8   : > { %1066 = vmax.xlane.f32.xlu0 %v1065_v36 }
 0x3aa   : > { %1075 = vmax.xlane.f32.xlu1 %v1074_v37 }
 0x3ac   : > { %1072 = vmax.xlane.f32.xlu0 %v1071_v55 }
 0x429   : > { %v1055_v26 = vpop.xlane.xlu0 %1054 }
 0x42a   : > { %v1077_v60 = vsub.f32 %v896_v29, %v1055_v26 }
 0x42b   : > { %v1058_v35 = vpop.xlane.xlu1 %1057 }
 0x42c   : > { %v1085_v59 = vmul.f32 1.442695, %v1077_v60  ;;  %v1078_v6 = vsub.f32 %v899_v34, %v1058_v35 }
 0x42d   : > { %v1061_v1 = vpop.xlane.xlu0 %1060 }
 0x42e   : > { %3662 = vpow2.f32 %v1085_v59  ;;  %v1087_v48 = vmul.f32 1.442695, %v1078_v6  ;;  %v1079_v21 = vsub.f32 %v946_v45, %v1061_v1 }
 0x430   : > { %3664 = vpow2.f32 %v1087_v48  ;;  %v1089_v19 = vmul.f32 1.442695, %v1079_v21 }
 0x431   : > { %v1064_v43 = vpop.xlane.xlu0 %1063 }
 0x432   : > { %3666 = vpow2.f32 %v1089_v19  ;;  %v1080_v36 = vsub.f32 %v949_v8, %v1064_v43 }
 0x433   : > { %v1070_v35 = vpop.xlane.xlu1 %1069 }
 0x434   : > { %v1091_v56 = vmul.f32 1.442695, %v1080_v36  ;;  %v1082_v59 = vsub.f32 %v999_v33, %v1070_v35 }
 0x435   : > { %v1067_v61 = vpop.xlane.xlu0 %1066 }
 0x436   : > { %3668 = vpow2.f32 %v1091_v56  ;;  %v1081_v37 = vsub.f32 %v996_v25, %v1067_v61  ;;  %v1095_v1 = vmul.f32 1.442695, %v1082_v59 }
 0x437   : > { %v1076_v6 = vpop.xlane.xlu1 %1075 }
 0x438   : > { %v3663_v13 = vpop.eup %3662  ;;  %v1093_v55 = vmul.f32 1.442695, %v1081_v37  ;;  %v1084_v21 = vsub.f32 %v4245_v39, %v1076_v6 }
 0x439   : > { %v1073_v12 = vpop.xlane.xlu0 %1072  ;;  %v1101_v29 = vsel %vm855_vm6, %v3663_v13, 0.0 }
 0x43a   : > { %v3665_v26 = vpop.eup %3664  ;;  %3670 = vpow2.f32 %v1093_v55  ;;  %v1083_v34 = vsub.f32 %v1046_v63, %v1073_v12  ;;  %1102 = vadd.xlane.f32.xlu0 %v1101_v29  ;;  %v1099_v19 = vmul.f32 1.442695, %v1084_v21 }
 0x43b   : > { %v1104_v45 = vsel %vm855_vm6, %v3665_v26, 0.0 }
 0x43c   : > { %v3667_v48 = vpop.eup %3666  ;;  %v1097_v60 = vmul.f32 1.442695, %v1083_v34  ;;  %1105 = vadd.xlane.f32.xlu1 %v1104_v45  ;;  %v4753_v45 = vmov 0.0  }
 0x43d   : > { %v1107_v43 = vsel %vm855_vm6, %v3667_v48, 0.0 }
 0x43e   : > { %3672 = vpow2.f32 %v1097_v60  ;;  %1108 = vadd.xlane.f32.xlu0 %v1107_v43 }
 0x43f   : > { %3674 = vpow2.f32 %v1095_v1 }
 0x440   : > { %v3669_v56 = vpop.eup %3668  ;;  %3676 = vpow2.f32 %v1099_v19 }
 0x441   : > { %v1110_v61 = vsel %vm855_vm6, %v3669_v56, 0.0 }
 0x442   : > { %1111 = vadd.xlane.f32.xlu1 %v1110_v61 }
 0x444   : > { %v4256_v8 = vpop.eup %3670 }
 0x445   : > { %v1113_v25 = vsel %vm855_vm6, %v4256_v8, 0.0 }
 0x446   : > { %1114 = vadd.xlane.f32.xlu0 %v1113_v25 }
 0x448   : > { %v4260_v12 = vpop.eup %3672 }
 0x449   : > { %v1119_v63 = vsel %vm855_vm6, %v4260_v12, 0.0  ;;  %v3675_v36 = vpop.eup %3674 }
 0x44a   : > { %1120 = vadd.xlane.f32.xlu0 %v1119_v63  ;;  %v1116_v37 = vsel %vm855_vm6, %v3675_v36, 0.0  ;;  %v3677_v55 = vpop.eup %3676 }
 0x453   : > { %1192 = vrot.lane.b32.xlu1 %v4096_v20, %s3803_s27  ;;  %v1122_v20 = vsel %vm855_vm6, %v3677_v55, 0.0 }
 0x457   : > { %1239 = vrot.lane.b32.xlu1 %v4163_v14, %s3803_s27 }
 0x460   : > { %1145 = vrot.lane.b32.xlu0 %v4140_v51, %s3803_s27 }
 0x47b   : > { %1117 = vadd.xlane.f32.xlu1 %v1116_v37 }
 0x47f   : > { %1123 = vadd.xlane.f32.xlu1 %v1122_v20 }
 0x490   : > { %1286 = vrot.lane.b32.xlu1 %v4195_v44, %s3803_s27 }
 0x4c7   : > { %v1103_v51 = vpop.xlane.xlu0 %1102 }
 0x4c9   : > { %v1106_v14 = vpop.xlane.xlu1 %1105 }
 0x4ca   : > { %3678 = vrcp.f32 %v1106_v14 }
 0x4cb   : > { %v1109_v33 = vpop.xlane.xlu0 %1108  ;;  %3680 = vrcp.f32 %v1103_v51 }
 0x4cc   : > { %3682 = vrcp.f32 %v1109_v33 }
 0x4cf   : > { %v1112_v39 = vpop.xlane.xlu1 %1111 }
 0x4d0   : > { %3684 = vrcp.f32 %v1112_v39 }
 0x4d3   : > { %v1115_v29 = vpop.xlane.xlu0 %1114  ;;  %v4275_v34 = vpop.permute.xlu1 %1192 }
 0x4d4   : > { %3443 = vmatpush3.bf16.msra.mxu1 %v4275_v34  ;;  %v3679_v60 = vpop.eup %3678  ;;  %3686 = vrcp.f32 %v1115_v29 }
 0x4d5   : > { %3454 = vmatprep.subr.bf16.mxu1 %v4753_v45  ;;  %v3681_v43 = vpop.eup %3680  ;;  %v1134_v44 = vmul.f32 %v3679_v60, %v3665_v26 }
 0x4d6   : > { %v3683_v25 = vpop.eup %3682  ;;  %v1133_v35 = vmul.f32 %v3681_v43, %v3663_v13 }
 0x4d7   : > { %v1121_v61 = vpop.xlane.xlu0 %1120  ;;  %v1135_v59 = vmul.f32 %v3683_v25, %v3667_v48  ;;  %v4280_v37 = vpop.permute.xlu1 %1239 }
 0x4d8   : > { %v1141_v21 = vpack.c.bf16 %v1134_v44, %v1133_v35 }
 0x4da   : > { %v3685_v63 = vpop.eup %3684 }
 0x4db   : > { %v1136_v6 = vmul.f32 %v3685_v63, %v3669_v56  ;;  %v1146_v1 = vpop.permute.xlu0 %1145 }
 0x4dc   : > { %3437 = vmatpush3.bf16.msra.mxu0 %v1146_v1 }
 0x4dd   : > { %v1142_v19 = vpack.c.bf16 %v1136_v6, %v1135_v59  ;;  %3448 = vmatprep.subr.bf16.mxu0 %v4753_v45 }
 0x4de   : > { %v3687_v56 = vpop.eup %3686 }
 0x4df   : > { %3439 = vmatmul.mubr.msk.bf16.vlgmr.msra.gmra.mrb[8].mxu0 %vm855_vm6, %v1141_v21  ;;  %3445 = vmatmul.mubr.msk.bf16.vlgmr.msra.gmra.mrb[24].mxu1 %vm855_vm6, %v1142_v19  ;;  %v1137_v51 = vmul.f32 %v3687_v56, %v4256_v8 }
 0x4e0   : > { %3449 = vmatpush3.bf16.msra.mxu0 %v4280_v37  ;;  %3450 = vmatprep.mubr.msk.bf16.mxu0 %vm3802_vm5, %v4753_v45 }
 0x4e1   : > { %3460 = vmatprep.subr.bf16.mxu0 %v4753_v45  ;;  %3456 = vmatprep.mubr.msk.bf16.mxu1 %vm3802_vm5, %v4753_v45 }
 0x508   : > { %v1118_v13 = vpop.xlane.xlu1 %1117 }
 0x509   : > { %3688 = vrcp.f32 %v1118_v13 }
 0x50a   : > { %3690 = vrcp.f32 %v1121_v61 }
 0x50c   : > { %v1124_v26 = vpop.xlane.xlu1 %1123 }
 0x50d   : > { %3692 = vrcp.f32 %v1124_v26 }
 0x510   : > { %v4290_v48 = vpop.permute.xlu1 %1286 }
 0x511   : > { %3455 = vmatpush3.bf16.msra.mxu1 %v4290_v48 }
 0x512   : > { %3466 = vmatprep.subr.bf16.mxu1 %v4753_v45 }
 0x513   : > { %v3689_v20 = vpop.eup %3688 }
 0x514   : > { %v1138_v14 = vmul.f32 %v3689_v20, %v3675_v36  ;;  %v3691_v33 = vpop.eup %3690 }
 0x515   : > { %v1139_v29 = vmul.f32 %v3691_v33, %v4260_v12 }
 0x516   : > { %v1143_v39 = vpack.c.bf16 %v1138_v14, %v1137_v51 }
 0x517   : > { %v3693_v60 = vpop.eup %3692 }
 0x518   : > { %v1140_v43 = vmul.f32 %v3693_v60, %v3677_v55  ;;  %3451 = vmatmul.mubr.msk.bf16.vlgmr.msra.gmra.mrb[12].mxu0 %vm855_vm6, %v1143_v39 }
 0x519   : > { %3461 = vmatpush3.bf16.xpose.msra.mxu0 %v4215_v9  ;;  %3462 = vmatprep.mubr.msk.bf16.mxu0 %vm3802_vm5, %v4753_v45 }
 0x51a   : > { %v1144_v61 = vpack.c.bf16 %v1140_v43, %v1139_v29  ;;  %3472 = vmatprep.subr.bf16.mxu0 %v4753_v45 }
 0x51c   : > { %3457 = vmatmul.mubr.msk.bf16.vlgmr.msra.gmra.mrb[28].mxu1 %vm855_vm6, %v1144_v61 }
 0x51d   : > { %3467 = vmatpush3.bf16.xpose.msra.mxu1 %v4210_v42  ;;  %3468 = vmatprep.mubr.msk.bf16.mxu1 %vm3802_vm5, %v4753_v45 }
 0x51e   : > { %3478 = vmatprep.subr.bf16.mxu1 %v4753_v45 }
 0x520   : > { %3463 = vmatmul.mubr.msk.bf16.vlgmr.msra.gmra.mrb[16].mxu0 %vm855_vm6, %v4161_v52 }
 0x521   : > { %3473 = vmatpush3.bf16.xpose.msra.mxu0 %v4223_v18  ;;  %3474 = vmatprep.mubr.msk.bf16.mxu0 %vm3802_vm5, %v4753_v45 }
 0x522   : > { %3484 = vmatprep.subr.bf16.mxu0 %v4753_v45 }
 0x524   : > { %3469 = vmatmul.mubr.msk.bf16.vlgmr.msra.gmra.mrb[32].mxu1 %vm855_vm6, %v4134_v46 }
 0x525   : > { %3479 = vmatpush3.bf16.xpose.msra.mxu1 %v4227_v15  ;;  %3480 = vmatprep.mubr.msk.bf16.mxu1 %vm3802_vm5, %v4753_v45 }
 0x526   : > { %3490 = vmatprep.subr.bf16.mxu1 %v4753_v45 }
 0x528   : > { %3475 = vmatmul.mubr.msk.bf16.vlgmr.msra.gmra.mrb[20].mxu0 %vm855_vm6, %v4190_v22 }
 0x529   : > { %3485 = vmatpush3.bf16.msra.mxu0 %v1146_v1  ;;  %3486 = vmatprep.mubr.msk.bf16.mxu0 %vm3802_vm5, %v4753_v45 }
 0x52a   : > { %3496 = vmatprep.subr.bf16.mxu0 %v4753_v45 }
 0x52c   : > { %3481 = vmatmul.mubr.msk.bf16.vlgmr.msra.gmra.mrb[36].mxu1 %vm855_vm6, %v4207_v0 }
 0x52d   : > { %3491 = vmatpush3.bf16.msra.mxu1 %v4275_v34  ;;  %3492 = vmatprep.mubr.msk.bf16.mxu1 %vm3802_vm5, %v4753_v45 }
 0x52e   : > { %3502 = vmatprep.subr.bf16.mxu1 %v4753_v45 }
 0x5b2   : > { %v4329_v46 = vpop.f32.mrb[8].mxu0  ;;  %v4331_v52 = vpop.f32.mrb[24].mxu1 }
 0x5b3   : > { %v3440_v22 = vpop.f32.mrb[9].mxu0  ;;  %v3446_v42 = vpop.f32.mrb[25].mxu1 }
 0x5b4   : > { %v4333_v9 = vpop.f32.mrb[10].mxu0  ;;  %v4335_v18 = vpop.f32.mrb[26].mxu1 }
 0x5b5   : > { %v3441_v15 = vpop.f32.mrb[11].mxu0  ;;  %v3447_v8 = vpop.f32.mrb[27].mxu1 }
 0x5eb   : > { %v4337_v0 = vpop.f32.mrb[12].mxu0 }
 0x5ec   : > { %v3452_v12 = vpop.f32.mrb[13].mxu0 }
 0x5ed   : > { %v4339_v36 = vpop.f32.mrb[14].mxu0 }
 0x5ee   : > { %v3453_v55 = vpop.f32.mrb[15].mxu0 }
 0x5ef   : > { %v4341_v34 = vpop.f32.mrb[28].mxu1 }
 0x5f0   : > { %v3458_v25 = vpop.f32.mrb[29].mxu1 }
 0x5f1   : > { %v4343_v44 = vpop.f32.mrb[30].mxu1 }
 0x5f2   : > { %v3459_v63 = vpop.f32.mrb[31].mxu1 }
 0x5f3   : > { %v1403_v35 = vpop.f32.mrb[16].mxu0 }
 0x5f4   : > { %v3464_v59 = vpop.f32.mrb[17].mxu0  ;;  %v1542_v6 = vsel %vm855_vm6, %v1403_v35, -inf }
 0x5f5   : > { %1543 = vmax.xlane.f32.xlu0 %v1542_v6  ;;  %v1406_v1 = vpop.f32.mrb[18].mxu0 }
 0x5f6   : > { %v3465_v21 = vpop.f32.mrb[19].mxu0  ;;  %v1545_v19 = vsel %vm855_vm6, %v1406_v1, -inf }
 0x5f7   : > { %v1447_v13 = vpop.f32.mrb[32].mxu1  ;;  %1546 = vmax.xlane.f32.xlu1 %v1545_v19 }
 0x5f8   : > { %v3470_v26 = vpop.f32.mrb[33].mxu1  ;;  %v1548_v56 = vsel %vm855_vm6, %v1447_v13, -inf }
 0x5f9   : > { %v1450_v20 = vpop.f32.mrb[34].mxu1  ;;  %1549 = vmax.xlane.f32.xlu0 %v1548_v56 }
 0x5fa   : > { %v3471_v51 = vpop.f32.mrb[35].mxu1  ;;  %v1551_v39 = vsel %vm855_vm6, %v1450_v20, -inf }
 0x5fb   : > { %v1491_v14 = vpop.f32.mrb[20].mxu0 }
 0x5fc   : > { %v3476_v33 = vpop.f32.mrb[21].mxu0  ;;  %v1554_v42 = vsel %vm855_vm6, %v1491_v14, -inf }
 0x5fd   : > { %1552 = vmax.xlane.f32.xlu0 %v1551_v39  ;;  %v1494_v60 = vpop.f32.mrb[22].mxu0 }
 0x5fe   : > { %v3477_v29 = vpop.f32.mrb[23].mxu0  ;;  %v1557_v43 = vsel %vm855_vm6, %v1494_v60, -inf }
 0x5ff   : > { %v1535_v61 = vpop.f32.mrb[36].mxu1  ;;  %1558 = vmax.xlane.f32.xlu1 %v1557_v43 }
 0x600   : > { %v3482_v22 = vpop.f32.mrb[37].mxu1  ;;  %v1560_v55 = vsel %vm855_vm6, %v1535_v61, -inf }
 0x601   : > { %v1538_v15 = vpop.f32.mrb[38].mxu1  ;;  %1555 = vmax.xlane.f32.xlu0 %v1554_v42 }
 0x602   : > { %v3483_v8 = vpop.f32.mrb[39].mxu1  ;;  %v1563_v12 = vsel %vm855_vm6, %v1538_v15, -inf }
 0x603   : > { %1564 = vmax.xlane.f32.xlu1 %v1563_v12 }
 0x605   : > { %1561 = vmax.xlane.f32.xlu0 %v1560_v55 }
 0x682   : > { %v1544_v25 = vpop.xlane.xlu0 %1543 }
 0x683   : > { %v1566_v63 = vsub.f32 %v1403_v35, %v1544_v25 }
 0x684   : > { %v1547_v59 = vpop.xlane.xlu1 %1546 }
 0x685   : > { %v1574_v6 = vmul.f32 1.442695, %v1566_v63  ;;  %v1567_v21 = vsub.f32 %v1406_v1, %v1547_v59 }
 0x686   : > { %v1550_v19 = vpop.xlane.xlu0 %1549 }
 0x687   : > { %3694 = vpow2.f32 %v1574_v6  ;;  %v1576_v26 = vmul.f32 1.442695, %v1567_v21  ;;  %v1568_v56 = vsub.f32 %v1447_v13, %v1550_v19 }
 0x689   : > { %3696 = vpow2.f32 %v1576_v26  ;;  %v1578_v51 = vmul.f32 1.442695, %v1568_v56 }
 0x68a   : > { %v1553_v33 = vpop.xlane.xlu0 %1552 }
 0x68b   : > { %3698 = vpow2.f32 %v1578_v51  ;;  %v1569_v39 = vsub.f32 %v1450_v20, %v1553_v33 }
 0x68c   : > { %v1559_v26 = vpop.xlane.xlu1 %1558 }
 0x68d   : > { %v1580_v29 = vmul.f32 1.442695, %v1569_v39  ;;  %v1571_v56 = vsub.f32 %v1494_v60, %v1559_v26 }
 0x68e   : > { %v1556_v43 = vpop.xlane.xlu0 %1555 }
 0x68f   : > { %3700 = vpow2.f32 %v1580_v29  ;;  %v1570_v22 = vsub.f32 %v1491_v14, %v1556_v43  ;;  %v1584_v33 = vmul.f32 1.442695, %v1571_v56 }
 0x690   : > { %v1565_v51 = vpop.xlane.xlu1 %1564 }
 0x691   : > { %v3695_v42 = vpop.eup %3694  ;;  %v1582_v8 = vmul.f32 1.442695, %v1570_v22  ;;  %v1573_v39 = vsub.f32 %v1538_v15, %v1565_v51 }
 0x692   : > { %v1562_v12 = vpop.xlane.xlu0 %1561  ;;  %v1590_v35 = vsel %vm855_vm6, %v3695_v42, 0.0 }
 0x693   : > { %v3697_v55 = vpop.eup %3696  ;;  %3702 = vpow2.f32 %v1582_v8  ;;  %v1572_v1 = vsub.f32 %v1535_v61, %v1562_v12  ;;  %1591 = vadd.xlane.f32.xlu0 %v1590_v35  ;;  %v1588_v29 = vmul.f32 1.442695, %v1573_v39 }
 0x694   : > { %v1593_v13 = vsel %vm855_vm6, %v3697_v55, 0.0 }
 0x695   : > { %v3699_v25 = vpop.eup %3698  ;;  %v1586_v63 = vmul.f32 1.442695, %v1572_v1  ;;  %1594 = vadd.xlane.f32.xlu1 %v1593_v13 }
 0x696   : > { %v1596_v20 = vsel %vm855_vm6, %v3699_v25, 0.0 }
 0x697   : > { %3704 = vpow2.f32 %v1586_v63  ;;  %1597 = vadd.xlane.f32.xlu0 %v1596_v20 }
 0x698   : > { %3706 = vpow2.f32 %v1584_v33 }
 0x699   : > { %v3701_v59 = vpop.eup %3700  ;;  %3708 = vpow2.f32 %v1588_v29 }
 0x69a   : > { %v1599_v14 = vsel %vm855_vm6, %v3701_v59, 0.0 }
 0x69b   : > { %1600 = vadd.xlane.f32.xlu1 %v1599_v14 }
 0x69d   : > { %v3703_v6 = vpop.eup %3702 }
 0x69e   : > { %v1602_v21 = vsel %vm855_vm6, %v3703_v6, 0.0 }
 0x69f   : > { %1603 = vadd.xlane.f32.xlu0 %v1602_v21 }
 0x6a1   : > { %v4358_v19 = vpop.eup %3704 }
 0x6a2   : > { %v1608_v61 = vsel %vm855_vm6, %v4358_v19, 0.0  ;;  %v3707_v43 = vpop.eup %3706 }
 0x6a3   : > { %1609 = vadd.xlane.f32.xlu0 %v1608_v61  ;;  %v1605_v22 = vsel %vm855_vm6, %v3707_v43, 0.0  ;;  %v3709_v8 = vpop.eup %3708 }
 0x6a4   : > { %v1611_v12 = vsel %vm855_vm6, %v3709_v8, 0.0 }
 0x6ac   : > { %2037 = vrot.lane.b32.xlu1 %v4063_v47, %s3800_s26 }
 0x6b9   : > { %1987 = vrot.lane.b32.xlu0 %v4065_v49, %s3800_s26 }
 0x6d0   : > { %1606 = vadd.xlane.f32.xlu1 %v1605_v22 }
 0x6d4   : > { %1612 = vadd.xlane.f32.xlu1 %v1611_v12 }
 0x6e5   : > { %2087 = vrot.lane.b32.xlu1 %v4157_v10, %s3800_s26 }
 0x6e9   : > { %2137 = vrot.lane.b32.xlu1 %v4110_v30, %s3800_s26 }
 0x720   : > { %v1592_v60 = vpop.xlane.xlu0 %1591 }
 0x721   : > { %3710 = vrcp.f32 %v1592_v60 }
 0x722   : > { %v1595_v15 = vpop.xlane.xlu1 %1594 }
 0x723   : > { %3712 = vrcp.f32 %v1595_v15 }
 0x724   : > { %v1598_v35 = vpop.xlane.xlu0 %1597 }
 0x725   : > { %3714 = vrcp.f32 %v1598_v35 }
 0x728   : > { %v1601_v1 = vpop.xlane.xlu1 %1600 }
 0x729   : > { %3716 = vrcp.f32 %v1601_v1 }
 0x72b   : > { %v3711_v13 = vpop.eup %3710 }
 0x72c   : > { %v1622_v20 = vmul.f32 %v3711_v13, %v3695_v42  ;;  %v1604_v42 = vpop.xlane.xlu0 %1603 }
 0x72d   : > { %v3713_v63 = vpop.eup %3712  ;;  %3718 = vrcp.f32 %v1604_v42 }
 0x72e   : > { %v1623_v14 = vmul.f32 %v3713_v63, %v3697_v55  ;;  %v2038_v55 = vpop.permute.xlu1 %2037 }
 0x72f   : > { %v3715_v61 = vpop.eup %3714 }
 0x730   : > { %v1630_v21 = vpack.c.bf16 %v1623_v14, %v1622_v20  ;;  %v1624_v56 = vmul.f32 %v3715_v61, %v3699_v25  ;;  %v4755_v61 = vpack.c.bf16 %v4075_v54, %v4059_v40  ;;  %v4757_v40 = vpack.c.bf16 %v4128_v38, %v4106_v28 }
 0x731   : > { %v1334_v28 = vsel %vm836_vm1, %v4333_v9, 0.0  ;;  %v1336_v9 = vsel %vm836_vm1, %v4335_v18, 0.0 }
 0x732   : > { %3487 = vmatmul.mubr.msk.bf16.vlgmr.msra.gmra.mrb[24].mxu0 %vm855_vm6, %v1630_v21 }
 0x733   : > { %v3717_v26 = vpop.eup %3716  ;;  %3497 = vmatpush3.bf16.msra.mxu0 %v4280_v37  ;;  %3498 = vmatprep.mubr.msk.bf16.mxu0 %vm3802_vm5, %v4753_v45  ;;  %v1610_v37 = vpop.xlane.xlu0 %1609 }
 0x734   : > { %v1625_v51 = vmul.f32 %v3717_v26, %v3701_v59  ;;  %3508 = vmatprep.subr.bf16.mxu0 %v4753_v45 }
 0x736   : > { %v1631_v33 = vpack.c.bf16 %v1625_v51, %v1624_v56 }
 0x737   : > { %v3719_v59 = vpop.eup %3718 }
 0x738   : > { %3493 = vmatmul.mubr.msk.bf16.vlgmr.msra.gmra.mrb[40].mxu1 %vm855_vm6, %v1631_v33  ;;  %v1626_v22 = vmul.f32 %v3719_v59, %v3703_v6 }
 0x739   : > { %3503 = vmatpush3.bf16.msra.mxu1 %v4290_v48  ;;  %3504 = vmatprep.mubr.msk.bf16.mxu1 %vm3802_vm5, %v4753_v45  ;;  %v1988_v48 = vpop.permute.xlu0 %1987 }
 0x73a   : > { %3514 = vmatprep.subr.bf16.mxu1 %v4753_v45  ;;  %v4384_v13 = vsel %vm855_vm6, %v1988_v48, 0 }
 0x75d   : > { %v1607_v39 = vpop.xlane.xlu1 %1606 }
 0x75e   : > { %3720 = vrcp.f32 %v1607_v39 }
 0x75f   : > { %3722 = vrcp.f32 %v1610_v37 }
 0x761   : > { %v1613_v25 = vpop.xlane.xlu1 %1612 }
 0x762   : > { %3724 = vrcp.f32 %v1613_v25 }
 0x765   : > { %v2088_v6 = vpop.permute.xlu1 %2087 }
 0x768   : > { %v3721_v29 = vpop.eup %3720 }
 0x769   : > { %v1627_v12 = vmul.f32 %v3721_v29, %v3707_v43  ;;  %v3723_v60 = vpop.eup %3722  ;;  %v4392_v43 = vsel %vm855_vm6, %v2038_v55, 0  ;;  %v2138_v14 = vpop.permute.xlu1 %2137 }
 0x76a   : > { %v1628_v1 = vmul.f32 %v3723_v60, %v4358_v19  ;;  %v4400_v19 = vsel %vm855_vm6, %v2088_v6, 0  ;;  %v4411_v21 = vsel %vm855_vm6, %v2138_v14, 0 }
 0x76b   : > { %v1632_v15 = vpack.c.bf16 %v1627_v12, %v1626_v22 }
 0x76c   : > { %v3725_v35 = vpop.eup %3724 }
 0x76d   : > { %v1629_v63 = vmul.f32 %v3725_v35, %v3709_v8  ;;  %3499 = vmatmul.mubr.msk.bf16.vlgmr.msra.gmra.mrb[28].mxu0 %vm855_vm6, %v1632_v15  ;;  %v4754_v8 = vpack.c.bf16 %v4085_v58, %v4069_v24  ;;  %v4756_v24 = vpack.c.bf16 %v4172_v27, %v4116_v31  ;;  %v1333_v58 = vsel %vm836_vm1, %v4329_v46, 0.0 }
 0x76e   : > { %3509 = vmatpush3.bf16.xpose.msra.mxu0 %v4384_v13  ;;  %3510 = vmatprep.mubr.msk.bf16.mxu0 %vm3802_vm5, %v4753_v45  ;;  %v1335_v46 = vsel %vm836_vm1, %v4331_v52, 0.0 }
 0x76f   : > { %v1633_v20 = vpack.c.bf16 %v1629_v63, %v1628_v1  ;;  %3520 = vmatprep.subr.bf16.mxu0 %v4753_v45 }
 0x771   : > { %3505 = vmatmul.mubr.msk.bf16.vlgmr.msra.gmra.mrb[44].mxu1 %vm855_vm6, %v1633_v20 }
 0x772   : > { %3515 = vmatpush3.bf16.xpose.msra.mxu1 %v4392_v43  ;;  %3516 = vmatprep.mubr.msk.bf16.mxu1 %vm3802_vm5, %v4753_v45 }
 0x773   : > { %3526 = vmatprep.subr.bf16.mxu1 %v4753_v45 }
 0x775   : > { %3511 = vmatmul.mubr.msk.bf16.vlgmr.msra.gmra.mrb[32].mxu0 %vm855_vm6, %v4754_v8 }
 0x776   : > { %3521 = vmatpush3.bf16.xpose.msra.mxu0 %v4400_v19  ;;  %3522 = vmatprep.mubr.msk.bf16.mxu0 %vm3802_vm5, %v4753_v45 }
 0x777   : > { %3532 = vmatprep.subr.bf16.mxu0 %v4753_v45 }
 0x779   : > { %3517 = vmatmul.mubr.msk.bf16.vlgmr.msra.gmra.mrb[48].mxu1 %vm855_vm6, %v4755_v61  ;;  %v1337_v61 = vsel %vm836_vm1, %v4337_v0, 0.0  ;;  %v1339_v0 = vsel %vm836_vm1, %v4341_v34, 0.0 }
 0x77a   : > { %3527 = vmatpush3.bf16.xpose.msra.mxu1 %v4411_v21  ;;  %3528 = vmatprep.mubr.msk.bf16.mxu1 %vm3802_vm5, %v4753_v45 }
 0x77b   : > { %3538 = vmatprep.subr.bf16.mxu1 %v4753_v45 }
 0x77d   : > { %3523 = vmatmul.mubr.msk.bf16.vlgmr.msra.gmra.mrb[36].mxu0 %vm855_vm6, %v4756_v24 }
 0x77e   : > { %3534 = vmatprep.mubr.msk.bf16.mxu0 %vm3802_vm5, %v4753_v45 }
 0x781   : > { %3529 = vmatmul.mubr.msk.bf16.vlgmr.msra.gmra.mrb[52].mxu1 %vm855_vm6, %v4757_v40 }
 0x782   : > { %3540 = vmatprep.mubr.msk.bf16.mxu1 %vm3802_vm5, %v4753_v45 }
 0x805   : > { %v1671_v54 = vpop.f32.mrb[24].mxu0 }
 0x806   : > { %v1810_v31 = vsel %vm4040_vm4, %v1671_v54, 0.0  ;;  %v3488_v27 = vpop.f32.mrb[25].mxu0 }
 0x807   : > { %v1818_v26 = vadd.f32 %v1810_v31, %v1333_v58  ;;  %v1674_v56 = vpop.f32.mrb[26].mxu0  ;;  %v1338_v31 = vsel %vm836_vm1, %v4339_v36, 0.0  ;;  %v1340_v36 = vsel %vm836_vm1, %v4343_v44, 0.0 }
 0x808   : > { %v1811_v38 = vsel %vm4040_vm4, %v1674_v56, 0.0  ;;  %v3489_v51 = vpop.f32.mrb[27].mxu0 }
 0x809   : > { %v1819_v33 = vadd.f32 %v1811_v38, %v1334_v28 }
 0x80b   : > { %v1715_v42 = vpop.f32.mrb[40].mxu1 }
 0x80c   : > { %v1812_v55 = vsel %vm4040_vm4, %v1715_v42, 0.0  ;;  %v3494_v37 = vpop.f32.mrb[41].mxu1 }
 0x80d   : > { %v1820_v39 = vadd.f32 %v1812_v55, %v1335_v46  ;;  %v1718_v25 = vpop.f32.mrb[42].mxu1 }
 0x80e   : > { %v1813_v59 = vsel %vm4040_vm4, %v1718_v25, 0.0  ;;  %v3495_v29 = vpop.f32.mrb[43].mxu1 }
 0x80f   : > { %v1826_v22 = vcombine.low %v1818_v26, %v1820_v39  ;;  %v1827_v12 = vcombine.high %v1818_v26, %v1820_v39  ;;  %v1821_v60 = vadd.f32 %v1813_v59, %v1336_v9 }
 0x811   : > { %v1842_v48 = vcombine.low %v1819_v33, %v1821_v60  ;;  %v1843_v15 = vcombine.high %v1819_v33, %v1821_v60  ;;  %v1834_v52 = vrot.slane %v1826_v22, %v4008_v41  ;;  %v1841_v35 = vrot.slane %v1827_v12, %v4008_v41 }
 0x813   : > { %v1850_v1 = vrot.slane %v1842_v48, %v4008_v41  ;;  %v1857_v63 = vrot.slane %v1843_v15, %v4008_v41 }
 0x815   : > { %v1890_v20 = vcombine.low %v1834_v52, %v1850_v1  ;;  %v1891_v6 = vcombine.high %v1834_v52, %v1850_v1  ;;  %v1906_v18 = vcombine.low %v1841_v35, %v1857_v63  ;;  %v1907_v8 = vcombine.high %v1841_v35, %v1857_v63 }
 0x840   : > { %v1759_v14 = vpop.f32.mrb[28].mxu0 }
 0x841   : > { %v1814_v24 = vsel %vm4040_vm4, %v1759_v14, 0.0  ;;  %v3500_v40 = vpop.f32.mrb[29].mxu0 }
 0x842   : > { %v1822_v54 = vadd.f32 %v1814_v24, %v1337_v61  ;;  %v1762_v58 = vpop.f32.mrb[30].mxu0 }
 0x843   : > { %v1815_v27 = vsel %vm4040_vm4, %v1762_v58, 0.0  ;;  %v3501_v26 = vpop.f32.mrb[31].mxu0 }
 0x844   : > { %v1823_v56 = vadd.f32 %v1815_v27, %v1338_v31  ;;  %v1803_v28 = vpop.f32.mrb[44].mxu1  ;;  %v1898_v31 = vrot.slane %v1890_v20, %v4016_v7  ;;  %v1905_v27 = vrot.slane %v1891_v6, %v4016_v7 }
 0x845   : > { %v1816_v38 = vsel %vm4040_vm4, %v1803_v28, 0.0  ;;  %v3506_v51 = vpop.f32.mrb[45].mxu1 }
 0x846   : > { %v1824_v33 = vadd.f32 %v1816_v38, %v1339_v0  ;;  %v1806_v42 = vpop.f32.mrb[46].mxu1  ;;  %v1914_v51 = vrot.slane %v1906_v18, %v4016_v7 }
 0x847   : > { %v1817_v46 = vsel %vm4040_vm4, %v1806_v42, 0.0  ;;  %v3507_v55 = vpop.f32.mrb[47].mxu1 }
 0x848   : > { %v1858_v37 = vcombine.low %v1822_v54, %v1824_v33  ;;  %v1859_v39 = vcombine.high %v1822_v54, %v1824_v33  ;;  %v1825_v25 = vadd.f32 %v1817_v46, %v1340_v36  ;;  %v4477_v9 = vpop.f32.mrb[32].mxu0  ;;  %v1921_v33 = vrot.slane %v1907_v8, %v4016_v7 }
 0x849   : > { %v3512_v34 = vpop.f32.mrb[33].mxu0  ;;  %v2186_v59 = vsel %vm855_vm6, %v4477_v9, -inf }
 0x84a   : > { %v1874_v29 = vcombine.low %v1823_v56, %v1825_v25  ;;  %v1875_v22 = vcombine.high %v1823_v56, %v1825_v25  ;;  %2187 = vmax.xlane.f32.xlu0 %v2186_v59  ;;  %v4481_v12 = vpop.f32.mrb[34].mxu0  ;;  %v1866_v48 = vrot.slane %v1858_v37, %v4008_v41  ;;  %v1873_v15 = vrot.slane %v1859_v39, %v4008_v41 }
 0x84b   : > { %v3513_v60 = vpop.f32.mrb[35].mxu0  ;;  %v2189_v44 = vsel %vm855_vm6, %v4481_v12, -inf }
 0x84c   : > { %v1882_v52 = vrot.slane %v1874_v29, %v4008_v41  ;;  %v1889_v35 = vrot.slane %v1875_v22, %v4008_v41  ;;  %v2079_v1 = vpop.f32.mrb[48].mxu1  ;;  %2190 = vmax.xlane.f32.xlu1 %v2189_v44 }
 0x84d   : > { %v3518_v63 = vpop.f32.mrb[49].mxu1  ;;  %v2192_v14 = vsel %vm855_vm6, %v2079_v1, -inf }
 0x84e   : > { %v1922_v61 = vcombine.low %v1866_v48, %v1882_v52  ;;  %v1923_v24 = vcombine.high %v1866_v48, %v1882_v52  ;;  %v1938_v40 = vcombine.low %v1873_v15, %v1889_v35  ;;  %v1939_v54 = vcombine.high %v1873_v15, %v1889_v35  ;;  %v2082_v58 = vpop.f32.mrb[50].mxu1  ;;  %2193 = vmax.xlane.f32.xlu0 %v2192_v14 }
 0x84f   : > { %v3519_v26 = vpop.f32.mrb[51].mxu1  ;;  %v2195_v36 = vsel %vm855_vm6, %v2082_v58, -inf }
 0x850   : > { %v1930_v56 = vrot.slane %v1922_v61, %v4016_v7  ;;  %v1937_v41 = vrot.slane %v1923_v24, %v4016_v7  ;;  %v1946_v28 = vrot.slane %v1938_v40, %v4016_v7  ;;  %v1953_v0 = vrot.slane %v1939_v54, %v4016_v7  ;;  %v2129_v38 = vpop.f32.mrb[36].mxu0 }
 0x851   : > { %v3524_v42 = vpop.f32.mrb[37].mxu0  ;;  %v2198_v44 = vsel %vm855_vm6, %v2129_v38, -inf }
 0x852   : > { %v1956_v20 = vcombine.low %v1905_v27, %v1937_v41  ;;  %v1957_v46 = vcombine.high %v1905_v27, %v1937_v41  ;;  %2196 = vmax.xlane.f32.xlu0 %v2195_v36  ;;  %v4499_v6 = vpop.f32.mrb[38].mxu0  ;;  %v1954_v55 = vcombine.low %v1898_v31, %v1930_v56  ;;  %v1955_v37 = vcombine.high %v1898_v31, %v1930_v56 }
 0x853   : > { %v3525_v39 = vpop.f32.mrb[39].mxu0  ;;  %v2201_v25 = vsel %vm855_vm6, %v4499_v6, -inf  ;;  %v1958_v34 = vcombine.low %v1914_v51, %v1946_v28  ;;  %v1959_v59 = vcombine.high %v1914_v51, %v1946_v28  ;;  %v1960_v29 = vcombine.low %v1921_v33, %v1953_v0 }
 0x854   : > { %v4503_v18 = vpack.c.bf16 %v1957_v46, %v1956_v20  ;;  %v2179_v7 = vpop.f32.mrb[52].mxu1  ;;  %2202 = vmax.xlane.f32.xlu1 %v2201_v25  ;;  %v4505_v8 = vpack.c.bf16 %v1955_v37, %v1954_v55  ;;  %v1961_v22 = vcombine.high %v1921_v33, %v1953_v0 }
 0x855   : > { %v3530_v60 = vpop.f32.mrb[53].mxu1  ;;  %v4508_v48 = vpack.c.bf16 %v1959_v59, %v1958_v34  ;;  %v2204_v14 = vsel %vm855_vm6, %v2179_v7, -inf }
 0x856   : > { %v2182_v15 = vpop.f32.mrb[54].mxu1  ;;  %2199 = vmax.xlane.f32.xlu0 %v2198_v44  ;;  %v4510_v52 = vpack.c.bf16 %v1961_v22, %v1960_v29 }
 0x857   : > { %v3531_v35 = vpop.f32.mrb[55].mxu1  ;;  %v2207_v63 = vsel %vm855_vm6, %v2182_v15, -inf }
 0x858   : > { %2208 = vmax.xlane.f32.xlu1 %v2207_v63 }
 0x85a   : > { %2205 = vmax.xlane.f32.xlu0 %v2204_v14 }
 0x8d7   : > { %v2188_v61 = vpop.xlane.xlu0 %2187 }
 0x8d8   : > { %v2210_v24 = vsub.f32 %v4477_v9, %v2188_v61 }
 0x8d9   : > { %v2191_v40 = vpop.xlane.xlu1 %2190 }
 0x8da   : > { %v2218_v54 = vmul.f32 1.442695, %v2210_v24  ;;  %v2211_v31 = vsub.f32 %v4481_v12, %v2191_v40 }
 0x8db   : > { %v2194_v27 = vpop.xlane.xlu0 %2193 }
 0x8dc   : > { %3726 = vpow2.f32 %v2218_v54  ;;  %v2220_v26 = vmul.f32 1.442695, %v2211_v31  ;;  %v2212_v56 = vsub.f32 %v2079_v1, %v2194_v27 }
 0x8de   : > { %3728 = vpow2.f32 %v2220_v26  ;;  %v2222_v41 = vmul.f32 1.442695, %v2212_v56 }
 0x8df   : > { %v2197_v28 = vpop.xlane.xlu0 %2196 }
 0x8e0   : > { %3730 = vpow2.f32 %v2222_v41  ;;  %v2213_v0 = vsub.f32 %v2082_v58, %v2197_v28 }
 0x8e1   : > { %v2203_v22 = vpop.xlane.xlu1 %2202 }
 0x8e2   : > { %v2224_v51 = vmul.f32 1.442695, %v2213_v0  ;;  %v2215_v60 = vsub.f32 %v4499_v6, %v2203_v22 }
 0x8e3   : > { %v2200_v33 = vpop.xlane.xlu0 %2199 }
 0x8e4   : > { %3732 = vpow2.f32 %v2224_v51  ;;  %v2214_v42 = vsub.f32 %v2129_v38, %v2200_v33  ;;  %v2228_v35 = vmul.f32 1.442695, %v2215_v60 }
 0x8e5   : > { %v2209_v44 = vpop.xlane.xlu1 %2208 }
 0x8e6   : > { %v3727_v36 = vpop.eup %3726  ;;  %v2226_v20 = vmul.f32 1.442695, %v2214_v42  ;;  %v2217_v63 = vsub.f32 %v2182_v15, %v2209_v44 }
 0x8e7   : > { %v2206_v9 = vpop.xlane.xlu0 %2205  ;;  %v2234_v46 = vsel %vm855_vm6, %v3727_v36, 0.0 }
 0x8e8   : > { %v3729_v55 = vpop.eup %3728  ;;  %3734 = vpow2.f32 %v2226_v20  ;;  %v2216_v12 = vsub.f32 %v2179_v7, %v2206_v9  ;;  %2235 = vadd.xlane.f32.xlu0 %v2234_v46  ;;  %v2232_v14 = vmul.f32 1.442695, %v2217_v63 }
 0x8e9   : > { %v2237_v1 = vsel %vm855_vm6, %v3729_v55, 0.0 }
 0x8ea   : > { %v3731_v37 = vpop.eup %3730  ;;  %v2230_v39 = vmul.f32 1.442695, %v2216_v12  ;;  %2238 = vadd.xlane.f32.xlu1 %v2237_v1 }
 0x8eb   : > { %v2240_v58 = vsel %vm855_vm6, %v3731_v37, 0.0 }
 0x8ec   : > { %3736 = vpow2.f32 %v2230_v39  ;;  %2241 = vadd.xlane.f32.xlu0 %v2240_v58 }
 0x8ed   : > { %3738 = vpow2.f32 %v2228_v35 }
 0x8ee   : > { %v3733_v25 = vpop.eup %3732  ;;  %3740 = vpow2.f32 %v2232_v14 }
 0x8ef   : > { %v2243_v38 = vsel %vm855_vm6, %v3733_v25, 0.0 }
 0x8f0   : > { %2244 = vadd.xlane.f32.xlu1 %v2243_v38 }
 0x8f2   : > { %v4520_v34 = vpop.eup %3734 }
 0x8f3   : > { %v2246_v59 = vsel %vm855_vm6, %v4520_v34, 0.0 }
 0x8f4   : > { %2247 = vadd.xlane.f32.xlu0 %v2246_v59 }
 0x8f6   : > { %v4524_v29 = vpop.eup %3736 }
 0x8f7   : > { %v2252_v7 = vsel %vm855_vm6, %v4524_v29, 0.0  ;;  %v3739_v61 = vpop.eup %3738 }
 0x8f8   : > { %2253 = vadd.xlane.f32.xlu0 %v2252_v7  ;;  %v2249_v24 = vsel %vm855_vm6, %v3739_v61, 0.0  ;;  %v3741_v40 = vpop.eup %3740 }
 0x901   : > { %2325 = vrot.lane.b32.xlu1 %v4063_v47, %s3803_s27  ;;  %v2255_v47 = vsel %vm855_vm6, %v3741_v40, 0.0 }
 0x905   : > { %2372 = vrot.lane.b32.xlu1 %v4157_v10, %s3803_s27 }
 0x90e   : > { %2278 = vrot.lane.b32.xlu0 %v4065_v49, %s3803_s27 }
 0x929   : > { %2250 = vadd.xlane.f32.xlu1 %v2249_v24 }
 0x92d   : > { %2256 = vadd.xlane.f32.xlu1 %v2255_v47 }
 0x93e   : > { %2419 = vrot.lane.b32.xlu1 %v4110_v30, %s3803_s27 }
 0x975   : > { %v2236_v49 = vpop.xlane.xlu0 %2235 }
 0x977   : > { %v2239_v10 = vpop.xlane.xlu1 %2238 }
 0x978   : > { %3742 = vrcp.f32 %v2239_v10 }
 0x979   : > { %v2242_v6 = vpop.xlane.xlu0 %2241  ;;  %3744 = vrcp.f32 %v2236_v49 }
 0x97a   : > { %3746 = vrcp.f32 %v2242_v6 }
 0x97d   : > { %v2245_v15 = vpop.xlane.xlu1 %2244 }
 0x97e   : > { %3748 = vrcp.f32 %v2245_v15 }
 0x981   : > { %v2248_v54 = vpop.xlane.xlu0 %2247  ;;  %v4539_v31 = vpop.permute.xlu1 %2325 }
 0x982   : > { %3539 = vmatpush3.bf16.msra.mxu1 %v4539_v31  ;;  %v3743_v27 = vpop.eup %3742  ;;  %3750 = vrcp.f32 %v2248_v54 }
 0x983   : > { %3550 = vmatprep.subr.bf16.mxu1 %v4753_v45  ;;  %v3745_v26 = vpop.eup %3744  ;;  %v2267_v30 = vmul.f32 %v3743_v27, %v3729_v55 }
 0x984   : > { %v3747_v41 = vpop.eup %3746  ;;  %v2266_v0 = vmul.f32 %v3745_v26, %v3727_v36 }
 0x985   : > { %v2254_v56 = vpop.xlane.xlu0 %2253  ;;  %v2268_v51 = vmul.f32 %v3747_v41, %v3731_v37  ;;  %v4544_v46 = vpop.permute.xlu1 %2372 }
 0x986   : > { %v2274_v20 = vpack.c.bf16 %v2267_v30, %v2266_v0 }
 0x988   : > { %v3749_v28 = vpop.eup %3748 }
 0x989   : > { %v2269_v33 = vmul.f32 %v3749_v28, %v3733_v25  ;;  %v2279_v42 = vpop.permute.xlu0 %2278 }
 0x98a   : > { %3533 = vmatpush3.bf16.msra.mxu0 %v2279_v42 }
 0x98b   : > { %v2275_v9 = vpack.c.bf16 %v2269_v33, %v2268_v51  ;;  %3544 = vmatprep.subr.bf16.mxu0 %v4753_v45 }
 0x98c   : > { %v3751_v1 = vpop.eup %3750 }
 0x98d   : > { %3535 = vmatmul.mubr.msk.bf16.vlgmr.msra.gmra.mrb[40].mxu0 %vm855_vm6, %v2274_v20  ;;  %3541 = vmatmul.mubr.msk.bf16.vlgmr.msra.gmra.mrb[56].mxu1 %vm855_vm6, %v2275_v9  ;;  %v2270_v39 = vmul.f32 %v3751_v1, %v4520_v34 }
 0x98e   : > { %3545 = vmatpush3.bf16.msra.mxu0 %v4544_v46  ;;  %3546 = vmatprep.mubr.msk.bf16.mxu0 %vm3802_vm5, %v4753_v45 }
 0x98f   : > { %3556 = vmatprep.subr.bf16.mxu0 %v4753_v45  ;;  %3552 = vmatprep.mubr.msk.bf16.mxu1 %vm3802_vm5, %v4753_v45 }
 0x9b6   : > { %v2251_v36 = vpop.xlane.xlu1 %2250 }
 0x9b7   : > { %3752 = vrcp.f32 %v2251_v36 }
 0x9b8   : > { %3754 = vrcp.f32 %v2254_v56 }
 0x9ba   : > { %v2257_v55 = vpop.xlane.xlu1 %2256 }
 0x9bb   : > { %3756 = vrcp.f32 %v2257_v55 }
 0x9be   : > { %v4554_v12 = vpop.permute.xlu1 %2419 }
 0x9bf   : > { %3551 = vmatpush3.bf16.msra.mxu1 %v4554_v12 }
 0x9c0   : > { %3562 = vmatprep.subr.bf16.mxu1 %v4753_v45 }
 0x9c1   : > { %v3753_v37 = vpop.eup %3752 }
 0x9c2   : > { %v2271_v58 = vmul.f32 %v3753_v37, %v3739_v61  ;;  %v3755_v25 = vpop.eup %3754 }
 0x9c3   : > { %v2272_v7 = vmul.f32 %v3755_v25, %v4524_v29 }
 0x9c4   : > { %v2276_v38 = vpack.c.bf16 %v2271_v58, %v2270_v39 }
 0x9c5   : > { %v3757_v59 = vpop.eup %3756 }
 0x9c6   : > { %v2273_v22 = vmul.f32 %v3757_v59, %v3741_v40  ;;  %3547 = vmatmul.mubr.msk.bf16.vlgmr.msra.gmra.mrb[44].mxu0 %vm855_vm6, %v2276_v38 }
 0x9c7   : > { %3557 = vmatpush3.bf16.xpose.msra.mxu0 %v4384_v13  ;;  %3558 = vmatprep.mubr.msk.bf16.mxu0 %vm3802_vm5, %v4753_v45 }
 0x9c8   : > { %v2277_v60 = vpack.c.bf16 %v2273_v22, %v2272_v7  ;;  %3568 = vmatprep.subr.bf16.mxu0 %v4753_v45 }
 0x9ca   : > { %3553 = vmatmul.mubr.msk.bf16.vlgmr.msra.gmra.mrb[60].mxu1 %vm855_vm6, %v2277_v60 }
 0x9cb   : > { %3563 = vmatpush3.bf16.xpose.msra.mxu1 %v4392_v43  ;;  %3564 = vmatprep.mubr.msk.bf16.mxu1 %vm3802_vm5, %v4753_v45 }
 0x9cc   : > { %3574 = vmatprep.subr.bf16.mxu1 %v4753_v45 }
 0x9ce   : > { %3559 = vmatmul.mubr.msk.bf16.vlgmr.msra.gmra.mrb[48].mxu0 %vm855_vm6, %v4091_v32 }
 0x9cf   : > { %3569 = vmatpush3.bf16.xpose.msra.mxu0 %v4400_v19  ;;  %3570 = vmatprep.mubr.msk.bf16.mxu0 %vm3802_vm5, %v4753_v45 }
 0x9d0   : > { %3580 = vmatprep.subr.bf16.mxu0 %v4753_v45 }
 0x9d2   : > { %3565 = vmatmul.mubr.msk.bf16.vlgmr.msra.gmra.mrb[64].mxu1 %vm855_vm6, %v4081_v57 }
 0x9d3   : > { %3575 = vmatpush3.bf16.xpose.msra.mxu1 %v4411_v21  ;;  %3576 = vmatprep.mubr.msk.bf16.mxu1 %vm3802_vm5, %v4753_v45 }
 0x9d4   : > { %3586 = vmatprep.subr.bf16.mxu1 %v4753_v45 }
 0x9d6   : > { %3571 = vmatmul.mubr.msk.bf16.vlgmr.msra.gmra.mrb[52].mxu0 %vm855_vm6, %v4182_v53 }
 0x9d7   : > { %3581 = vmatpush3.bf16.msra.mxu0 %v2279_v42  ;;  %3582 = vmatprep.mubr.msk.bf16.mxu0 %vm3802_vm5, %v4753_v45 }
 0x9d8   : > { %3592 = vmatprep.subr.bf16.mxu0 %v4753_v45 }
 0x9da   : > { %3577 = vmatmul.mubr.msk.bf16.vlgmr.msra.gmra.mrb[68].mxu1 %vm855_vm6, %v4138_v50 }
 0x9db   : > { %3587 = vmatpush3.bf16.msra.mxu1 %v4539_v31  ;;  %3588 = vmatprep.mubr.msk.bf16.mxu1 %vm3802_vm5, %v4753_v45 }
 0x9dc   : > { %3598 = vmatprep.subr.bf16.mxu1 %v4753_v45 }
 0xa60   : > { %v4593_v57 = vpop.f32.mrb[40].mxu0  ;;  %v4595_v32 = vpop.f32.mrb[56].mxu1 }
 0xa61   : > { %v3536_v53 = vpop.f32.mrb[41].mxu0  ;;  %v3542_v13 = vpop.f32.mrb[57].mxu1 }
 0xa62   : > { %v4597_v43 = vpop.f32.mrb[42].mxu0  ;;  %v4599_v19 = vpop.f32.mrb[58].mxu1 }
 0xa63   : > { %v3537_v21 = vpop.f32.mrb[43].mxu0  ;;  %v3543_v34 = vpop.f32.mrb[59].mxu1 }
 0xa99   : > { %v4601_v50 = vpop.f32.mrb[44].mxu0 }
 0xa9a   : > { %v3548_v29 = vpop.f32.mrb[45].mxu0 }
 0xa9b   : > { %v4603_v44 = vpop.f32.mrb[46].mxu0 }
 0xa9c   : > { %v3549_v35 = vpop.f32.mrb[47].mxu0 }
 0xa9d   : > { %v4605_v63 = vpop.f32.mrb[60].mxu1 }
 0xa9e   : > { %v3554_v14 = vpop.f32.mrb[61].mxu1 }
 0xa9f   : > { %v4607_v61 = vpop.f32.mrb[62].mxu1 }
 0xaa0   : > { %v3555_v24 = vpop.f32.mrb[63].mxu1 }
 0xaa1   : > { %v2531_v40 = vpop.f32.mrb[48].mxu0 }
 0xaa2   : > { %v3560_v47 = vpop.f32.mrb[49].mxu0  ;;  %v2670_v49 = vsel %vm855_vm6, %v2531_v40, -inf }
 0xaa3   : > { %2671 = vmax.xlane.f32.xlu0 %v2670_v49  ;;  %v2534_v10 = vpop.f32.mrb[50].mxu0 }
 0xaa4   : > { %v3561_v6 = vpop.f32.mrb[51].mxu0  ;;  %v2673_v15 = vsel %vm855_vm6, %v2534_v10, -inf }
 0xaa5   : > { %v2575_v54 = vpop.f32.mrb[64].mxu1  ;;  %2674 = vmax.xlane.f32.xlu1 %v2673_v15 }
 0xaa6   : > { %v3566_v31 = vpop.f32.mrb[65].mxu1  ;;  %v2676_v27 = vsel %vm855_vm6, %v2575_v54, -inf }
 0xaa7   : > { %v2578_v26 = vpop.f32.mrb[66].mxu1  ;;  %2677 = vmax.xlane.f32.xlu0 %v2676_v27 }
 0xaa8   : > { %v3567_v56 = vpop.f32.mrb[67].mxu1  ;;  %v2679_v28 = vsel %vm855_vm6, %v2578_v26, -inf }
 0xaa9   : > { %v2619_v41 = vpop.f32.mrb[52].mxu0 }
 0xaaa   : > { %v3572_v30 = vpop.f32.mrb[53].mxu0  ;;  %v2682_v9 = vsel %vm855_vm6, %v2619_v41, -inf }
 0xaab   : > { %2680 = vmax.xlane.f32.xlu0 %v2679_v28  ;;  %v2622_v0 = vpop.f32.mrb[54].mxu0 }
 0xaac   : > { %v3573_v51 = vpop.f32.mrb[55].mxu0  ;;  %v2685_v33 = vsel %vm855_vm6, %v2622_v0, -inf }
 0xaad   : > { %v2663_v42 = vpop.f32.mrb[68].mxu1  ;;  %2686 = vmax.xlane.f32.xlu1 %v2685_v33 }
 0xaae   : > { %v3578_v20 = vpop.f32.mrb[69].mxu1  ;;  %v2688_v37 = vsel %vm855_vm6, %v2663_v42, -inf }
 0xaaf   : > { %v2666_v36 = vpop.f32.mrb[70].mxu1  ;;  %2683 = vmax.xlane.f32.xlu0 %v2682_v9 }
 0xab0   : > { %v3579_v55 = vpop.f32.mrb[71].mxu1  ;;  %v2691_v1 = vsel %vm855_vm6, %v2666_v36, -inf }
 0xab1   : > { %2692 = vmax.xlane.f32.xlu1 %v2691_v1 }
 0xab3   : > { %2689 = vmax.xlane.f32.xlu0 %v2688_v37 }
 0xb30   : > { %v2672_v39 = vpop.xlane.xlu0 %2671 }
 0xb31   : > { %v2694_v58 = vsub.f32 %v2531_v40, %v2672_v39 }
 0xb32   : > { %v2675_v25 = vpop.xlane.xlu1 %2674 }
 0xb33   : > { %v2702_v38 = vmul.f32 1.442695, %v2694_v58  ;;  %v2695_v59 = vsub.f32 %v2534_v10, %v2675_v25 }
 0xb34   : > { %v2678_v7 = vpop.xlane.xlu0 %2677 }
 0xb35   : > { %3758 = vpow2.f32 %v2702_v38  ;;  %v2704_v22 = vmul.f32 1.442695, %v2695_v59  ;;  %v2696_v60 = vsub.f32 %v2575_v54, %v2678_v7 }
 0xb37   : > { %3760 = vpow2.f32 %v2704_v22  ;;  %v2706_v53 = vmul.f32 1.442695, %v2696_v60 }
 0xb38   : > { %v2681_v13 = vpop.xlane.xlu0 %2680 }
 0xb39   : > { %3762 = vpow2.f32 %v2706_v53  ;;  %v2697_v21 = vsub.f32 %v2578_v26, %v2681_v13 }
 0xb3a   : > { %v2687_v34 = vpop.xlane.xlu1 %2686 }
 0xb3b   : > { %v2708_v29 = vmul.f32 1.442695, %v2697_v21  ;;  %v2699_v35 = vsub.f32 %v2622_v0, %v2687_v34 }
 0xb3c   : > { %v2684_v14 = vpop.xlane.xlu0 %2683 }
 0xb3d   : > { %3764 = vpow2.f32 %v2708_v29  ;;  %v2712_v24 = vmul.f32 1.442695, %v2699_v35  ;;  %v2698_v47 = vsub.f32 %v2619_v41, %v2684_v14 }
 0xb3e   : > { %v2693_v40 = vpop.xlane.xlu1 %2692 }
 0xb3f   : > { %v3759_v49 = vpop.eup %3758  ;;  %3766 = vpow2.f32 %v2712_v24  ;;  %v2710_v10 = vmul.f32 1.442695, %v2698_v47  ;;  %v2701_v6 = vsub.f32 %v2666_v36, %v2693_v40 }
 0xb40   : > { %v2690_v15 = vpop.xlane.xlu0 %2689  ;;  %v2718_v54 = vsel %vm855_vm6, %v3759_v49, 0.0 }
 0xb41   : > { %v3761_v31 = vpop.eup %3760  ;;  %3768 = vpow2.f32 %v2710_v10  ;;  %v2716_v27 = vmul.f32 1.442695, %v2701_v6  ;;  %v2700_v56 = vsub.f32 %v2663_v42, %v2690_v15  ;;  %2719 = vadd.xlane.f32.xlu0 %v2718_v54 }
 0xb42   : > { %v2721_v26 = vsel %vm855_vm6, %v3761_v31, 0.0 }
 0xb43   : > { %v3763_v30 = vpop.eup %3762  ;;  %3770 = vpow2.f32 %v2716_v27  ;;  %v2714_v28 = vmul.f32 1.442695, %v2700_v56  ;;  %2722 = vadd.xlane.f32.xlu1 %v2721_v26 }
 0xb44   : > { %v2724_v41 = vsel %vm855_vm6, %v3763_v30, 0.0 }
 0xb45   : > { %3772 = vpow2.f32 %v2714_v28  ;;  %2725 = vadd.xlane.f32.xlu0 %v2724_v41  ;;  %v2959_v41 = vld [vmem:[%s4743_s7 + $0x8] sm:$0xff] }
 0xb47   : > { %v3765_v0 = vpop.eup %3764 }
 0xb48   : > { %v2727_v51 = vsel %vm855_vm6, %v3765_v0, 0.0 }
 0xb49   : > { %v3767_v33 = vpop.eup %3766  ;;  %2728 = vadd.xlane.f32.xlu1 %v2727_v51 }
 0xb4a   : > { %v2733_v42 = vsel %vm855_vm6, %v3767_v33, 0.0 }
 0xb4b   : > { %v3769_v20 = vpop.eup %3768 }
 0xb4c   : > { %v2730_v9 = vsel %vm855_vm6, %v3769_v20, 0.0 }
 0xb4d   : > { %v3771_v36 = vpop.eup %3770  ;;  %2731 = vadd.xlane.f32.xlu0 %v2730_v9  ;;  %2734 = vadd.xlane.f32.xlu1 %v2733_v42 }
 0xb4e   : > { %v2739_v37 = vsel %vm855_vm6, %v3771_v36, 0.0 }
 0xb4f   : > { %v3773_v55 = vpop.eup %3772 }
 0xb50   : > { %v2736_v1 = vsel %vm855_vm6, %v3773_v55, 0.0 }
 0xb51   : > { %2737 = vadd.xlane.f32.xlu0 %v2736_v1  ;;  %2740 = vadd.xlane.f32.xlu1 %v2739_v37 }
 0xbce   : > { %v2720_v39 = vpop.xlane.xlu0 %2719 }
 0xbcf   : > { %3774 = vrcp.f32 %v2720_v39 }
 0xbd0   : > { %v2723_v58 = vpop.xlane.xlu1 %2722 }
 0xbd1   : > { %3776 = vrcp.f32 %v2723_v58 }
 0xbd2   : > { %v2726_v25 = vpop.xlane.xlu0 %2725 }
 0xbd3   : > { %3778 = vrcp.f32 %v2726_v25 }
 0xbd6   : > { %v2729_v38 = vpop.xlane.xlu1 %2728 }
 0xbd7   : > { %3780 = vrcp.f32 %v2729_v38 }
 0xbd9   : > { %v3775_v59 = vpop.eup %3774 }
 0xbda   : > { %v2732_v7 = vpop.xlane.xlu0 %2731  ;;  %v2735_v22 = vpop.xlane.xlu1 %2734  ;;  %v2750_v53 = vmul.f32 %v3775_v59, %v3759_v49 }
 0xbdb   : > { %v3777_v60 = vpop.eup %3776  ;;  %3782 = vrcp.f32 %v2732_v7 }
 0xbdc   : > { %v2751_v13 = vmul.f32 %v3777_v60, %v3761_v31  ;;  %3784 = vrcp.f32 %v2735_v22 }
 0xbdd   : > { %v3779_v35 = vpop.eup %3778 }
 0xbde   : > { %v2738_v21 = vpop.xlane.xlu0 %2737  ;;  %v2741_v34 = vpop.xlane.xlu1 %2740  ;;  %v2758_v29 = vpack.c.bf16 %v2751_v13, %v2750_v53  ;;  %v2752_v24 = vmul.f32 %v3779_v35, %v3763_v30  ;;  %v2965_v30 = vld [vmem:[%s4744_s8] sm:$0xff] }
 0xbdf   : > { %3786 = vrcp.f32 %v2738_v21 }
 0xbe0   : > { %3788 = vrcp.f32 %v2741_v34  ;;  %3583 = vmatmul.mubr.msk.bf16.vlgmr.msra.gmra.mrb[56].mxu0 %vm855_vm6, %v2758_v29 }
 0xbe1   : > { %v3781_v14 = vpop.eup %3780  ;;  %3593 = vmatpush3.bf16.msra.mxu0 %v4544_v46  ;;  %3594 = vmatprep.mubr.msk.bf16.mxu0 %vm3802_vm5, %v4753_v45 }
 0xbe2   : > { %v2753_v47 = vmul.f32 %v3781_v14, %v3765_v0 }
 0xbe4   : > { %v2759_v40 = vpack.c.bf16 %v2753_v47, %v2752_v24 }
 0xbe5   : > { %v3783_v49 = vpop.eup %3782 }
 0xbe6   : > { %v3785_v10 = vpop.eup %3784  ;;  %v2754_v6 = vmul.f32 %v3783_v49, %v3769_v20  ;;  %3589 = vmatmul.mubr.msk.bf16.vlgmr.msra.gmra.mrb[72].mxu1 %vm855_vm6, %v2759_v40 }
 0xbe7   : > { %v2755_v15 = vmul.f32 %v3785_v10, %v3767_v33  ;;  %3599 = vmatpush3.bf16.msra.mxu1 %v4554_v12  ;;  %3600 = vmatprep.mubr.msk.bf16.mxu1 %vm3802_vm5, %v4753_v45  ;;  %v2966_v12 = vld [vmem:[%s4744_s8 + $0x8] sm:$0xff]  ;;  %v2958_v45 = vld [vmem:[%s4743_s7] sm:$0xff]  ;;  %v2466_v33 = vsel %vm836_vm1, %v4593_v57, 0.0  ;;  %v2468_v57 = vsel %vm836_vm1, %v4595_v32, 0.0  ;;  %v2470_v32 = vsel %vm836_vm1, %v4601_v50, 0.0 }
 0xbe8   : > { %v2967_v28 = vpack.c.bf16 %v2966_v12, %v2965_v30  ;;  %v2960_v0 = vpack.c.bf16 %v2959_v41, %v2958_v45  ;;  %v2472_v50 = vsel %vm836_vm1, %v4605_v63, 0.0 }
 0xbe9   : > { %v3787_v54 = vpop.eup %3786  ;;  %v2760_v31 = vpack.c.bf16 %v2755_v15, %v2754_v6 }
 0xbea   : > { %v3789_v46 = vpop.eup %3788  ;;  %v2756_v27 = vmul.f32 %v3787_v54, %v3773_v55  ;;  %3604 = vmatprep.subr.bf16.mxu0 %v2967_v28  ;;  %v2467_v55 = vsel %vm836_vm1, %v4597_v43, 0.0  ;;  %v2469_v43 = vsel %vm836_vm1, %v4599_v19, 0.0  ;;  %v2471_v19 = vsel %vm836_vm1, %v4603_v44, 0.0 }
 0xbeb   : > { %v2757_v56 = vmul.f32 %v3789_v46, %v3771_v36  ;;  %3595 = vmatmul.mubr.msk.bf16.vlgmr.msra.gmra.mrb[60].mxu0 %vm855_vm6, %v2760_v31  ;;  %v2473_v46 = vsel %vm836_vm1, %v4607_v61, 0.0 }
 0xbec   : > { %3605 = vmatpush3.bf16.msra.mxu0 %v2967_v28 }
 0xbed   : > { %v2761_v26 = vpack.c.bf16 %v2757_v56, %v2756_v27  ;;  %3614 = vmatprep.subr.bf16.mxu0 %v2960_v0 }
 0xbef   : > { %3601 = vmatmul.mubr.msk.bf16.vlgmr.msra.gmra.mrb[76].mxu1 %vm855_vm6, %v2761_v26 }
 0xcb3   : > { %v2799_v51 = vpop.f32.mrb[56].mxu0 }
 0xcb4   : > { %v2938_v20 = vsel %vm4040_vm4, %v2799_v51, 0.0  ;;  %v3584_v9 = vpop.f32.mrb[57].mxu0 }
 0xcb5   : > { %v2946_v42 = vadd.f32 %v2938_v20, %v2466_v33  ;;  %v2802_v36 = vpop.f32.mrb[58].mxu0 }
 0xcb6   : > { %v2939_v1 = vsel %vm4040_vm4, %v2802_v36, 0.0  ;;  %v3585_v37 = vpop.f32.mrb[59].mxu0 }
 0xcb7   : > { %v2947_v39 = vadd.f32 %v2939_v1, %v2467_v55 }
 0xcb9   : > { %v2961_v58 = vpack.c.bf16 %v2947_v39, %v2946_v42  ;;  %v2843_v25 = vpop.f32.mrb[72].mxu1 }
 0xcba   : > { %v2940_v38 = vsel %vm4040_vm4, %v2843_v25, 0.0  ;;  %v3590_v59 = vpop.f32.mrb[73].mxu1 }
 0xcbb   : > { %v2948_v7 = vadd.f32 %v2940_v38, %v2468_v57  ;;  %v2846_v22 = vpop.f32.mrb[74].mxu1  ;;  %3606 = vmatprep.mubr.msk.bf16.mxu0 %vm855_vm6, %v2961_v58  ;;  %v4758_v38 = vld [vmem:[#allocation2_spill] sm:$0xff] }
 0xcbc   : > { %v2941_v60 = vsel %vm4040_vm4, %v2846_v22, 0.0  ;;  %v3591_v53 = vpop.f32.mrb[75].mxu1 }
 0xcbd   : > { %v2949_v13 = vadd.f32 %v2941_v60, %v2469_v43 }
 0xcbe   : > { %v2887_v21 = vpop.f32.mrb[60].mxu0 }
 0xcbf   : > { %v2962_v34 = vpack.c.bf16 %v2949_v13, %v2948_v7  ;;  %v2942_v29 = vsel %vm4040_vm4, %v2887_v21, 0.0  ;;  %v3596_v35 = vpop.f32.mrb[61].mxu0 }
 0xcc0   : > { %v2950_v14 = vadd.f32 %v2942_v29, %v2470_v32  ;;  %v2890_v24 = vpop.f32.mrb[62].mxu0 }
 0xcc1   : > { %v2943_v47 = vsel %vm4040_vm4, %v2890_v24, 0.0  ;;  %v3597_v40 = vpop.f32.mrb[63].mxu0  ;;  %3607 = vmatmul.mubr.msk.bf16.vlgmr.msra.gmra.mrb[64].mxu0 %vm855_vm6, %v2962_v34 }
 0xcc2   : > { %v2951_v49 = vadd.f32 %v2943_v47, %v2471_v19  ;;  %v2931_v10 = vpop.f32.mrb[76].mxu1  ;;  %3615 = vmatpush3.bf16.msra.mxu0 %v2960_v0 }
 0xcc3   : > { %v2944_v6 = vsel %vm4040_vm4, %v2931_v10, 0.0  ;;  %v3602_v15 = vpop.f32.mrb[77].mxu1 }
 0xcc4   : > { %v2963_v54 = vpack.c.bf16 %v2951_v49, %v2950_v14  ;;  %v2952_v31 = vadd.f32 %v2944_v6, %v2472_v50  ;;  %v2934_v44 = vpop.f32.mrb[78].mxu1 }
 0xcc5   : > { %v2945_v27 = vsel %vm4040_vm4, %v2934_v44, 0.0  ;;  %v3603_v56 = vpop.f32.mrb[79].mxu1 }
 0xcc6   : > { %v2953_v26 = vadd.f32 %v2945_v27, %v2473_v46  ;;  %3610 = vmatprep.mubr.msk.bf16.mxu0 %vm855_vm6, %v2963_v54 }
 0xcc8   : > { %v2964_v63 = vpack.c.bf16 %v2953_v26, %v2952_v31 }
 0xcca   : > { %3611 = vmatmul.mubr.msk.bf16.gmra.mrb[68].mxu0 %vm855_vm6, %v2964_v63 }
 0xccb   : > { %3616 = vmatprep.mubr.msk.bf16.mxu0 %vm855_vm6, %v4505_v8 }
 0xcd2   : > { %3617 = vmatmul.mubr.msk.bf16.vlgmr.msra.gmra.mrb[64].mxu0 %vm855_vm6, %v4503_v18 }
 0xcd3   : > { %3620 = vmatprep.mubr.msk.bf16.mxu0 %vm855_vm6, %v4508_v48 }
 0xcda   : > { %3621 = vmatmul.mubr.msk.bf16.gmra.mrb[68].mxu0 %vm855_vm6, %v4510_v52 }
 0xda5   : > { %v3618_v23 = vpop.f32.mrb[64].mxu0 }
 0xda6   : > { %v3131_v61 = vadd.f32 %v3618_v23, %v3278_v62  ;;  %v3091_v30 = vpop.f32.mrb[65].mxu0 }
 0xda7   : > { %v3129_v12 = vadd.f32 %v3278_v62, %v3091_v30  ;;  %v3619_v28 = vpop.f32.mrb[66].mxu0 }
 0xda8   : > { %v3139_v8 = vadd.f32 %v3877_v3, %v3131_v61  ;;  %v3132_v45 = vadd.f32 %v3619_v28, %v3278_v62  ;;  %v3094_v41 = vpop.f32.mrb[67].mxu0 }
 0xda9   : > { %v3137_v18 = vadd.f32 %v3875_v2, %v3129_v12  ;;  %v3130_v48 = vadd.f32 %v3278_v62, %v3094_v41 }
 0xdaa   : > { %v3147_v52 = vpack.c.bf16 %v3139_v8, %v3139_v8  ;;  %v3140_v0 = vadd.f32 %v3881_v5, %v3132_v45 }
 0xdab   : > { %v3145_v3 = vpack.c.bf16 %v3137_v18, %v3137_v18  ;;  %v3138_v51 = vadd.f32 %v3879_v4, %v3130_v48 }
 0xdac   : > { %3156 = vst.msk [vmem:[%s4708_s23 + $0x8] sm:$0xf] %vm3153_vm7, %v3147_v52  ;;  %v3148_v33 = vpack.c.bf16 %v3140_v0, %v3140_v0 }
 0xdad   : > { %3154 = vst.msk [vmem:[%s4708_s23] sm:$0xf] %vm3153_vm7, %v3145_v3  ;;  %v3146_v20 = vpack.c.bf16 %v3138_v51, %v3138_v51  ;;  %v3622_v9 = vpop.f32.mrb[68].mxu0 }
 0xdae   : > { %3157 = vst.msk [vmem:[%s4708_s23 + $0xc] sm:$0xf] %vm3153_vm7, %v3148_v33  ;;  %v3135_v42 = vadd.f32 %v3622_v9, %v3278_v62  ;;  %v3107_v2 = vpop.f32.mrb[69].mxu0 }
 0xdaf   : > { %3155 = vst.msk [vmem:[%s4708_s23 + $0x4] sm:$0xf] %vm3153_vm7, %v3146_v20  ;;  %v3133_v5 = vadd.f32 %v3278_v62, %v3107_v2  ;;  %v3623_v36 = vpop.f32.mrb[70].mxu0 }
 0xdb0   : > { %v3143_v4 = vadd.f32 %v3899_v16, %v3135_v42  ;;  %v3136_v55 = vadd.f32 %v3623_v36, %v3278_v62  ;;  %v3110_v1 = vpop.f32.mrb[71].mxu0 }
 0xdb1   : > { %v3141_v37 = vadd.f32 %v3891_v11, %v3133_v5  ;;  %v3134_v39 = vadd.f32 %v3278_v62, %v3110_v1 }
 0xdb2   : > { %v3151_v58 = vpack.c.bf16 %v3143_v4, %v3143_v4  ;;  %v3144_v25 = vadd.f32 %v3901_v17, %v3136_v55 }
 0xdb3   : > { %v3149_v57 = vpack.c.bf16 %v3141_v37, %v3141_v37  ;;  %v3142_v59 = vadd.f32 %v4758_v38, %v3134_v39 }
 0xdb4   : > { %3160 = vst.msk [vmem:[%s4708_s23 + $0x18] sm:$0xf] %vm3153_vm7, %v3151_v58  ;;  %v3152_v7 = vpack.c.bf16 %v3144_v25, %v3144_v25 }
 0xdb5   : > { %3158 = vst.msk [vmem:[%s4708_s23 + $0x10] sm:$0xf] %vm3153_vm7, %v3149_v57  ;;  %v3150_v22 = vpack.c.bf16 %v3142_v59, %v3142_v59 }
 0xdb6   : > { %3161 = vst.msk [vmem:[%s4708_s23 + $0x1c] sm:$0xf] %vm3153_vm7, %v3152_v7 }
 0xdb7   : > { %3159 = vst.msk [vmem:[%s4708_s23 + $0x14] sm:$0xf] %vm3153_vm7, %v3150_v22 }
 0xdb8 PF: > { %s20_s13 = sadd.s32 1, %s3796_s13  }
 0xdb9   : > { %p17_p4 = scmp.ge.s32.totalorder %s20_s13, 4  }
 0xdbb   :  { %19 = sbr.rel (!%p17_p4) target bundleno = 1 (0x1), region = 90 }

// kernel: cswinir_forward.14
= control target key start
LH: loop header
LB: loop body
LE: loop exit
PB: predicated region body
PF: predicated region fallthrough
CT: control target
= control target key end

     0   :  { %vm93_vm0 = vcmask 523264   ;;  %vm327_vm1 = vcmask 257024   ;;  %s678_s1 = inlined_call_operand.vmem [shape: f32[64,32], index: 1, kind: input, shape index: {}]   ;;  %s679_s0 = inlined_call_operand.vmem [shape: bf16[128,64], index: 0, kind: input, shape index: {}]   ;;  %s680_s3 = inlined_call_operand.vmem [shape: bf16[128,32], index: 3, kind: input, shape index: {}]   ;;  %s681_s2 = inlined_call_operand.vmem [shape: f32[1,32], index: 2, kind: input, shape index: {}]   ;;  %s682_s4 = inlined_call_operand.vmem [shape: bf16[128,32], index: 4, kind: output, shape index: {}]  }
   0x1   :  { %v34_v0 = vld [vmem:[%s678_s1] sm:$0xff]  ;;  %v35_v1 = vld [vmem:[%s678_s1 + $0x8] sm:$0xff]  ;;  %v36_v2 = vld [vmem:[%s678_s1 + $0x10] sm:$0xff] }
   0x2   :  { %v42_v3 = vpack.c.bf16 %v35_v1, %v34_v0  ;;  %v37_v4 = vld [vmem:[%s678_s1 + $0x18] sm:$0xff]  ;;  %v38_v6 = vld [vmem:[%s678_s1 + $0x20] sm:$0xff]  ;;  %v39_v7 = vld [vmem:[%s678_s1 + $0x28] sm:$0xff] }
   0x3   :  { %v43_v5 = vpack.c.bf16 %v37_v4, %v36_v2  ;;  %v480_v8 = vld [vmem:[%s679_s0] sm:$0xff]   ;;  %v44_v10 = vpack.c.bf16 %v39_v7, %v38_v6  ;;  %v40_v11 = vld [vmem:[%s678_s1 + $0x30] sm:$0xff]  ;;  %v41_v12 = vld [vmem:[%s678_s1 + $0x38] sm:$0xff] }
   0x4   :  { %448 = vmatprep.subr.bf16.mxu0 %v42_v3  ;;  %472 = vmatprep.subr.bf16.mxu1 %v42_v3  ;;  %v481_v9 = vld [vmem:[%s679_s0 + $0x20] sm:$0xff]   ;;  %v45_v13 = vpack.c.bf16 %v41_v12, %v40_v11  ;;  %v482_v14 = vld [vmem:[%s679_s0 + $0x8] sm:$0xff]   ;;  %v484_v16 = vld [vmem:[%s679_s0 + $0x10] sm:$0xff]  }
   0x5   :  { %449 = vmatpush3.bf16.msra.mxu0 %v42_v3  ;;  %476 = vmatpush3.bf16.msra.mxu1 %v42_v3  ;;  %v483_v15 = vld [vmem:[%s679_s0 + $0x28] sm:$0xff]   ;;  %v485_v17 = vld [vmem:[%s679_s0 + $0x30] sm:$0xff]   ;;  %v486_v18 = vld [vmem:[%s679_s0 + $0x18] sm:$0xff]  }
   0x6   :  { %450 = vmatprep.subr.bf16.mxu0 %v43_v5  ;;  %473 = vmatprep.subr.bf16.mxu1 %v43_v5  ;;  %v487_v19 = vld [vmem:[%s679_s0 + $0x38] sm:$0xff]   ;;  %v429_v20 = vld [vmem:[%s680_s3 + $0x8] sm:$0xff]   ;;  %v398_v22 = vld [vmem:[%s680_s3] sm:$0xff]  }
   0x7   :  { %456 = vmatprep.mubr.msk.bf16.mxu0 %vm93_vm0, %v480_v8  ;;  %464 = vmatprep.mubr.msk.bf16.mxu1 %vm93_vm0, %v481_v9  ;;  %v433_v21 = vld [vmem:[%s680_s3 + $0x28] sm:$0xff]   ;;  %v432_v23 = vld [vmem:[%s680_s3 + $0x20] sm:$0xff]   ;;  %v403_v25 = vunpack.c.l.bf16 %v429_v20  ;;  %v399_v29 = vunpack.c.l.bf16 %v398_v22  ;;  %v404_v31 = vunpack.c.h.bf16 %v429_v20  ;;  %v400_v37 = vunpack.c.h.bf16 %v398_v22  ;;  %v431_v53 = vld [vmem:[%s680_s3 + $0x18] sm:$0xff]  }
   0x8   :  { %v584_v24 = vld [vmem:[%s681_s2] ss:$0 sm:$0xff]  ;;  %v419_v26 = vunpack.c.l.bf16 %v433_v21  ;;  %v415_v30 = vunpack.c.l.bf16 %v432_v23  ;;  %v420_v36 = vunpack.c.h.bf16 %v433_v21  ;;  %v416_v42 = vunpack.c.h.bf16 %v432_v23  ;;  %v435_v54 = vld [vmem:[%s680_s3 + $0x38] sm:$0xff]   ;;  %v430_v59 = vld [vmem:[%s680_s3 + $0x10] sm:$0xff]  }
   0x9   :  { %451 = vmatpush3.bf16.msra.mxu0 %v43_v5  ;;  %477 = vmatpush3.bf16.msra.mxu1 %v43_v5  ;;  %v434_v60 = vld [vmem:[%s680_s3 + $0x30] sm:$0xff]   ;;  %v411_v3 = vunpack.c.l.bf16 %v431_v53  ;;  %v427_v4 = vunpack.c.l.bf16 %v435_v54  ;;  %v407_v9 = vunpack.c.l.bf16 %v430_v59  ;;  %v408_v21 = vunpack.c.h.bf16 %v430_v59 }
   0xa   :  { %452 = vmatprep.subr.bf16.mxu0 %v44_v10  ;;  %474 = vmatprep.subr.bf16.mxu1 %v44_v10  ;;  %v424_v22 = vunpack.c.h.bf16 %v434_v60 }
   0xd   :  { %453 = vmatpush3.bf16.msra.mxu0 %v44_v10  ;;  %478 = vmatpush3.bf16.msra.mxu1 %v44_v10  ;;  %v423_v10 = vunpack.c.l.bf16 %v434_v60 }
   0xe   :  { %454 = vmatprep.subr.bf16.mxu0 %v45_v13  ;;  %475 = vmatprep.subr.bf16.mxu1 %v45_v13 }
  0x11   :  { %455 = vmatpush3.bf16.msra.mxu0 %v45_v13  ;;  %479 = vmatpush3.bf16.msra.mxu1 %v45_v13 }
  0x14   :  { %457 = vmatmul.mubr.msk.bf16.vlgmr.msra.gmra.mrb[0].mxu0 %vm93_vm0, %v482_v14  ;;  %465 = vmatmul.mubr.msk.bf16.vlgmr.msra.gmra.mrb[0].mxu1 %vm93_vm0, %v483_v15  ;;  %v412_v15 = vunpack.c.h.bf16 %v431_v53 }
  0x15   :  { %460 = vmatprep.mubr.msk.bf16.mxu0 %vm93_vm0, %v484_v16  ;;  %468 = vmatprep.mubr.msk.bf16.mxu1 %vm93_vm0, %v485_v17  ;;  %v428_v16 = vunpack.c.h.bf16 %v435_v54 }
  0x1c   :  { %461 = vmatmul.mubr.msk.bf16.gmra.mrb[4].mxu0 %vm93_vm0, %v486_v18  ;;  %469 = vmatmul.mubr.msk.bf16.gmra.mrb[4].mxu1 %vm93_vm0, %v487_v19 }
  0xe7   :  { %v458_v27 = vpop.f32.mrb[0].mxu0  ;;  %v466_v28 = vpop.f32.mrb[0].mxu1 }
  0xe8   :  { %v161_v32 = vadd.f32 %v458_v27, %v584_v24  ;;  %v193_v33 = vadd.f32 %v466_v28, %v584_v24  ;;  %v152_v34 = vpop.f32.mrb[1].mxu0  ;;  %v184_v35 = vpop.f32.mrb[1].mxu1 }
  0xe9   :  { %v153_v38 = vadd.f32 %v584_v24, %v152_v34  ;;  %v185_v39 = vadd.f32 %v584_v24, %v184_v35  ;;  %v459_v40 = vpop.f32.mrb[2].mxu0  ;;  %v467_v41 = vpop.f32.mrb[2].mxu1 }
  0xea   :  { %v249_v43 = vadd.f32 %v403_v25, %v161_v32  ;;  %v257_v44 = vadd.f32 %v419_v26, %v193_v33  ;;  %v164_v45 = vadd.f32 %v459_v40, %v584_v24  ;;  %v196_v46 = vadd.f32 %v467_v41, %v584_v24  ;;  %v155_v47 = vpop.f32.mrb[3].mxu0  ;;  %v187_v48 = vpop.f32.mrb[3].mxu1 }
  0xeb   :  { %v247_v49 = vadd.f32 %v399_v29, %v153_v38  ;;  %v255_v50 = vadd.f32 %v415_v30, %v185_v39  ;;  %v156_v51 = vadd.f32 %v584_v24, %v155_v47  ;;  %v188_v52 = vadd.f32 %v584_v24, %v187_v48 }
  0xec   :  { %v383_v55 = vpack.c.bf16 %v249_v43, %v249_v43  ;;  %v391_v56 = vpack.c.bf16 %v257_v44, %v257_v44  ;;  %v250_v57 = vadd.f32 %v404_v31, %v164_v45  ;;  %v258_v58 = vadd.f32 %v420_v36, %v196_v46 }
  0xed   :  { %v381_v61 = vpack.c.bf16 %v247_v49, %v247_v49  ;;  %v389_v62 = vpack.c.bf16 %v255_v50, %v255_v50  ;;  %v248_v63 = vadd.f32 %v400_v37, %v156_v51  ;;  %v256_v0 = vadd.f32 %v416_v42, %v188_v52 }
  0xee   :  { %330 = vst.msk [vmem:[%s682_s4 + $0x8] sm:$0xf] %vm327_vm1, %v383_v55  ;;  %338 = vst.msk [vmem:[%s682_s4 + $0x28] sm:$0xf] %vm327_vm1, %v391_v56  ;;  %v384_v1 = vpack.c.bf16 %v250_v57, %v250_v57  ;;  %v392_v2 = vpack.c.bf16 %v258_v58, %v258_v58 }
  0xef   :  { %328 = vst.msk [vmem:[%s682_s4] sm:$0xf] %vm327_vm1, %v381_v61  ;;  %336 = vst.msk [vmem:[%s682_s4 + $0x20] sm:$0xf] %vm327_vm1, %v389_v62  ;;  %v382_v5 = vpack.c.bf16 %v248_v63, %v248_v63  ;;  %v390_v6 = vpack.c.bf16 %v256_v0, %v256_v0  ;;  %v462_v7 = vpop.f32.mrb[4].mxu0  ;;  %v470_v8 = vpop.f32.mrb[4].mxu1 }
  0xf0   :  { %331 = vst.msk [vmem:[%s682_s4 + $0xc] sm:$0xf] %vm327_vm1, %v384_v1  ;;  %339 = vst.msk [vmem:[%s682_s4 + $0x2c] sm:$0xf] %vm327_vm1, %v392_v2  ;;  %v177_v11 = vadd.f32 %v462_v7, %v584_v24  ;;  %v209_v12 = vadd.f32 %v470_v8, %v584_v24  ;;  %v168_v13 = vpop.f32.mrb[5].mxu0  ;;  %v200_v14 = vpop.f32.mrb[5].mxu1 }
  0xf1   :  { %329 = vst.msk [vmem:[%s682_s4 + $0x4] sm:$0xf] %vm327_vm1, %v382_v5  ;;  %337 = vst.msk [vmem:[%s682_s4 + $0x24] sm:$0xf] %vm327_vm1, %v390_v6  ;;  %v169_v17 = vadd.f32 %v584_v24, %v168_v13  ;;  %v201_v18 = vadd.f32 %v584_v24, %v200_v14  ;;  %v463_v19 = vpop.f32.mrb[6].mxu0  ;;  %v471_v20 = vpop.f32.mrb[6].mxu1 }
  0xf2   :  { %v253_v23 = vadd.f32 %v411_v3, %v177_v11  ;;  %v261_v25 = vadd.f32 %v427_v4, %v209_v12  ;;  %v180_v26 = vadd.f32 %v463_v19, %v584_v24  ;;  %v212_v27 = vadd.f32 %v471_v20, %v584_v24  ;;  %v171_v28 = vpop.f32.mrb[7].mxu0  ;;  %v203_v29 = vpop.f32.mrb[7].mxu1 }
  0xf3   :  { %v251_v30 = vadd.f32 %v407_v9, %v169_v17  ;;  %v259_v31 = vadd.f32 %v423_v10, %v201_v18  ;;  %v172_v32 = vadd.f32 %v584_v24, %v171_v28  ;;  %v204_v33 = vadd.f32 %v584_v24, %v203_v29 }
  0xf4   :  { %v387_v34 = vpack.c.bf16 %v253_v23, %v253_v23  ;;  %v395_v35 = vpack.c.bf16 %v261_v25, %v261_v25  ;;  %v254_v36 = vadd.f32 %v412_v15, %v180_v26  ;;  %v262_v37 = vadd.f32 %v428_v16, %v212_v27 }
  0xf5   :  { %v385_v38 = vpack.c.bf16 %v251_v30, %v251_v30  ;;  %v393_v39 = vpack.c.bf16 %v259_v31, %v259_v31  ;;  %v252_v40 = vadd.f32 %v408_v21, %v172_v32  ;;  %v260_v41 = vadd.f32 %v424_v22, %v204_v33 }
  0xf6   :  { %334 = vst.msk [vmem:[%s682_s4 + $0x18] sm:$0xf] %vm327_vm1, %v387_v34  ;;  %342 = vst.msk [vmem:[%s682_s4 + $0x38] sm:$0xf] %vm327_vm1, %v395_v35  ;;  %v388_v42 = vpack.c.bf16 %v254_v36, %v254_v36  ;;  %v396_v24 = vpack.c.bf16 %v262_v37, %v262_v37 }
  0xf7   :  { %332 = vst.msk [vmem:[%s682_s4 + $0x10] sm:$0xf] %vm327_vm1, %v385_v38  ;;  %340 = vst.msk [vmem:[%s682_s4 + $0x30] sm:$0xf] %vm327_vm1, %v393_v39  ;;  %v386_v43 = vpack.c.bf16 %v252_v40, %v252_v40  ;;  %v394_v44 = vpack.c.bf16 %v260_v41, %v260_v41 }
  0xf8   :  { %335 = vst.msk [vmem:[%s682_s4 + $0x1c] sm:$0xf] %vm327_vm1, %v388_v42  ;;  %343 = vst.msk [vmem:[%s682_s4 + $0x3c] sm:$0xf] %vm327_vm1, %v396_v24 }
  0xf9   :  { %333 = vst.msk [vmem:[%s682_s4 + $0x14] sm:$0xf] %vm327_vm1, %v386_v43  ;;  %341 = vst.msk [vmem:[%s682_s4 + $0x34] sm:$0xf] %vm327_vm1, %v394_v44 }

// kernel: cswinir_forward.19
= control target key start
LH: loop header
LB: loop body
LE: loop exit
PB: predicated region body
PF: predicated region fallthrough
CT: control target
= control target key end

     0   :  { %9 = vsyncpa [#allocation4], 0  ;;  %s2473_s0 = inlined_call_operand.vmem [shape: bf16[2,8,8,32], index: 0, kind: input, shape index: {}]   ;;  %s2474_s1 = inlined_call_operand.vmem [shape: f32[9,32,32], index: 1, kind: input, shape index: {}]   ;;  %s2475_s2 = inlined_call_operand.vmem [shape: f32[1,32], index: 2, kind: input, shape index: {}]   ;;  %s2476_s3 = inlined_call_operand.vmem [shape: f32[2,8,8,32], index: 3, kind: input, shape index: {}]   ;;  %s2477_s4 = inlined_call_operand.hbm [shape: f32[2,8,8,32], index: 4, kind: output, shape index: {}]  }
   0x1   :  { %11 = vsyncpa [#allocation4 + $0x1], 0  ;;  %s2069_s15 = smov 0   ;;  %s2071_s16 = smov 0  }
   0x2   :  { %s2073_s17 = smov 0   ;;  %s2075_s18 = smov 0  }
   0x3 LB: > { %s2090_s19 = sadd.s32 4294967295, %s2038_s18   ;;  %s1527_s20 = sadd.s32 4294967294, %s2038_s18   ;;  %s2038_s18 = sphi %s2075_s18, %s2483_s18   ;;  %s2034_s17 = sphi %s2073_s17, %s2482_s17   ;;  %s2030_s16 = sphi %s2071_s16, %s2481_s16   ;;  %s2026_s15 = sphi %s2069_s15, %s2480_s15  }
   0x4   : > { %s2094_s21 = sadd.s32 1, %s2038_s18   ;;  %s118_s22 = sadd.s32 1, %s2034_s17 }
   0x5   : > { %s115_s23 = ssub.s32 %s2038_s18, %s2094_s21  ;;  %p128_p0 = scmp.ne.s32.totalorder %s2034_s17, %s2030_s16 }
   0x6   : > { %p116_p1 = scmp.eq.s32.totalorder %s115_s23, 0  ;;  %p129_p2 = scmp.eq.s32.totalorder %s2090_s19, 1 }
   0x7   : > { %p134_p3 = scmp.ne.s32.totalorder %s2030_s16, %s2026_s15  ;;  %p135_p4 = scmp.eq.s32.totalorder %s1527_s20, 1 }
   0x8   : > { %s2105_s24 = scalar_select %p116_p1, %s2034_s17, %s118_s22  }
   0x9   : > { %p2107_p5 = por %p129_p2, %p128_p0  ;;  %p2111_p6 = por %p135_p4, %p134_p3 }
   0xa   : > { %p1530_p7 = scmp.ge.s32.totalorder %s2038_s18, 1  ;;  %p175_p8 = scmp.lt.s32.totalorder %s2038_s18, 3 }
   0xc   : > { %p176_p9 = pnand %p1530_p7, %p175_p8 }
   0xd   : > { %v1536_v0 = vld [vmem:[%s2474_s1 + $0x20] sm:$0xff] (!%p176_p9)  ;;  %v1537_v1 = vld [vmem:[%s2474_s1 + $0x28] sm:$0xff] (!%p176_p9)  ;;  %p206_p10 = scmp.lt.s32.totalorder (!%p176_p9), %s2090_s19, 1  ;;  %vm217_vm0 = vcmask (!%p176_p9), 261120   ;;  %v1538_v5 = vld [vmem:[%s2474_s1 + $0x30] sm:$0xff] (!%p176_p9)  ;;  %v2040_v7 = vmov (!%p176_p9), 0.0  }
   0xe   : > { %179 = sbr.rel (%p176_p9) target bundleno = 343 (0x157), region = 36  ;;  %v1580_v2 = vld [vmem:[%s2474_s1 + $0x80] sm:$0xff] (!%p176_p9)  ;;  %v307_v3 = vpack.c.bf16 (!%p176_p9), %v1537_v1, %v1536_v0  ;;  %v1581_v4 = vld [vmem:[%s2474_s1 + $0x88] sm:$0xff] (!%p176_p9)  ;;  %v1539_v6 = vld [vmem:[%s2474_s1 + $0x38] sm:$0xff] (!%p176_p9)  ;;  %218 = vst.msk [vmem:[#allocation2] sm:$0xff] (!%p176_p9), %vm217_vm0, %v2040_v7  ;;  %vm219_vm1 = vcmask (!%p176_p9), 254976  }
   0xf   : > { %221 = vst.msk [vmem:[#allocation2 + $0x10] sm:$0xff] (!%p176_p9), %vm217_vm0, %v2040_v7  ;;  %223 = vst.msk [vmem:[#allocation2 + $0x20] sm:$0xff] (!%p176_p9), %vm217_vm0, %v2040_v7  ;;  %v2146_v8 = vpack.c.bf16 (!%p176_p9), %v1581_v4, %v1580_v2  ;;  %v308_v9 = vpack.c.bf16 (!%p176_p9), %v1539_v6, %v1538_v5  ;;  %v1582_v10 = vld [vmem:[%s2474_s1 + $0x90] sm:$0xff] (!%p176_p9)  ;;  %v1583_v11 = vld [vmem:[%s2474_s1 + $0x98] sm:$0xff] (!%p176_p9)  ;;  %s203_s14 = sand.u32 (!%p176_p9), 1, %s2030_s16   ;;  %s1684_s5 = sshll.u32 (!%p176_p9), %s2090_s19, 10 }
  0x10   : > { %225 = vst.msk [vmem:[#allocation2 + $0x30] sm:$0xff] (!%p176_p9), %vm217_vm0, %v2040_v7  ;;  %227 = vst.msk [vmem:[#allocation2 + $0x40] sm:$0xff] (!%p176_p9), %vm217_vm0, %v2040_v7  ;;  %v280_v12 = vld [vmem:[%s2474_s1] sm:$0xff] (!%p176_p9)  ;;  %1758 = vmatprep.subr.bf16.mxu1 (!%p176_p9), %v307_v3  ;;  %v2172_v13 = vpack.c.bf16 (!%p176_p9), %v1583_v11, %v1582_v10  ;;  %v281_v14 = vld [vmem:[%s2474_s1 + $0x8] sm:$0xff] (!%p176_p9)  ;;  %s1531_s30 = sshll.u32 (!%p176_p9), %s203_s14, 6  ;;  %s2041_s11 = smov (!%p176_p9), [#allocation3]  }
  0x11   : > { %229 = vst.msk [vmem:[#allocation2 + $0x50] sm:$0xff] (!%p176_p9), %vm217_vm0, %v2040_v7  ;;  %231 = vst.msk [vmem:[#allocation2 + $0x60] sm:$0xff] (!%p176_p9), %vm217_vm0, %v2040_v7  ;;  %v1592_v15 = vld [vmem:[%s2474_s1 + $0xa0] sm:$0xff] (!%p176_p9)  ;;  %v1593_v16 = vld [vmem:[%s2474_s1 + $0xa8] sm:$0xff] (!%p176_p9)  ;;  %1806 = vmatprep.subr.bf16.mxu0 (!%p176_p9), %v2146_v8  ;;  %1759 = vmatpush3.bf16.msra.mxu1 (!%p176_p9), %v307_v3  ;;  %v284_v17 = vpack.c.bf16 (!%p176_p9), %v281_v14, %v280_v12 }
  0x12   : > { %233 = vst.msk [vmem:[#allocation2 + $0x70] sm:$0xff] (!%p176_p9), %vm217_vm0, %v2040_v7  ;;  %235 = vst.msk [vmem:[#allocation2 + $0x80] sm:$0xff] (!%p176_p9), %vm217_vm0, %v2040_v7  ;;  %1807 = vmatpush3.bf16.msra.mxu0 (!%p176_p9), %v2146_v8  ;;  %1760 = vmatprep.subr.bf16.mxu1 (!%p176_p9), %v308_v9  ;;  %v908_v19 = vpack.c.bf16 (!%p176_p9), %v1593_v16, %v1592_v15  ;;  %v1594_v32 = vld [vmem:[%s2474_s1 + $0xb0] sm:$0xff] (!%p176_p9)  ;;  %v1595_v33 = vld [vmem:[%s2474_s1 + $0xb8] sm:$0xff] (!%p176_p9) }
  0x13   : > { %237 = vst.msk [vmem:[#allocation2 + $0x90] sm:$0xff] (!%p176_p9), %vm217_vm0, %v2040_v7  ;;  %1808 = vmatprep.subr.bf16.mxu0 (!%p176_p9), %v2172_v13  ;;  %v282_v34 = vld [vmem:[%s2474_s1 + $0x10] sm:$0xff] (!%p176_p9)  ;;  %v283_v35 = vld [vmem:[%s2474_s1 + $0x18] sm:$0xff] (!%p176_p9)  ;;  %v909_v45 = vpack.c.bf16 (!%p176_p9), %v1595_v33, %v1594_v32  ;;  %v1604_v49 = vld [vmem:[%s2474_s1 + $0xc0] sm:$0xff] (!%p176_p9) }
  0x14   : > { %220 = vst.msk [vmem:[#allocation2 + $0x8] sm:$0x3] (!%p176_p9), %vm219_vm1, %v2040_v7  ;;  %222 = vst.msk [vmem:[#allocation2 + $0x18] sm:$0x3] (!%p176_p9), %vm219_vm1, %v2040_v7  ;;  %v285_v50 = vpack.c.bf16 (!%p176_p9), %v283_v35, %v282_v34  ;;  %v1605_v52 = vld [vmem:[%s2474_s1 + $0xc8] sm:$0xff] (!%p176_p9)  ;;  %v1556_v53 = vld [vmem:[%s2474_s1 + $0x40] sm:$0xff] (!%p176_p9) }
  0x15   : > { %s2157_s23 = scalar_select %p206_p10, %s2090_s19, 1  ;;  %224 = vst.msk [vmem:[#allocation2 + $0x28] sm:$0x3] %vm219_vm1, %v2040_v7  ;;  %226 = vst.msk [vmem:[#allocation2 + $0x38] sm:$0x3] %vm219_vm1, %v2040_v7  ;;  %1761 = vmatpush3.bf16.msra.mxu1 %v308_v9  ;;  %v1557_v54 = vld [vmem:[%s2474_s1 + $0x48] sm:$0xff]  ;;  %v1037_v57 = vpack.c.bf16 %v1605_v52, %v1604_v49 }
  0x16   : > { %228 = vst.msk [vmem:[#allocation2 + $0x48] sm:$0x3] %vm219_vm1, %v2040_v7  ;;  %230 = vst.msk [vmem:[#allocation2 + $0x58] sm:$0x3] %vm219_vm1, %v2040_v7  ;;  %1809 = vmatpush3.bf16.msra.mxu0 %v2172_v13  ;;  %1770 = vmatprep.subr.bf16.mxu1 %v284_v17  ;;  %v264_v58 = vld [vmem:[#allocation2] sm:$0xff]  ;;  %v524_v60 = vpack.c.bf16 %v1557_v54, %v1556_v53  ;;  %v1606_v3 = vld [vmem:[%s2474_s1 + $0xd0] sm:$0xff] }
  0x17   : > { %232 = vst.msk [vmem:[#allocation2 + $0x68] sm:$0x3] %vm219_vm1, %v2040_v7  ;;  %234 = vst.msk [vmem:[#allocation2 + $0x78] sm:$0x3] %vm219_vm1, %v2040_v7  ;;  %s1646_s9 = sshll.u32 %s2157_s23, 5  ;;  %1818 = vmatprep.subr.bf16.mxu0 %v908_v19  ;;  %v1607_v4 = vld [vmem:[%s2474_s1 + $0xd8] sm:$0xff] }
  0x18   : > { %236 = vst.msk [vmem:[#allocation2 + $0x88] sm:$0x3] %vm219_vm1, %v2040_v7  ;;  %238 = vst.msk [vmem:[#allocation2 + $0x98] sm:$0x3] %vm219_vm1, %v2040_v7  ;;  %s210_s12 = scalar_lea.vmem %s2473_s0, %s1646_s9  ;;  %v1038_v10 = vpack.c.bf16 %v1607_v4, %v1606_v3  ;;  %v1558_v11 = vld [vmem:[%s2474_s1 + $0x50] sm:$0xff]  ;;  %v1559_v15 = vld [vmem:[%s2474_s1 + $0x58] sm:$0xff]  ;;  %s2420_s9 = scalar_lea.hbm %s2477_s4, %s1684_s5 }
  0x19   : > { %v1686_v18 = vld [vmem:[%s210_s12] sm:$0xff]   ;;  %v1701_v20 = vld [vmem:[%s210_s12 + $0x8] sm:$0xff]   ;;  %v1702_v21 = vld [vmem:[%s210_s12 + $0x10] sm:$0xff]   ;;  %s1647_s13 = sshll.u32 %s2157_s23, 6  ;;  %s2399_s23 = scalar_lea.vmem [#allocation3], %s1531_s30 }
  0x1a   : > { %v1687_v22 = vunpack.c.l.bf16 %v1686_v18  ;;  %v1688_v23 = vunpack.c.h.bf16 %v1686_v18  ;;  %v1691_v24 = vunpack.c.l.bf16 %v1701_v20  ;;  %v1692_v25 = vunpack.c.h.bf16 %v1701_v20  ;;  %v1703_v26 = vld [vmem:[%s210_s12 + $0x18] sm:$0xff]   ;;  %v1617_v18 = vld [vmem:[%s2474_s1 + $0xe8] sm:$0xff]  ;;  %v1618_v33 = vld [vmem:[%s2474_s1 + $0xf0] sm:$0xff]  ;;  %s2388_s27 = scalar_lea.vmem %s2476_s3, %s1647_s13  ;;  %s1453_s6 = sshll.u32 %s2399_s23, 4  ;;  %s2422_s6 = int_to_ptr.vmem [resolvable:$true] %s1453_s6 }
  0x1b   : > { %v1695_v27 = vunpack.c.l.bf16 %v1702_v21  ;;  %v1696_v28 = vunpack.c.h.bf16 %v1702_v21  ;;  %v1699_v29 = vunpack.c.l.bf16 %v1703_v26  ;;  %v1700_v30 = vunpack.c.h.bf16 %v1703_v26  ;;  %v286_v31 = vld [vmem:[#allocation2 + $0x1] sm:$0xff]  ;;  %v1619_v34 = vld [vmem:[%s2474_s1 + $0xf8] sm:$0xff]  ;;  %v1630_v52 = vld [vmem:[%s2474_s1 + $0x110] sm:$0xff]  ;;  %s2432_s19 = scalar_lea.sflag [#allocation4], %s203_s14  ;;  %s1976_s10 = scalar_lea.vmem %s2422_s6, 1024 }
  0x1c   : > { %256 = vst.msk [vmem:[#allocation2 + $0x11] sm:$0xff] %vm217_vm0, %v1687_v22  ;;  %257 = vst.msk [vmem:[#allocation2 + $0x21] sm:$0xff] %vm217_vm0, %v1688_v23  ;;  %v525_v22 = vpack.c.bf16 %v1559_v15, %v1558_v11  ;;  %v1166_v35 = vpack.c.bf16 %v1619_v34, %v1618_v33  ;;  %v1631_v53 = vld [vmem:[%s2474_s1 + $0x118] sm:$0xff]  ;;  %v1417_v4 = vld [vmem:[%s2388_s27 + $0x10] sm:$0xff]  ;;  %p1977_p11 = scmp.ne.s32.totalorder %s2422_s6, %s1976_s10  ;;  %s1980_s12 = sshll.u32 %s2041_s11, 4  ;;  %s1981_s12 = int_to_ptr.vmem [resolvable:$false] %s1980_s12 }
  0x1d   : > { %258 = vst.msk [vmem:[#allocation2 + $0x31] sm:$0xff] %vm217_vm0, %v1691_v24  ;;  %259 = vst.msk [vmem:[#allocation2 + $0x41] sm:$0xff] %vm217_vm0, %v1692_v25  ;;  %v1568_v24 = vld [vmem:[%s2474_s1 + $0x60] sm:$0xff]  ;;  %v1569_v25 = vld [vmem:[%s2474_s1 + $0x68] sm:$0xff]  ;;  %v1294_v54 = vpack.c.bf16 %v1631_v53, %v1630_v52  ;;  %s1982_s13 = scalar_lea.vmem %s1981_s12, 2048  ;;  %p1983_p0 = scmp.lt.s32.totalorder %s2422_s6, %s1981_s12 }
  0x1e   : > { %260 = vst.msk [vmem:[#allocation2 + $0x51] sm:$0xff] %vm217_vm0, %v1695_v27  ;;  %261 = vst.msk [vmem:[#allocation2 + $0x61] sm:$0xff] %vm217_vm0, %v1696_v28  ;;  %v1419_v33 = vld [vmem:[%s2388_s27 + $0x20] sm:$0xff]  ;;  %p1978_p12 = pnand %p1977_p11, %p2107_p5  ;;  %p1984_p1 = scmp.lt.s32.totalorder %s1982_s13, %s1976_s10 }
  0x1f   : > { %262 = vst.msk [vmem:[#allocation2 + $0x71] sm:$0xff] %vm217_vm0, %v1699_v29  ;;  %263 = vst.msk [vmem:[#allocation2 + $0x81] sm:$0xff] %vm217_vm0, %v1700_v30  ;;  %v503_v29 = vld [vmem:[#allocation2 + $0x2] sm:$0xff]  ;;  %v652_v30 = vpack.c.bf16 %v1569_v25, %v1568_v24 }
  0x20   : > { %p1979_p13 = pneg %p1978_p12  ;;  %p1985_p2 = por %p1984_p1, %p1983_p0 }
  0x22   : > { %p1986_p3 = pnand %p1985_p2, %p1979_p13 }
  0x23   : > { %v287_v36 = vld [vmem:[#allocation2 + $0x11] sm:$0xff]  ;;  %v760_v37 = vld [vmem:[#allocation2 + $0x21] sm:$0xff] }
  0x24   : > { %v289_v38 = vld [vmem:[#allocation2 + $0x31] sm:$0xff]  ;;  %v1648_v39 = vpack.c.bf16 %v287_v36, %v286_v31  ;;  %v1664_v40 = vpack.c.bf16 %v760_v37, %v287_v36  ;;  %v762_v42 = vld [vmem:[#allocation2 + $0x41] sm:$0xff] }
  0x25   : > { %v2211_v41 = vpack.c.bf16 %v289_v38, %v760_v37  ;;  %v2213_v43 = vld [vmem:[#allocation2 + $0x51] sm:$0xff]  ;;  %v1665_v44 = vpack.c.bf16 %v762_v42, %v289_v38  ;;  %v2220_v48 = vld [vmem:[#allocation2 + $0x22] sm:$0xff] }
  0x26   : > { %v2216_v46 = vpack.c.bf16 %v2213_v43, %v762_v42  ;;  %v2218_v47 = vld [vmem:[#allocation2 + $0x12] sm:$0xff]  ;;  %1762 = vmatprep.mubr.msk.bf16.mxu1 %vm217_vm0, %v1648_v39  ;;  %1810 = vmatprep.mubr.msk.bf16.mxu0 %vm217_vm0, %v1664_v40  ;;  %v2241_v55 = vld [vmem:[#allocation2 + $0x61] sm:$0xff] }
  0x27   : > { %v1668_v51 = vpack.c.bf16 %v2220_v48, %v2218_v47  ;;  %1763 = vmatmul.mubr.msk.bf16.vlgmr.msra.gmra.mrb[0].mxu1 %vm217_vm0, %v2211_v41  ;;  %1811 = vmatmul.mubr.msk.bf16.vlgmr.msra.gmra.mrb[0].mxu0 %vm217_vm0, %v1665_v44  ;;  %v2243_v56 = vld [vmem:[#allocation2 + $0x71] sm:$0xff]  ;;  %v2254_v63 = vld [vmem:[#allocation2 + $0x42] sm:$0xff]  ;;  %v1656_v32 = vpack.c.bf16 %v2218_v47, %v503_v29 }
  0x28   : > { %1771 = vmatpush3.bf16.msra.mxu1 %v284_v17  ;;  %1819 = vmatpush3.bf16.msra.mxu0 %v908_v19  ;;  %v2247_v59 = vld [vmem:[#allocation2 + $0x10] sm:$0xff]  ;;  %v2252_v61 = vpack.c.bf16 %v2243_v56, %v2241_v55  ;;  %v2257_v2 = vld [vmem:[#allocation2 + $0x62] sm:$0xff]  ;;  %v1571_v37 = vld [vmem:[%s2474_s1 + $0x78] sm:$0xff] }
  0x29   : > { %1820 = vmatprep.subr.bf16.mxu0 %v909_v45  ;;  %1766 = vmatprep.mubr.msk.bf16.mxu1 %vm217_vm0, %v2216_v46  ;;  %v889_v62 = vld [vmem:[#allocation2 + $0x32] sm:$0xff]  ;;  %v1652_v0 = vpack.c.bf16 %v2247_v59, %v264_v58  ;;  %v2269_v6 = vld [vmem:[#allocation2 + $0x20] sm:$0xff]  ;;  %v1629_v40 = vld [vmem:[%s2474_s1 + $0x108] sm:$0xff] }
  0x2a   : > { %1772 = vmatprep.subr.bf16.mxu1 %v285_v50  ;;  %1822 = vmatprep.mubr.msk.bf16.mxu0 %vm217_vm0, %v1668_v51  ;;  %v891_v1 = vld [vmem:[#allocation2 + $0x52] sm:$0xff]  ;;  %v1669_v5 = vpack.c.bf16 %v2254_v63, %v889_v62  ;;  %v2277_v12 = vld [vmem:[#allocation2 + $0x40] sm:$0xff]  ;;  %v1657_v38 = vpack.c.bf16 %v889_v62, %v2220_v48  ;;  %v1660_v51 = vpack.c.bf16 %v2269_v6, %v2247_v59 }
  0x2b   : > { %v2271_v7 = vld [vmem:[#allocation2 + $0x30] sm:$0xff]  ;;  %v1670_v9 = vpack.c.bf16 %v2257_v2, %v891_v1  ;;  %v1616_v17 = vld [vmem:[%s2474_s1 + $0xe0] sm:$0xff] }
  0x2c   : > { %1821 = vmatpush3.bf16.msra.mxu0 %v909_v45  ;;  %1773 = vmatpush3.bf16.msra.mxu1 %v285_v50  ;;  %v2279_v14 = vld [vmem:[#allocation2 + $0x50] sm:$0xff]  ;;  %v1653_v16 = vpack.c.bf16 %v2271_v7, %v2269_v6  ;;  %v2294_v20 = vld [vmem:[#allocation2 + $0x82] sm:$0xff]  ;;  %v1165_v23 = vpack.c.bf16 %v1617_v18, %v1616_v17  ;;  %v1658_v45 = vpack.c.bf16 %v891_v1, %v2254_v63  ;;  %v1640_v1 = vld [vmem:[%s2475_s2] ss:$0 sm:$0xff] }
  0x2d   : > { %1830 = vmatprep.subr.bf16.mxu0 %v1037_v57  ;;  %1782 = vmatprep.subr.bf16.mxu1 %v524_v60  ;;  %v893_v19 = vld [vmem:[#allocation2 + $0x72] sm:$0xff]  ;;  %v1654_v21 = vpack.c.bf16 %v2279_v14, %v2277_v12  ;;  %v2306_v27 = vld [vmem:[#allocation2 + $0x60] sm:$0xff]  ;;  %v1416_v18 = vld [vmem:[%s2388_s27 + $0x8] sm:$0xff] }
  0x2e   : > { %v1671_v26 = vpack.c.bf16 %v2294_v20, %v893_v19  ;;  %v2308_v28 = vld [vmem:[#allocation2 + $0x70] sm:$0xff]  ;;  %v1628_v39 = vld [vmem:[%s2474_s1 + $0x100] sm:$0xff]  ;;  %v1659_v50 = vpack.c.bf16 %v893_v19, %v2257_v2  ;;  %v1662_v59 = vpack.c.bf16 %v2306_v27, %v2279_v14  ;;  %v1418_v14 = vld [vmem:[%s2388_s27 + $0x18] sm:$0xff] }
  0x2f   : > { %1767 = vmatmul.mubr.msk.bf16.gmra.mrb[4].mxu1 %vm217_vm0, %v2252_v61  ;;  %v1655_v31 = vpack.c.bf16 %v2308_v28, %v2306_v27  ;;  %v1570_v36 = vld [vmem:[%s2474_s1 + $0x70] sm:$0xff]  ;;  %v1022_v42 = vld [vmem:[#allocation2 + $0x80] sm:$0xff]  ;;  %v1293_v49 = vpack.c.bf16 %v1629_v40, %v1628_v39 }
  0x30   : > { %1774 = vmatprep.mubr.msk.bf16.mxu1 %vm217_vm0, %v1652_v0  ;;  %v1023_v44 = vld [vmem:[#allocation2 + $0x90] sm:$0xff]  ;;  %v653_v47 = vpack.c.bf16 %v1571_v37, %v1570_v36 }
  0x31   : > { %v1675_v48 = vpack.c.bf16 %v1023_v44, %v1022_v42  ;;  %v1151_v58 = vld [vmem:[#allocation2 + $0x91] sm:$0xff]  ;;  %v1420_v44 = vld [vmem:[%s2388_s27 + $0x28] sm:$0xff] }
  0x33   : > { %1823 = vmatmul.mubr.msk.bf16.vlgmr.msra.gmra.mrb[0].mxu0 %vm217_vm0, %v1669_v5 }
  0x34   : > { %1831 = vmatpush3.bf16.msra.mxu0 %v1037_v57  ;;  %1826 = vmatprep.mubr.msk.bf16.mxu0 %vm217_vm0, %v1670_v9  ;;  %v1150_v57 = vld [vmem:[#allocation2 + $0x81] sm:$0xff] }
  0x35   : > { %1832 = vmatprep.subr.bf16.mxu0 %v1038_v10  ;;  %v1667_v62 = vpack.c.bf16 %v1150_v57, %v2243_v56  ;;  %v1415_v9 = vld [vmem:[%s2388_s27] sm:$0xff] }
  0x37   : > { %1775 = vmatmul.mubr.msk.bf16.vlgmr.msra.gmra.mrb[0].mxu1 %vm217_vm0, %v1653_v16 }
  0x38   : > { %1783 = vmatpush3.bf16.msra.mxu1 %v524_v60  ;;  %1833 = vmatpush3.bf16.msra.mxu0 %v1038_v10  ;;  %v1679_v60 = vpack.c.bf16 %v1151_v58, %v1150_v57 }
  0x39   : > { %1778 = vmatprep.mubr.msk.bf16.mxu1 %vm217_vm0, %v1654_v21  ;;  %1784 = vmatprep.subr.bf16.mxu1 %v525_v22 }
  0x3a   : > { %1842 = vmatprep.subr.bf16.mxu0 %v1165_v23 }
  0x3b   : > { %1827 = vmatmul.mubr.msk.bf16.gmra.mrb[4].mxu0 %vm217_vm0, %v1671_v26 }
  0x3c   : > { %1785 = vmatpush3.bf16.msra.mxu1 %v525_v22  ;;  %1834 = vmatprep.mubr.msk.bf16.mxu0 %vm217_vm0, %v1653_v16 }
  0x3d   : > { %1794 = vmatprep.subr.bf16.mxu1 %v652_v30 }
  0x3f   : > { %1779 = vmatmul.mubr.msk.bf16.gmra.mrb[4].mxu1 %vm217_vm0, %v1655_v31 }
  0x40   : > { %1786 = vmatprep.mubr.msk.bf16.mxu1 %vm217_vm0, %v1656_v32 }
  0x43   : > { %1835 = vmatmul.mubr.msk.bf16.vlgmr.msra.gmra.mrb[0].mxu0 %vm217_vm0, %v1654_v21 }
  0x44   : > { %1843 = vmatpush3.bf16.msra.mxu0 %v1165_v23  ;;  %1838 = vmatprep.mubr.msk.bf16.mxu0 %vm217_vm0, %v1655_v31 }
  0x45   : > { %1844 = vmatprep.subr.bf16.mxu0 %v1166_v35 }
  0x47   : > { %1787 = vmatmul.mubr.msk.bf16.vlgmr.msra.gmra.mrb[0].mxu1 %vm217_vm0, %v1657_v38 }
  0x48   : > { %1795 = vmatpush3.bf16.msra.mxu1 %v652_v30  ;;  %1845 = vmatpush3.bf16.msra.mxu0 %v1166_v35 }
  0x49   : > { %1790 = vmatprep.mubr.msk.bf16.mxu1 %vm217_vm0, %v1658_v45  ;;  %1796 = vmatprep.subr.bf16.mxu1 %v653_v47 }
  0x4a   : > { %1854 = vmatprep.subr.bf16.mxu0 %v1293_v49 }
  0x4b   : > { %1839 = vmatmul.mubr.msk.bf16.gmra.mrb[4].mxu0 %vm217_vm0, %v1675_v48 }
  0x4c   : > { %1797 = vmatpush3.bf16.msra.mxu1 %v653_v47  ;;  %1846 = vmatprep.mubr.msk.bf16.mxu0 %vm217_vm0, %v2211_v41  ;;  %v1661_v41 = vpack.c.bf16 %v2277_v12, %v2271_v7 }
  0x4d   : > { %1866 = vmatprep.subr.bf16.mxu1 %v2146_v8 }
  0x4f   : > { %1791 = vmatmul.mubr.msk.bf16.gmra.mrb[4].mxu1 %vm217_vm0, %v1659_v50 }
  0x50   : > { %1798 = vmatprep.mubr.msk.bf16.mxu1 %vm217_vm0, %v1660_v51 }
  0x53   : > { %1847 = vmatmul.mubr.msk.bf16.vlgmr.msra.gmra.mrb[0].mxu0 %vm217_vm0, %v2216_v46  ;;  %v1663_v46 = vpack.c.bf16 %v1022_v42, %v2308_v28  ;;  %v1421_v28 = vld [vmem:[%s2388_s27 + $0x30] sm:$0xff] }
  0x54   : > { %1855 = vmatpush3.bf16.msra.mxu0 %v1293_v49  ;;  %1850 = vmatprep.mubr.msk.bf16.mxu0 %vm217_vm0, %v2252_v61  ;;  %v1666_v61 = vpack.c.bf16 %v2241_v55, %v2213_v43 }
  0x55   : > { %1856 = vmatprep.subr.bf16.mxu0 %v1294_v54 }
  0x57   : > { %1799 = vmatmul.mubr.msk.bf16.vlgmr.msra.gmra.mrb[0].mxu1 %vm217_vm0, %v1661_v41 }
  0x58   : > { %1868 = vmatpush3.bf16.msra.mxu1 %v2146_v8  ;;  %1857 = vmatpush3.bf16.msra.mxu0 %v1294_v54  ;;  %v1279_v8 = vld [vmem:[#allocation2 + $0x92] sm:$0xff] }
  0x59   : > { %1802 = vmatprep.mubr.msk.bf16.mxu1 %vm217_vm0, %v1662_v59  ;;  %1867 = vmatprep.subr.bf16.mxu1 %v2172_v13 }
  0x5b   : > { %1851 = vmatmul.mubr.msk.bf16.gmra.mrb[4].mxu0 %vm217_vm0, %v1679_v60 }
  0x5c   : > { %1869 = vmatpush3.bf16.msra.mxu1 %v2172_v13  ;;  %1858 = vmatprep.mubr.msk.bf16.mxu0 %vm217_vm0, %v1657_v38  ;;  %v1683_v13 = vpack.c.bf16 %v1279_v8, %v2294_v20  ;;  %v1422_v38 = vld [vmem:[%s2388_s27 + $0x38] sm:$0xff] }
  0x5f   : > { %1803 = vmatmul.mubr.msk.bf16.gmra.mrb[4].mxu1 %vm217_vm0, %v1663_v46 }
  0x60   : > { %1814 = vmatprep.mubr.msk.bf16.mxu1 %vm217_vm0, %v1666_v61 }
  0x63   : > { %1859 = vmatmul.mubr.msk.bf16.vlgmr.msra.gmra.mrb[0].mxu0 %vm217_vm0, %v1658_v45 }
  0x64   : > { %1862 = vmatprep.mubr.msk.bf16.mxu0 %vm217_vm0, %v1659_v50 }
  0x6b   : > { %1815 = vmatmul.mubr.msk.bf16.vlgmr.msra.gmra.mrb[4].mxu1 %vm217_vm0, %v1667_v62  ;;  %1863 = vmatmul.mubr.msk.bf16.gmra.mrb[4].mxu0 %vm217_vm0, %v1683_v13 }
 0x12a   : > { %v1800_v63 = vpop.f32.mrb[0].mxu1 }
 0x12b   : > { %v720_v43 = vpop.f32.mrb[1].mxu1 }
 0x12c   : > { %v1801_v55 = vpop.f32.mrb[2].mxu1 }
 0x12d   : > { %v723_v0 = vpop.f32.mrb[3].mxu1 }
 0x136   : > { %v1860_v56 = vpop.f32.mrb[0].mxu0 }
 0x137   : > { %v1870_v2 = vadd.f32 %v1860_v56, %v1800_v63  ;;  %v1361_v3 = vpop.f32.mrb[1].mxu0 }
 0x138   : > { %v1871_v5 = vadd.f32 %v1361_v3, %v720_v43  ;;  %v1861_v6 = vpop.f32.mrb[2].mxu0 }
 0x139   : > { %v1409_v7 = vadd.f32 %v1870_v2, %v1640_v1  ;;  %v1872_v10 = vadd.f32 %v1861_v6, %v1801_v55  ;;  %v1364_v11 = vpop.f32.mrb[3].mxu0 }
 0x13a   : > { %v1407_v12 = vadd.f32 %v1871_v5, %v1640_v1  ;;  %v1873_v15 = vadd.f32 %v1364_v11, %v723_v0 }
 0x13b   : > { %v1425_v16 = vadd.f32 %v1417_v4, %v1409_v7  ;;  %v1410_v17 = vadd.f32 %v1872_v10, %v1640_v1 }
 0x13c   : > { %v1423_v19 = vadd.f32 %v1415_v9, %v1407_v12  ;;  %v1408_v20 = vadd.f32 %v1873_v15, %v1640_v1 }
 0x13d   : > { %1433 = vst.msk [vmem:[%s2399_s23 + $0x10] sm:$0xff] %vm217_vm0, %v1425_v16  ;;  %v1426_v21 = vadd.f32 %v1418_v14, %v1410_v17 }
 0x13e   : > { %1431 = vst.msk [vmem:[%s2399_s23] sm:$0xff] %vm217_vm0, %v1423_v19  ;;  %v1424_v22 = vadd.f32 %v1416_v18, %v1408_v20  ;;  %v1816_v23 = vpop.f32.mrb[4].mxu1  ;;  %v1864_v24 = vpop.f32.mrb[4].mxu0 }
 0x13f   : > { %1434 = vst.msk [vmem:[%s2399_s23 + $0x18] sm:$0xff] %vm217_vm0, %v1426_v21  ;;  %v1874_v25 = vadd.f32 %v1864_v24, %v1816_v23  ;;  %v864_v26 = vpop.f32.mrb[5].mxu1  ;;  %v1377_v27 = vpop.f32.mrb[5].mxu0 }
 0x140   : > { %1432 = vst.msk [vmem:[%s2399_s23 + $0x8] sm:$0xff] %vm217_vm0, %v1424_v22  ;;  %v1875_v29 = vadd.f32 %v1377_v27, %v864_v26  ;;  %v1817_v30 = vpop.f32.mrb[6].mxu1  ;;  %v1865_v31 = vpop.f32.mrb[6].mxu0 }
 0x141   : > { %v1413_v32 = vadd.f32 %v1874_v25, %v1640_v1  ;;  %v1876_v34 = vadd.f32 %v1865_v31, %v1817_v30  ;;  %v867_v35 = vpop.f32.mrb[7].mxu1  ;;  %v1380_v36 = vpop.f32.mrb[7].mxu0 }
 0x142   : > { %v1411_v37 = vadd.f32 %v1875_v29, %v1640_v1  ;;  %v1877_v39 = vadd.f32 %v1380_v36, %v867_v35 }
 0x143   : > { %v1429_v40 = vadd.f32 %v1421_v28, %v1413_v32  ;;  %v1414_v42 = vadd.f32 %v1876_v34, %v1640_v1 }
 0x144   : > { %v1427_v45 = vadd.f32 %v1419_v33, %v1411_v37  ;;  %v1412_v47 = vadd.f32 %v1877_v39, %v1640_v1 }
 0x145   : > { %1437 = vst.msk [vmem:[%s2399_s23 + $0x30] sm:$0xff] %vm217_vm0, %v1429_v40  ;;  %v1430_v49 = vadd.f32 %v1422_v38, %v1414_v42 }
 0x146   : > { %1435 = vst.msk [vmem:[%s2399_s23 + $0x20] sm:$0xff] %vm217_vm0, %v1427_v45  ;;  %v1428_v48 = vadd.f32 %v1420_v44, %v1412_v47 }
 0x147   : > { %1438 = vst.msk [vmem:[%s2399_s23 + $0x38] sm:$0xff] %vm217_vm0, %v1430_v49 }
 0x148   : > { %1436 = vst.msk [vmem:[%s2399_s23 + $0x28] sm:$0xff] %vm217_vm0, %v1428_v48 }
 0x149   : > { %1989 = shalt.err (!%p1986_p3)
}
 0x14a   : > { %s1990_s14 = scalar_lea.hbm %s2420_s9, 1024  ;;  %s1994_s27 = scalar_lea.hbm %s2477_s4, 2048 }
 0x14b   : > { %p1991_p4 = scmp.ne.s32.totalorder %s2420_s9, %s1990_s14  ;;  %p1995_p9 = scmp.lt.u32.totalorder %s2420_s9, %s2477_s4 }
 0x14c   : > { %p1996_p10 = scmp.lt.u32.totalorder %s1994_s27, %s1990_s14  ;;  %p1998_p12 = scmp.lt.u32.totalorder %s1990_s14, %s2420_s9 }
 0x14d   : > { %p1992_p7 = pnand %p1991_p4, %p2107_p5 }
 0x14e   : > { %p1997_p11 = por %p1996_p10, %p1995_p9 }
 0x14f   : > { %p1993_p8 = pneg %p1992_p7 }
 0x150   : > { %p1999_p13 = por %p1998_p12, %p1997_p11 }
 0x152   : > { %p2000_p0 = pnand %p1999_p13, %p1993_p8 }
 0x154   : > { %2003 = shalt.err (!%p2000_p0)
}
 0x155   : > { %s2042_s30 = smov 128   ;;  %s2043_s23 = smov 8  }
 0x156   : > { %1934 = dma.vmem_to_hbm [thread:$0]  (%p2107_p5), %s2422_s6, 1024, %s2420_s9, %s2432_s19, %s2042_s30, %s2042_s30, %s2043_s23  }
 0x157 PF: > { %p1940_p1 = scmp.ge.s32.totalorder %s2038_s18, 2  ;;  %s1468_s5 = sand.u32 1, %s2026_s15  }
 0x158   : > { %s1469_s7 = scalar_lea.sflag [#allocation4], %s1468_s5 }
 0x159   : > { %p1937_p2 = pnand %p1940_p1, %p2111_p6 }
 0x15b   : > { %2021 = dma.done.wait (!%p1937_p2), %s1469_s7, 1024  }
 0x15c   : > { %2023 = vsyncadd (!%p1937_p2), %s1469_s7, 4294966272  ;;  %p14_p3 = scmp.ge.s32.totalorder %s2094_s21, 4   ;;  %s2480_s15 = smov %s2030_s16 }
 0x15d   : > { %s2481_s16 = smov %s2034_s17  ;;  %s2482_s17 = smov %s2105_s24 }
 0x15e   : > { %s2483_s18 = smov %s2094_s21  ;;  %16 = sbr.rel (!%p14_p3) target bundleno = 3 (0x3), region = 84 }
 0x165   :  { %1474 = vsyncpa [#allocation4], 1 }
 0x166   :  { %1476 = vsyncpa [#allocation4 + $0x1], 1 }

</bundles_post_ra>
